<compile_context>
chip_gen: v7x
topology: tpu7x:2x2x1
jax: 0.10.0
libtpu: 0.0.40
codegen_flags: <defaults>
</compile_context>

<pallas_src>
import functools

import jax
import jax.numpy as jnp
from jax.experimental import pallas as pl
from jax.experimental.pallas import tpu as pltpu

LANE = 128


def bottleneck_kernel(x_ref, w1_ref, w2_ref, w3_ref, b1_ref, b2_ref, b3_ref,
                      o_ref, buf_ref, *, Wp, W, LHW, E0):
    """One batch element: x_ref (1, LHW, Cin) f32 -> o_ref (1, LHW, Cout) f32."""
    C = buf_ref.shape[-1]          # lane-padded hidden (planes) width
    nrows = buf_ref.shape[0]

    # ---- zero the conv2 halo rows of the scratch ---------------------------
    # The shifted reads below span rows [E0 - Wp - 1, E0 + LHW + Wp + 1); rows
    # outside the t1 block are the 1-pixel top/bottom zero padding of conv2.
    # NOTE: deliberately done every grid step (not pl.when(program_id == 0)):
    # scratch is per-TensorCore, and under a "parallel" batch axis a core may
    # never execute program_id 0, which would leave its halo uninitialized.
    # Cost is only ~2*E0 rows (~25 KB of stores) per step.
    buf_ref[pl.ds(0, E0), :] = jnp.zeros((E0, C), jnp.float32)
    buf_ref[pl.ds(E0 + LHW, nrows - E0 - LHW), :] = jnp.zeros(
        (nrows - E0 - LHW, C), jnp.float32)

    x = x_ref[0]                                        # (LHW, Cin) f32

    # ---- conv1 (1x1, BN scale folded into w1) + bias + ReLU ----------------
    t1 = jnp.dot(x.astype(jnp.bfloat16), w1_ref[...],
                 preferred_element_type=jnp.float32)    # (LHW, C) f32
    t1 = jnp.maximum(t1 + b1_ref[...], 0.0)
    # Zero the width-pad columns (col 0 and cols > W) so conv2's shifted views
    # see true zero padding; the column index is derived in-kernel from an
    # iota (f32 arithmetic avoids vector integer division).
    row = jax.lax.broadcasted_iota(jnp.int32, (LHW, C), 0).astype(jnp.float32)
    col = row - float(Wp) * jnp.floor(row * (1.0 / float(Wp)))
    interior = jnp.logical_and(col >= 0.5, col <= float(W) + 0.5)
    t1 = jnp.where(interior, t1, 0.0)

    # TODO(synk): the scratch stays f32 -- a bf16 scratch would halve these
    # loads, but 6 of the 9 tap offsets below are odd, which for packed bf16
    # rows needs sub-word sublane relayouts (or a second row-shifted copy);
    # at this size the scratch loads are a few percent of the kernel.
    buf_ref[pl.ds(E0, LHW), :] = t1

    # ---- conv2 (3x3, pad=1): nine accumulated (LHW,C)@(C,C) MXU dots -------
    # (no (LHW, 9C) im2col materialization -- per review this removes the full
    #  extra vreg/VMEM pass through the stacked operand.)
    t2 = None
    for t in range(9):
        dy, dx = t // 3, t % 3
        off = E0 + (dy - 1) * Wp + (dx - 1)             # static row offset
        view = buf_ref[pl.ds(off, LHW), :].astype(jnp.bfloat16)
        d = jnp.dot(view, w2_ref[t], preferred_element_type=jnp.float32)
        t2 = d if t2 is None else t2 + d
    t2 = jnp.maximum(t2 + b2_ref[...], 0.0)             # (LHW, C) f32

    # ---- conv3 (1x1) + bias + residual + ReLU -------------------------------
    t3 = jnp.dot(t2.astype(jnp.bfloat16), w3_ref[...],
                 preferred_element_type=jnp.float32)    # (LHW, Cout) f32
    out = jnp.maximum(t3 + b3_ref[...] + x, 0.0)
    o_ref[0] = out.astype(o_ref.dtype)


@jax.jit
def bottleneck_forward(x_nchw, w1, w2, w3, s1, b1, s2, b2, s3, b3):
    N, Cin, H, W = x_nchw.shape
    P = w1.shape[1]                      # planes
    Cout = w3.shape[1]                   # planes * 4
    assert Cin == Cout, "downsample=None requires inplanes == planes*4"

    C = ((P + LANE - 1) // LANE) * LANE  # lane-padded hidden (planes) width
    Wp = W + 2                           # width incl. the two zero pad columns
    LHW = H * Wp                         # flat spatial rows per image
    E0 = ((Wp + 1 + 7) // 8) * 8         # sublane-aligned start of t1 in scratch
    SCR = ((E0 + LHW + Wp + 1 + 7) // 8) * 8     # scratch rows incl. halos

    # NCHW (PyTorch) -> NHWC, pad ONLY the width by one zero column each side,
    # flatten spatial.  No channel padding and no top/bottom pad rows in HBM:
    # lane padding and the conv2 halo live purely in VMEM.
    # TODO(synk): when chaining blocks keep activations in this layout
    # end-to-end to drop the NCHW<->NHWC transposes entirely.
    x = jnp.transpose(x_nchw, (0, 2, 3, 1)).astype(jnp.float32)
    xw = jnp.pad(x, ((0, 0), (0, 0), (1, 1), (0, 0))).reshape(N, LHW, Cin)

    # Fold BN scales into the conv weights, pad the hidden (planes) dim to the
    # lane width, cast MXU operands to bf16 (f32 accumulation in-kernel).
    w1s = jnp.pad(w1 * s1.reshape(1, P),
                  ((0, 0), (0, C - P))).astype(jnp.bfloat16)          # (Cin, C)
    w2s = jnp.pad(w2 * s2.reshape(1, 1, 1, P),
                  ((0, 0), (0, 0), (0, C - P), (0, C - P)))
    w2s = w2s.reshape(9, C, C).astype(jnp.bfloat16)                   # (9, C, C)
    w3s = jnp.pad(w3 * s3.reshape(1, Cout),
                  ((0, C - P), (0, 0))).astype(jnp.bfloat16)          # (C, Cout)
    b1p = jnp.pad(b1.reshape(1, P), ((0, 0), (0, C - P))).astype(jnp.float32)
    b2p = jnp.pad(b2.reshape(1, P), ((0, 0), (0, C - P))).astype(jnp.float32)
    b3p = b3.reshape(1, Cout).astype(jnp.float32)

    kernel = functools.partial(bottleneck_kernel, Wp=Wp, W=W, LHW=LHW, E0=E0)

    # Grid-invariant operands: single-buffer them (default double buffering
    # would waste a second VMEM copy of w2 etc.; matters at real ResNet widths
    # and on v7x's 64 MiB VMEM).
    const = dict(pipeline_mode=pl.Buffered(1))

    grid_spec = pltpu.PrefetchScalarGridSpec(
        num_scalar_prefetch=0,
        grid=(N,),
        in_specs=[
            pl.BlockSpec((1, LHW, Cin), lambda n: (n, 0, 0)),        # x
            pl.BlockSpec((Cin, C), lambda n: (0, 0), **const),       # w1 * s1
            pl.BlockSpec((9, C, C), lambda n: (0, 0, 0), **const),   # w2 * s2
            pl.BlockSpec((C, Cout), lambda n: (0, 0), **const),      # w3 * s3
            pl.BlockSpec((1, C), lambda n: (0, 0), **const),         # b1
            pl.BlockSpec((1, C), lambda n: (0, 0), **const),         # b2
            pl.BlockSpec((1, Cout), lambda n: (0, 0), **const),      # b3
        ],
        out_specs=pl.BlockSpec((1, LHW, Cout), lambda n: (n, 0, 0)),
        scratch_shapes=[pltpu.VMEM((SCR, C), jnp.float32)],
    )

    # TODO(synk): for real ResNet widths (planes >= 64, H = W = 56) add a
    # spatial row-stripe grid axis (second "parallel" axis for the v7x
    # megacore), stream w2 tap-by-tap over an "arbitrary" reduction axis with
    # a pl.when-initialized accumulator so the whole weight never has to be
    # VMEM-resident, use 256-wide output-channel tiles on v6e/v7x, and raise
    # vmem_limit_bytes accordingly.
    out = pl.pallas_call(
        kernel,
        out_shape=jax.ShapeDtypeStruct((N, LHW, Cout), jnp.float32),
        grid_spec=grid_spec,
        compiler_params=pltpu.CompilerParams(
            dimension_semantics=("parallel",)),
    )(xw, w1s, w2s, w3s, b1p, b2p, b3p)

    # Drop the width-pad columns; back to NCHW.
    out = out.reshape(N, H, Wp, Cout)[:, :, 1:W + 1, :]
    return jnp.transpose(out, (0, 3, 1, 2))


def bottleneck_reference(x_nchw, w1, w2, w3, s1, b1, s2, b2, s3, b3):
    """Pure-JAX f32 reference mirroring the PyTorch forward (eval-mode BN)."""
    x = jnp.transpose(x_nchw, (0, 2, 3, 1)).astype(jnp.float32)   # NHWC
    N, H, W, Cin = x.shape
    P = w1.shape[1]

    t1 = jnp.einsum('nhwc,cp->nhwp', x, w1)
    t1 = jnp.maximum(t1 * s1.reshape(1, 1, 1, P) + b1.reshape(1, 1, 1, P), 0.0)

    tp = jnp.pad(t1, ((0, 0), (1, 1), (1, 1), (0, 0)))
    acc = jnp.zeros((N, H, W, P), jnp.float32)
    for dy in range(3):
        for dx in range(3):
            acc = acc + jnp.einsum('nhwc,cp->nhwp',
                                   tp[:, dy:dy + H, dx:dx + W, :], w2[dy, dx])
    t2 = jnp.maximum(acc * s2.reshape(1, 1, 1, P) + b2.reshape(1, 1, 1, P), 0.0)

    t3 = jnp.einsum('nhwp,pc->nhwc', t2, w3)
    t3 = t3 * s3.reshape(1, 1, 1, -1) + b3.reshape(1, 1, 1, -1)
    out = jnp.maximum(t3 + x, 0.0)
    return jnp.transpose(out, (0, 3, 1, 2))


def fold_bn(gamma, beta, mean, var, eps=1e-5):
    s = gamma / jnp.sqrt(var + eps)
    b = beta - mean * s
    return s.reshape(1, -1), b.reshape(1, -1)


if __name__ == "__main__":
    # Small shapes consistent with the module: planes=8, inplanes=planes*4=32.
    N, H, W = 2, 16, 16
    planes = 8
    inplanes = planes * 4          # required so the residual add works (downsample=None)
    cout = planes * 4

    key = jax.random.PRNGKey(0)
    keys = jax.random.split(key, 16)

    x_nchw = jax.random.normal(keys[0], (N, inplanes, H, W), jnp.float32)

    # Conv weights (no bias, as in the module), stored matmul-ready:
    # w1: (cin, planes) 1x1, w2: (kh, kw, planes, planes) 3x3, w3: (planes, cout) 1x1.
    w1 = 0.1 * jax.random.normal(keys[1], (inplanes, planes), jnp.float32)
    w2 = 0.1 * jax.random.normal(keys[2], (3, 3, planes, planes), jnp.float32)
    w3 = 0.1 * jax.random.normal(keys[3], (planes, cout), jnp.float32)

    # BatchNorm params (eval mode): gamma, beta, running_mean, running_var.
    def bn_params(kg, kb, km, kv, c):
        gamma = 1.0 + 0.1 * jax.random.normal(kg, (c,), jnp.float32)
        beta = 0.1 * jax.random.normal(kb, (c,), jnp.float32)
        mean = 0.1 * jax.random.normal(km, (c,), jnp.float32)
        var = 1.0 + 0.1 * jnp.abs(jax.random.normal(kv, (c,), jnp.float32))
        return gamma, beta, mean, var

    s1, b1 = fold_bn(*bn_params(keys[4], keys[5], keys[6], keys[7], planes))
    s2, b2 = fold_bn(*bn_params(keys[8], keys[9], keys[10], keys[11], planes))
    s3, b3 = fold_bn(*bn_params(keys[12], keys[13], keys[14], keys[15], cout))

    out = bottleneck_forward(x_nchw, w1, w2, w3, s1, b1, s2, b2, s3, b3)
    out = jax.block_until_ready(out)

    ref = bottleneck_reference(x_nchw, w1, w2, w3, s1, b1, s2, b2, s3, b3)
    max_err = float(jnp.max(jnp.abs(out - ref)))
    assert out.shape == (N, cout, H, W), out.shape
    # bf16 MXU inputs vs the f32 reference => loosened tolerance.
    assert max_err < 5e-2, f"mismatch vs reference: max_err={max_err}"

    print("KERNEL_OK")
</pallas_src>

<mosaic_0001>
module attributes {stable_mosaic.version = 11 : i64} {
  func.func @bottleneck_kernel(%arg0: i32, %arg1: memref<1x288x32xf32, #tpu.memory_space<vmem>>, %arg2: memref<32x128xbf16, #tpu.memory_space<vmem>>, %arg3: memref<9x128x128xbf16, #tpu.memory_space<vmem>>, %arg4: memref<128x32xbf16, #tpu.memory_space<vmem>>, %arg5: memref<1x128xf32, #tpu.memory_space<vmem>>, %arg6: memref<1x128xf32, #tpu.memory_space<vmem>>, %arg7: memref<1x32xf32, #tpu.memory_space<vmem>>, %arg8: memref<1x288x32xf32, #tpu.memory_space<vmem>>, %arg9: memref<336x128xf32, #tpu.memory_space<vmem>>) attributes {dimension_semantics = [#tpu.dimension_semantics<parallel>], iteration_bounds = array<i64: 2>, scalar_prefetch = 0 : i64, scratch_operands = 1 : i64, tpu.core_type = #tpu.core_type<tc>, window_params = [{transform_indices = @transform_0, window_bounds = array<i64: 1, 288, 32>}, {pipeline_mode = #tpu.pipeline_mode<synchronous>, transform_indices = @transform_1, window_bounds = array<i64: 32, 128>}, {pipeline_mode = #tpu.pipeline_mode<synchronous>, transform_indices = @transform_2, window_bounds = array<i64: 9, 128, 128>}, {pipeline_mode = #tpu.pipeline_mode<synchronous>, transform_indices = @transform_3, window_bounds = array<i64: 128, 32>}, {pipeline_mode = #tpu.pipeline_mode<synchronous>, transform_indices = @transform_4, window_bounds = array<i64: 1, 128>}, {pipeline_mode = #tpu.pipeline_mode<synchronous>, transform_indices = @transform_5, window_bounds = array<i64: 1, 128>}, {pipeline_mode = #tpu.pipeline_mode<synchronous>, transform_indices = @transform_6, window_bounds = array<i64: 1, 32>}, {transform_indices = @transform_7, window_bounds = array<i64: 1, 288, 32>}]} {
    %cst = arith.constant 0.000000e+00 : f32
    %0 = vector.broadcast %cst : f32 to vector<24x128xf32>
    %c0 = arith.constant 0 : index
    %c0_0 = arith.constant 0 : index
    %1 = vector.load %arg9[%c0, %c0_0] : memref<336x128xf32, #tpu.memory_space<vmem>>, vector<24x128xf32>
    tpu.vector_store %arg9[%c0, %c0_0], %0 {strides = array<i32>} : memref<336x128xf32, #tpu.memory_space<vmem>>, vector<24x128xf32>,
    %cst_1 = arith.constant 0.000000e+00 : f32
    %2 = vector.broadcast %cst_1 : f32 to vector<24x128xf32>
    %c312 = arith.constant 312 : index
    %c0_2 = arith.constant 0 : index
    %3 = vector.load %arg9[%c312, %c0_2] : memref<336x128xf32, #tpu.memory_space<vmem>>, vector<24x128xf32>
    tpu.vector_store %arg9[%c312, %c0_2], %2 {strides = array<i32>} : memref<336x128xf32, #tpu.memory_space<vmem>>, vector<24x128xf32>,
    %c0_3 = arith.constant 0 : index
    %c0_4 = arith.constant 0 : index
    %c0_5 = arith.constant 0 : index
    %4 = vector.load %arg1[%c0_3, %c0_4, %c0_5] : memref<1x288x32xf32, #tpu.memory_space<vmem>>, vector<1x288x32xf32>
    %5 = vector.shape_cast %4 : vector<1x288x32xf32> to vector<288x32xf32>
    %6 = arith.truncf %5 : vector<288x32xf32> to vector<288x32xbf16>
    %c0_6 = arith.constant 0 : index
    %c0_7 = arith.constant 0 : index
    %7 = vector.load %arg2[%c0_6, %c0_7] : memref<32x128xbf16, #tpu.memory_space<vmem>>, vector<32x128xbf16>
    %cst_8 = arith.constant dense<0.000000e+00> : vector<288x128xf32>
    %8 = tpu.matmul %6, %7, %cst_8 {dimension_numbers = #tpu.dot_dimension_numbers<[1], [0], [0], [1], [0, 0, 1, 1], [], []>} : vector<288x32xbf16>, vector<32x128xbf16>, vector<288x128xf32> -> vector<288x128xf32>
    %c0_9 = arith.constant 0 : index
    %c0_10 = arith.constant 0 : index
    %9 = vector.load %arg5[%c0_9, %c0_10] : memref<1x128xf32, #tpu.memory_space<vmem>>, vector<1x128xf32>
    %10 = vector.broadcast %9 : vector<1x128xf32> to vector<288x128xf32>
    %11 = arith.addf %8, %10 : vector<288x128xf32>
    %cst_11 = arith.constant 0.000000e+00 : f32
    %12 = vector.broadcast %cst_11 : f32 to vector<288x128xf32>
    %13 = arith.maximumf %11, %12 : vector<288x128xf32>
    %14 = tpu.iota {dimensions = array<i32: 0>} : vector<288x128xi32>
    %15 = arith.sitofp %14 : vector<288x128xi32> to vector<288x128xf32>
    %cst_12 = arith.constant 0.055555556 : f32
    %16 = vector.broadcast %cst_12 : f32 to vector<288x128xf32>
    %17 = arith.mulf %15, %16 : vector<288x128xf32>
    %18 = math.floor %17 : vector<288x128xf32>
    %cst_13 = arith.constant 1.800000e+01 : f32
    %19 = vector.broadcast %cst_13 : f32 to vector<288x128xf32>
    %20 = arith.mulf %19, %18 : vector<288x128xf32>
    %21 = arith.subf %15, %20 : vector<288x128xf32>
    %cst_14 = arith.constant 5.000000e-01 : f32
    %22 = vector.broadcast %cst_14 : f32 to vector<288x128xf32>
    %23 = arith.cmpf oge, %21, %22 : vector<288x128xf32>
    %cst_15 = arith.constant 1.650000e+01 : f32
    %24 = vector.broadcast %cst_15 : f32 to vector<288x128xf32>
    %25 = arith.cmpf ole, %21, %24 : vector<288x128xf32>
    %26 = arith.andi %23, %25 : vector<288x128xi1>
    %cst_16 = arith.constant 0.000000e+00 : f32
    %27 = vector.broadcast %cst_16 : f32 to vector<288x128xf32>
    %28 = arith.select %26, %13, %27 : vector<288x128xi1>, vector<288x128xf32>
    %c24 = arith.constant 24 : index
    %c0_17 = arith.constant 0 : index
    %29 = vector.load %arg9[%c24, %c0_17] : memref<336x128xf32, #tpu.memory_space<vmem>>, vector<288x128xf32>
    tpu.vector_store %arg9[%c24, %c0_17], %28 {strides = array<i32>} : memref<336x128xf32, #tpu.memory_space<vmem>>, vector<288x128xf32>,
    %c5 = arith.constant 5 : index
    %c0_18 = arith.constant 0 : index
    %30 = vector.load %arg9[%c5, %c0_18] : memref<336x128xf32, #tpu.memory_space<vmem>>, vector<288x128xf32>
    %31 = arith.truncf %30 : vector<288x128xf32> to vector<288x128xbf16>
    %c0_19 = arith.constant 0 : index
    %c0_20 = arith.constant 0 : index
    %c0_21 = arith.constant 0 : index
    %32 = vector.load %arg3[%c0_19, %c0_20, %c0_21] : memref<9x128x128xbf16, #tpu.memory_space<vmem>>, vector<1x128x128xbf16>
    %33 = vector.shape_cast %32 : vector<1x128x128xbf16> to vector<128x128xbf16>
    %cst_22 = arith.constant dense<0.000000e+00> : vector<288x128xf32>
    %34 = tpu.matmul %31, %33, %cst_22 {dimension_numbers = #tpu.dot_dimension_numbers<[1], [0], [0], [1], [0, 0, 1, 1], [], []>} : vector<288x128xbf16>, vector<128x128xbf16>, vector<288x128xf32> -> vector<288x128xf32>
    %c6 = arith.constant 6 : index
    %c0_23 = arith.constant 0 : index
    %35 = vector.load %arg9[%c6, %c0_23] : memref<336x128xf32, #tpu.memory_space<vmem>>, vector<288x128xf32>
    %36 = arith.truncf %35 : vector<288x128xf32> to vector<288x128xbf16>
    %c1 = arith.constant 1 : index
    %c0_24 = arith.constant 0 : index
    %c0_25 = arith.constant 0 : index
    %37 = vector.load %arg3[%c1, %c0_24, %c0_25] : memref<9x128x128xbf16, #tpu.memory_space<vmem>>, vector<1x128x128xbf16>
    %38 = vector.shape_cast %37 : vector<1x128x128xbf16> to vector<128x128xbf16>
    %cst_26 = arith.constant dense<0.000000e+00> : vector<288x128xf32>
    %39 = tpu.matmul %36, %38, %cst_26 {dimension_numbers = #tpu.dot_dimension_numbers<[1], [0], [0], [1], [0, 0, 1, 1], [], []>} : vector<288x128xbf16>, vector<128x128xbf16>, vector<288x128xf32> -> vector<288x128xf32>
    %40 = arith.addf %34, %39 : vector<288x128xf32>
    %c7 = arith.constant 7 : index
    %c0_27 = arith.constant 0 : index
    %41 = vector.load %arg9[%c7, %c0_27] : memref<336x128xf32, #tpu.memory_space<vmem>>, vector<288x128xf32>
    %42 = arith.truncf %41 : vector<288x128xf32> to vector<288x128xbf16>
    %c2 = arith.constant 2 : index
    %c0_28 = arith.constant 0 : index
    %c0_29 = arith.constant 0 : index
    %43 = vector.load %arg3[%c2, %c0_28, %c0_29] : memref<9x128x128xbf16, #tpu.memory_space<vmem>>, vector<1x128x128xbf16>
    %44 = vector.shape_cast %43 : vector<1x128x128xbf16> to vector<128x128xbf16>
    %cst_30 = arith.constant dense<0.000000e+00> : vector<288x128xf32>
    %45 = tpu.matmul %42, %44, %cst_30 {dimension_numbers = #tpu.dot_dimension_numbers<[1], [0], [0], [1], [0, 0, 1, 1], [], []>} : vector<288x128xbf16>, vector<128x128xbf16>, vector<288x128xf32> -> vector<288x128xf32>
    %46 = arith.addf %40, %45 : vector<288x128xf32>
    %c23 = arith.constant 23 : index
    %c0_31 = arith.constant 0 : index
    %47 = vector.load %arg9[%c23, %c0_31] : memref<336x128xf32, #tpu.memory_space<vmem>>, vector<288x128xf32>
    %48 = arith.truncf %47 : vector<288x128xf32> to vector<288x128xbf16>
    %c3 = arith.constant 3 : index
    %c0_32 = arith.constant 0 : index
    %c0_33 = arith.constant 0 : index
    %49 = vector.load %arg3[%c3, %c0_32, %c0_33] : memref<9x128x128xbf16, #tpu.memory_space<vmem>>, vector<1x128x128xbf16>
    %50 = vector.shape_cast %49 : vector<1x128x128xbf16> to vector<128x128xbf16>
    %cst_34 = arith.constant dense<0.000000e+00> : vector<288x128xf32>
    %51 = tpu.matmul %48, %50, %cst_34 {dimension_numbers = #tpu.dot_dimension_numbers<[1], [0], [0], [1], [0, 0, 1, 1], [], []>} : vector<288x128xbf16>, vector<128x128xbf16>, vector<288x128xf32> -> vector<288x128xf32>
    %52 = arith.addf %46, %51 : vector<288x128xf32>
    %c24_35 = arith.constant 24 : index
    %c0_36 = arith.constant 0 : index
    %53 = vector.load %arg9[%c24_35, %c0_36] : memref<336x128xf32, #tpu.memory_space<vmem>>, vector<288x128xf32>
    %54 = arith.truncf %53 : vector<288x128xf32> to vector<288x128xbf16>
    %c4 = arith.constant 4 : index
    %c0_37 = arith.constant 0 : index
    %c0_38 = arith.constant 0 : index
    %55 = vector.load %arg3[%c4, %c0_37, %c0_38] : memref<9x128x128xbf16, #tpu.memory_space<vmem>>, vector<1x128x128xbf16>
    %56 = vector.shape_cast %55 : vector<1x128x128xbf16> to vector<128x128xbf16>
    %cst_39 = arith.constant dense<0.000000e+00> : vector<288x128xf32>
    %57 = tpu.matmul %54, %56, %cst_39 {dimension_numbers = #tpu.dot_dimension_numbers<[1], [0], [0], [1], [0, 0, 1, 1], [], []>} : vector<288x128xbf16>, vector<128x128xbf16>, vector<288x128xf32> -> vector<288x128xf32>
    %58 = arith.addf %52, %57 : vector<288x128xf32>
    %c25 = arith.constant 25 : index
    %c0_40 = arith.constant 0 : index
    %59 = vector.load %arg9[%c25, %c0_40] : memref<336x128xf32, #tpu.memory_space<vmem>>, vector<288x128xf32>
    %60 = arith.truncf %59 : vector<288x128xf32> to vector<288x128xbf16>
    %c5_41 = arith.constant 5 : index
    %c0_42 = arith.constant 0 : index
    %c0_43 = arith.constant 0 : index
    %61 = vector.load %arg3[%c5_41, %c0_42, %c0_43] : memref<9x128x128xbf16, #tpu.memory_space<vmem>>, vector<1x128x128xbf16>
    %62 = vector.shape_cast %61 : vector<1x128x128xbf16> to vector<128x128xbf16>
    %cst_44 = arith.constant dense<0.000000e+00> : vector<288x128xf32>
    %63 = tpu.matmul %60, %62, %cst_44 {dimension_numbers = #tpu.dot_dimension_numbers<[1], [0], [0], [1], [0, 0, 1, 1], [], []>} : vector<288x128xbf16>, vector<128x128xbf16>, vector<288x128xf32> -> vector<288x128xf32>
    %64 = arith.addf %58, %63 : vector<288x128xf32>
    %c41 = arith.constant 41 : index
    %c0_45 = arith.constant 0 : index
    %65 = vector.load %arg9[%c41, %c0_45] : memref<336x128xf32, #tpu.memory_space<vmem>>, vector<288x128xf32>
    %66 = arith.truncf %65 : vector<288x128xf32> to vector<288x128xbf16>
    %c6_46 = arith.constant 6 : index
    %c0_47 = arith.constant 0 : index
    %c0_48 = arith.constant 0 : index
    %67 = vector.load %arg3[%c6_46, %c0_47, %c0_48] : memref<9x128x128xbf16, #tpu.memory_space<vmem>>, vector<1x128x128xbf16>
    %68 = vector.shape_cast %67 : vector<1x128x128xbf16> to vector<128x128xbf16>
    %cst_49 = arith.constant dense<0.000000e+00> : vector<288x128xf32>
    %69 = tpu.matmul %66, %68, %cst_49 {dimension_numbers = #tpu.dot_dimension_numbers<[1], [0], [0], [1], [0, 0, 1, 1], [], []>} : vector<288x128xbf16>, vector<128x128xbf16>, vector<288x128xf32> -> vector<288x128xf32>
    %70 = arith.addf %64, %69 : vector<288x128xf32>
    %c42 = arith.constant 42 : index
    %c0_50 = arith.constant 0 : index
    %71 = vector.load %arg9[%c42, %c0_50] : memref<336x128xf32, #tpu.memory_space<vmem>>, vector<288x128xf32>
    %72 = arith.truncf %71 : vector<288x128xf32> to vector<288x128xbf16>
    %c7_51 = arith.constant 7 : index
    %c0_52 = arith.constant 0 : index
    %c0_53 = arith.constant 0 : index
    %73 = vector.load %arg3[%c7_51, %c0_52, %c0_53] : memref<9x128x128xbf16, #tpu.memory_space<vmem>>, vector<1x128x128xbf16>
    %74 = vector.shape_cast %73 : vector<1x128x128xbf16> to vector<128x128xbf16>
    %cst_54 = arith.constant dense<0.000000e+00> : vector<288x128xf32>
    %75 = tpu.matmul %72, %74, %cst_54 {dimension_numbers = #tpu.dot_dimension_numbers<[1], [0], [0], [1], [0, 0, 1, 1], [], []>} : vector<288x128xbf16>, vector<128x128xbf16>, vector<288x128xf32> -> vector<288x128xf32>
    %76 = arith.addf %70, %75 : vector<288x128xf32>
    %c43 = arith.constant 43 : index
    %c0_55 = arith.constant 0 : index
    %77 = vector.load %arg9[%c43, %c0_55] : memref<336x128xf32, #tpu.memory_space<vmem>>, vector<288x128xf32>
    %78 = arith.truncf %77 : vector<288x128xf32> to vector<288x128xbf16>
    %c8 = arith.constant 8 : index
    %c0_56 = arith.constant 0 : index
    %c0_57 = arith.constant 0 : index
    %79 = vector.load %arg3[%c8, %c0_56, %c0_57] : memref<9x128x128xbf16, #tpu.memory_space<vmem>>, vector<1x128x128xbf16>
    %80 = vector.shape_cast %79 : vector<1x128x128xbf16> to vector<128x128xbf16>
    %cst_58 = arith.constant dense<0.000000e+00> : vector<288x128xf32>
    %81 = tpu.matmul %78, %80, %cst_58 {dimension_numbers = #tpu.dot_dimension_numbers<[1], [0], [0], [1], [0, 0, 1, 1], [], []>} : vector<288x128xbf16>, vector<128x128xbf16>, vector<288x128xf32> -> vector<288x128xf32>
    %82 = arith.addf %76, %81 : vector<288x128xf32>
    %c0_59 = arith.constant 0 : index
    %c0_60 = arith.constant 0 : index
    %83 = vector.load %arg6[%c0_59, %c0_60] : memref<1x128xf32, #tpu.memory_space<vmem>>, vector<1x128xf32>
    %84 = vector.broadcast %83 : vector<1x128xf32> to vector<288x128xf32>
    %85 = arith.addf %82, %84 : vector<288x128xf32>
    %cst_61 = arith.constant 0.000000e+00 : f32
    %86 = vector.broadcast %cst_61 : f32 to vector<288x128xf32>
    %87 = arith.maximumf %85, %86 : vector<288x128xf32>
    %88 = arith.truncf %87 : vector<288x128xf32> to vector<288x128xbf16>
    %c0_62 = arith.constant 0 : index
    %c0_63 = arith.constant 0 : index
    %89 = vector.load %arg4[%c0_62, %c0_63] : memref<128x32xbf16, #tpu.memory_space<vmem>>, vector<128x32xbf16>
    %cst_64 = arith.constant dense<0.000000e+00> : vector<288x32xf32>
    %90 = tpu.matmul %88, %89, %cst_64 {dimension_numbers = #tpu.dot_dimension_numbers<[1], [0], [0], [1], [0, 0, 1, 1], [], []>} : vector<288x128xbf16>, vector<128x32xbf16>, vector<288x32xf32> -> vector<288x32xf32>
    %c0_65 = arith.constant 0 : index
    %c0_66 = arith.constant 0 : index
    %91 = vector.load %arg7[%c0_65, %c0_66] : memref<1x32xf32, #tpu.memory_space<vmem>>, vector<1x32xf32>
    %92 = vector.broadcast %91 : vector<1x32xf32> to vector<288x32xf32>
    %93 = arith.addf %90, %92 : vector<288x32xf32>
    %94 = arith.addf %93, %5 : vector<288x32xf32>
    %cst_67 = arith.constant 0.000000e+00 : f32
    %95 = vector.broadcast %cst_67 : f32 to vector<288x32xf32>
    %96 = arith.maximumf %94, %95 : vector<288x32xf32>
    %c0_68 = arith.constant 0 : index
    %c0_69 = arith.constant 0 : index
    %c0_70 = arith.constant 0 : index
    %97 = vector.load %arg8[%c0_68, %c0_69, %c0_70] : memref<1x288x32xf32, #tpu.memory_space<vmem>>, vector<1x288x32xf32>
    %98 = vector.shape_cast %97 : vector<1x288x32xf32> to vector<288x32xf32>
    %99 = vector.shape_cast %96 : vector<288x32xf32> to vector<1x288x32xf32>
    tpu.vector_store %arg8[%c0_68, %c0_69, %c0_70], %99 {strides = array<i32>} : memref<1x288x32xf32, #tpu.memory_space<vmem>>, vector<1x288x32xf32>,
    return
  }
  func.func @transform_0(%arg0: i32) -> (i32, i32, i32) {
    %c0_i32 = arith.constant 0 : i32
    %c0_i32_0 = arith.constant 0 : i32
    %c0_i32_1 = arith.constant 0 : i32
    return %arg0, %c0_i32, %c0_i32_0 : i32, i32, i32
  }
  func.func @transform_1(%arg0: i32) -> (i32, i32) {
    %c0_i32 = arith.constant 0 : i32
    %c0_i32_0 = arith.constant 0 : i32
    %c0_i32_1 = arith.constant 0 : i32
    return %c0_i32, %c0_i32_0 : i32, i32
  }
  func.func @transform_2(%arg0: i32) -> (i32, i32, i32) {
    %c0_i32 = arith.constant 0 : i32
    %c0_i32_0 = arith.constant 0 : i32
    %c0_i32_1 = arith.constant 0 : i32
    %c0_i32_2 = arith.constant 0 : i32
    return %c0_i32, %c0_i32_0, %c0_i32_1 : i32, i32, i32
  }
  func.func @transform_3(%arg0: i32) -> (i32, i32) {
    %c0_i32 = arith.constant 0 : i32
    %c0_i32_0 = arith.constant 0 : i32
    %c0_i32_1 = arith.constant 0 : i32
    return %c0_i32, %c0_i32_0 : i32, i32
  }
  func.func @transform_4(%arg0: i32) -> (i32, i32) {
    %c0_i32 = arith.constant 0 : i32
    %c0_i32_0 = arith.constant 0 : i32
    %c0_i32_1 = arith.constant 0 : i32
    return %c0_i32, %c0_i32_0 : i32, i32
  }
  func.func @transform_5(%arg0: i32) -> (i32, i32) {
    %c0_i32 = arith.constant 0 : i32
    %c0_i32_0 = arith.constant 0 : i32
    %c0_i32_1 = arith.constant 0 : i32
    return %c0_i32, %c0_i32_0 : i32, i32
  }
  func.func @transform_6(%arg0: i32) -> (i32, i32) {
    %c0_i32 = arith.constant 0 : i32
    %c0_i32_0 = arith.constant 0 : i32
    %c0_i32_1 = arith.constant 0 : i32
    return %c0_i32, %c0_i32_0 : i32, i32
  }
  func.func @transform_7(%arg0: i32) -> (i32, i32, i32) {
    %c0_i32 = arith.constant 0 : i32
    %c0_i32_0 = arith.constant 0 : i32
    %c0_i32_1 = arith.constant 0 : i32
    return %arg0, %c0_i32, %c0_i32_0 : i32, i32, i32
  }
}

</mosaic_0001>

<bundles_post_ra>
// kernel: bottleneck_forward.1
= control target key start
LH: loop header
LB: loop body
LE: loop exit
PB: predicated region body
PF: predicated region fallthrough
CT: control target
= control target key end

     0   :  { %s6041_s24 = smov 0   ;;  %s7898_s0 = inlined_call_operand.vmem [shape: f32[2,288,32], index: 0, kind: input, shape index: {}]   ;;  %s7899_s1 = inlined_call_operand.vmem [shape: bf16[32,128], index: 1, kind: input, shape index: {}]   ;;  %s7900_s2 = inlined_call_operand.vmem [shape: bf16[9,128,128], index: 2, kind: input, shape index: {}]   ;;  %s7901_s3 = inlined_call_operand.vmem [shape: bf16[128,32], index: 3, kind: input, shape index: {}]   ;;  %s7902_s4 = inlined_call_operand.vmem [shape: f32[1,128], index: 4, kind: input, shape index: {}]   ;;  %s7903_s5 = inlined_call_operand.vmem [shape: f32[1,128], index: 5, kind: input, shape index: {}]   ;;  %s7904_s6 = inlined_call_operand.vmem [shape: f32[1,32], index: 6, kind: input, shape index: {}]   ;;  %s7905_s7 = inlined_call_operand.vmem [shape: f32[2,288,32], index: 7, kind: output, shape index: {}]  }
   0x1 LB: > { %s4451_s25 = sadd.s32 4294967295, %s5997_s24   ;;  %p4455_p0 = scmp.ge.s32.totalorder %s5997_s24, 1  ;;  %s5997_s24 = sphi %s6041_s24, %s17_s24  }
   0x2   : > { %p237_p1 = scmp.lt.s32.totalorder %s5997_s24, 3 }
   0x4   : > { %p238_p2 = pnand %p4455_p0, %p237_p1 }
   0x6   : > { %241 = sbr.rel (%p238_p2) target bundleno = 1083 (0x43b), region = 48 }
   0xd   : > { %v5845_v0 = vld [vmem:[%s7899_s1] sm:$0xff]   ;;  %p269_p3 = scmp.lt.s32.totalorder %s4451_s25, 1  ;;  %v5846_v1 = vld [vmem:[%s7899_s1 + $0x8] sm:$0xff]   ;;  %vm7906_vm0 = vcmask 261120   ;;  %v5851_v19 = vld [vmem:[%s7900_s2 + $0x50] sm:$0xff]  }
   0xe   : > { %4971 = vmatprep.subr.bf16.mxu0 %v5845_v0  ;;  %v5848_v2 = vld [vmem:[%s7900_s2 + $0xc0] sm:$0xff]   ;;  %v5850_v4 = vld [vmem:[%s7900_s2 + $0xc8] sm:$0xff]   ;;  %v5852_v26 = vld [vmem:[%s7900_s2 + $0xd0] sm:$0xff]  }
   0xf   : > { %s8093_s25 = smov (!%p269_p3, %s4451_s25), 1  ;;  %4972 = vmatpush3.bf16.msra.mxu0 %v5845_v0  ;;  %v5847_v3 = vld [vmem:[%s7900_s2 + $0x40] sm:$0xff]   ;;  %5167 = vmatprep.subr.bf16.mxu1 %v5848_v2  ;;  %v5849_v14 = vld [vmem:[%s7900_s2 + $0x48] sm:$0xff]   ;;  %v5853_v27 = vld [vmem:[%s7900_s2 + $0x58] sm:$0xff]  }
  0x10   : > { %4973 = vmatprep.subr.bf16.mxu0 %v5846_v1  ;;  %s5835_s9 = smul.u32 288, %s8093_s25  ;;  %5168 = vmatpush3.bf16.msra.mxu1 %v5848_v2  ;;  %v5854_v28 = vld [vmem:[%s7900_s2 + $0xd8] sm:$0xff]   ;;  %v5855_v0 = vld [vmem:[%s7900_s2 + $0x60] sm:$0xff]   ;;  %v5857_v2 = vld [vmem:[%s7900_s2 + $0x68] sm:$0xff]  }
  0x11   : > { %5169 = vmatprep.subr.bf16.mxu1 %v5850_v4 }
  0x12   : > { %s6072_s16 = scalar_lea.vmem %s7898_s0, %s5835_s9  ;;  %s7753_s8 = scalar_lea.vmem %s7905_s7, %s5835_s9 }
  0x13   : > { %4974 = vmatpush3.bf16.msra.mxu0 %v5846_v1  ;;  %v286_v5 = vld [vmem:[%s6072_s16] sm:$0xff]  ;;  %v287_v6 = vld [vmem:[%s6072_s16 + $0x8] sm:$0xff]  ;;  %v288_v7 = vld [vmem:[%s6072_s16 + $0x10] sm:$0xff] }
  0x14   : > { %v322_v8 = vpack.c.bf16 %v287_v6, %v286_v5  ;;  %v289_v9 = vld [vmem:[%s6072_s16 + $0x18] sm:$0xff]  ;;  %v290_v10 = vld [vmem:[%s6072_s16 + $0x20] sm:$0xff]  ;;  %v291_v11 = vld [vmem:[%s6072_s16 + $0x28] sm:$0xff]  ;;  %5011 = vmatprep.subr.bf16.mxu0 %v5847_v3  ;;  %5170 = vmatpush3.bf16.msra.mxu1 %v5850_v4  ;;  %v5999_v4 = vmov 0.0  }
  0x15   : > { %v323_v12 = vpack.c.bf16 %v289_v9, %v288_v7  ;;  %v324_v13 = vpack.c.bf16 %v291_v11, %v290_v10  ;;  %v292_v15 = vld [vmem:[%s6072_s16 + $0x30] sm:$0xff]  ;;  %v293_v16 = vld [vmem:[%s6072_s16 + $0x38] sm:$0xff]  ;;  %v294_v17 = vld [vmem:[%s6072_s16 + $0x40] sm:$0xff]  ;;  %5171 = vmatprep.subr.bf16.mxu1 %v5852_v26  ;;  %280 = vst [vmem:[#allocation2] sm:$0xff] %v5999_v4 }
  0x16   : > { %4975 = vmatprep.mubr.msk.bf16.mxu0 %vm7906_vm0, %v322_v8  ;;  %v295_v18 = vld [vmem:[%s6072_s16 + $0x48] sm:$0xff]  ;;  %v325_v20 = vpack.c.bf16 %v293_v16, %v292_v15  ;;  %v296_v22 = vld [vmem:[%s6072_s16 + $0x50] sm:$0xff]  ;;  %v297_v23 = vld [vmem:[%s6072_s16 + $0x58] sm:$0xff]  ;;  %281 = vst [vmem:[#allocation2 + $0x8] sm:$0xff] %v5999_v4 }
  0x17   : > { %4976 = vmatmul.mubr.msk.bf16.vlgmr.msra.gmra.mrb[0].mxu0 %vm7906_vm0, %v323_v12  ;;  %v326_v21 = vpack.c.bf16 %v295_v18, %v294_v17  ;;  %v298_v24 = vld [vmem:[%s6072_s16 + $0x60] sm:$0xff]  ;;  %v299_v25 = vld [vmem:[%s6072_s16 + $0x68] sm:$0xff]  ;;  %v327_v29 = vpack.c.bf16 %v297_v23, %v296_v22  ;;  %v300_v31 = vld [vmem:[%s6072_s16 + $0x70] sm:$0xff]  ;;  %282 = vst [vmem:[#allocation2 + $0x10] sm:$0xff] %v5999_v4 }
  0x18   : > { %4979 = vmatprep.mubr.msk.bf16.mxu0 %vm7906_vm0, %v324_v13  ;;  %5012 = vmatpush3.bf16.msra.mxu0 %v5847_v3  ;;  %v328_v30 = vpack.c.bf16 %v299_v25, %v298_v24  ;;  %v301_v32 = vld [vmem:[%s6072_s16 + $0x78] sm:$0xff]  ;;  %v302_v33 = vld [vmem:[%s6072_s16 + $0x80] sm:$0xff]  ;;  %v303_v34 = vld [vmem:[%s6072_s16 + $0x88] sm:$0xff]  ;;  %283 = vst [vmem:[#allocation2 + $0x138] sm:$0xff] %v5999_v4 }
  0x19   : > { %5013 = vmatprep.subr.bf16.mxu0 %v5849_v14  ;;  %5172 = vmatpush3.bf16.msra.mxu1 %v5852_v26  ;;  %v329_v35 = vpack.c.bf16 %v301_v32, %v300_v31  ;;  %v330_v36 = vpack.c.bf16 %v303_v34, %v302_v33  ;;  %v304_v37 = vld [vmem:[%s6072_s16 + $0x90] sm:$0xff]  ;;  %v305_v38 = vld [vmem:[%s6072_s16 + $0x98] sm:$0xff]  ;;  %v306_v39 = vld [vmem:[%s6072_s16 + $0xa0] sm:$0xff]  ;;  %284 = vst [vmem:[#allocation2 + $0x140] sm:$0xff] %v5999_v4 }
  0x1a   : > { %5173 = vmatprep.subr.bf16.mxu1 %v5854_v28  ;;  %v307_v40 = vld [vmem:[%s6072_s16 + $0xa8] sm:$0xff]  ;;  %v331_v41 = vpack.c.bf16 %v305_v38, %v304_v37  ;;  %v308_v43 = vld [vmem:[%s6072_s16 + $0xb0] sm:$0xff]  ;;  %v309_v44 = vld [vmem:[%s6072_s16 + $0xb8] sm:$0xff]  ;;  %285 = vst [vmem:[#allocation2 + $0x148] sm:$0xff] %v5999_v4 }
  0x1b   : > { %v332_v42 = vpack.c.bf16 %v307_v40, %v306_v39  ;;  %v310_v45 = vld [vmem:[%s6072_s16 + $0xc0] sm:$0xff]  ;;  %v311_v46 = vld [vmem:[%s6072_s16 + $0xc8] sm:$0xff]  ;;  %v333_v47 = vpack.c.bf16 %v309_v44, %v308_v43  ;;  %v312_v49 = vld [vmem:[%s6072_s16 + $0xd0] sm:$0xff] }
  0x1c   : > { %5014 = vmatpush3.bf16.msra.mxu0 %v5849_v14  ;;  %v334_v48 = vpack.c.bf16 %v311_v46, %v310_v45  ;;  %v313_v50 = vld [vmem:[%s6072_s16 + $0xd8] sm:$0xff]  ;;  %v314_v51 = vld [vmem:[%s6072_s16 + $0xe0] sm:$0xff]  ;;  %v315_v52 = vld [vmem:[%s6072_s16 + $0xe8] sm:$0xff]  ;;  %v631_v14 = vlaneseq }
  0x1d   : > { %5015 = vmatprep.subr.bf16.mxu0 %v5851_v19  ;;  %5174 = vmatpush3.bf16.msra.mxu1 %v5854_v28  ;;  %v335_v53 = vpack.c.bf16 %v313_v50, %v312_v49  ;;  %v336_v54 = vpack.c.bf16 %v315_v52, %v314_v51  ;;  %v316_v55 = vld [vmem:[%s6072_s16 + $0xf0] sm:$0xff]  ;;  %v317_v56 = vld [vmem:[%s6072_s16 + $0xf8] sm:$0xff]  ;;  %v318_v57 = vld [vmem:[%s6072_s16 + $0x100] sm:$0xff] }
  0x1e   : > { %v319_v58 = vld [vmem:[%s6072_s16 + $0x108] sm:$0xff]  ;;  %v337_v59 = vpack.c.bf16 %v317_v56, %v316_v55  ;;  %v320_v61 = vld [vmem:[%s6072_s16 + $0x110] sm:$0xff]  ;;  %v321_v62 = vld [vmem:[%s6072_s16 + $0x118] sm:$0xff]  ;;  %v6179_v15 = vshrl.u32 %v631_v14, 7 }
  0x1f   : > { %4980 = vmatmul.mubr.msk.bf16.gmra.mrb[4].mxu0 %vm7906_vm0, %v325_v20  ;;  %v338_v60 = vpack.c.bf16 %v319_v58, %v318_v57  ;;  %v339_v63 = vpack.c.bf16 %v321_v62, %v320_v61  ;;  %v5856_v1 = vld [vmem:[%s7900_s2 + $0xe0] sm:$0xff]   ;;  %v5858_v3 = vld [vmem:[%s7900_s2 + $0xe8] sm:$0xff]   ;;  %v5859_v5 = vld [vmem:[%s7900_s2 + $0x70] sm:$0xff]  }
  0x20   : > { %4983 = vmatprep.mubr.msk.bf16.mxu0 %vm7906_vm0, %v326_v21  ;;  %5016 = vmatpush3.bf16.msra.mxu0 %v5851_v19  ;;  %v5860_v6 = vld [vmem:[%s7900_s2 + $0xf0] sm:$0xff]   ;;  %v5861_v7 = vld [vmem:[%s7900_s2 + $0x78] sm:$0xff]   ;;  %v1098_v9 = vld [vmem:[#allocation2 + $0x6] sm:$0xff]  ;;  %v634_v16 = vadd.s32 16, %v6179_v15  ;;  %v635_v18 = vadd.s32 24, %v6179_v15  ;;  %v668_v19 = vcvt.s32.f32 %v6179_v15  ;;  %v633_v20 = vadd.s32 8, %v6179_v15 }
  0x21   : > { %5017 = vmatprep.subr.bf16.mxu0 %v5853_v27  ;;  %5175 = vmatprep.subr.bf16.mxu1 %v5856_v1  ;;  %v5862_v8 = vld [vmem:[%s7900_s2 + $0xf8] sm:$0xff]   ;;  %v1099_v10 = vld [vmem:[#allocation2 + $0xe] sm:$0xff]  ;;  %v6170_v12 = vld [vmem:[%s7900_s2 + $0x100] sm:$0xff]   ;;  %v6186_v23 = vadd.s32 48, %v6179_v15  ;;  %v6196_v33 = vadd.s32 40, %v6179_v15  ;;  %v6203_v37 = vadd.s32 64, %v6179_v15 }
  0x22   : > { %5176 = vmatpush3.bf16.msra.mxu1 %v5856_v1  ;;  %v1134_v11 = vpack.c.bf16 %v1099_v10, %v1098_v9  ;;  %v6176_v13 = vld [vmem:[%s7900_s2] sm:$0xff]   ;;  %v670_v17 = vcvt.s32.f32 %v634_v16  ;;  %v671_v22 = vcvt.s32.f32 %v635_v18  ;;  %v704_v24 = vmul.f32 0.055555556, %v668_v19 }
  0x23   : > { %5177 = vmatprep.subr.bf16.mxu1 %v5858_v3  ;;  %v669_v25 = vcvt.s32.f32 %v633_v20  ;;  %v6206_v38 = vadd.s32 88, %v6179_v15  ;;  %v6209_v39 = vadd.s32 72, %v6179_v15  ;;  %v6212_v40 = vadd.s32 112, %v6179_v15 }
  0x24   : > { %5018 = vmatpush3.bf16.msra.mxu0 %v5853_v27  ;;  %v706_v21 = vmul.f32 0.055555556, %v670_v17  ;;  %v6189_v27 = vadd.s32 32, %v6179_v15  ;;  %v707_v28 = vmul.f32 0.055555556, %v671_v22  ;;  %v740_v31 = vfloor.f32 %v704_v24 }
  0x25   : > { %5019 = vmatprep.subr.bf16.mxu0 %v5855_v0  ;;  %v705_v32 = vmul.f32 0.055555556, %v669_v25  ;;  %v6218_v44 = vadd.s32 96, %v6179_v15  ;;  %v676_v51 = vcvt.s32.f32 %v6203_v37  ;;  %v679_v52 = vcvt.s32.f32 %v6206_v38 }
  0x26   : > { %5178 = vmatpush3.bf16.msra.mxu1 %v5858_v3  ;;  %v742_v26 = vfloor.f32 %v706_v21  ;;  %v776_v45 = vmul.f32 18.0, %v740_v31  ;;  %v6231_v55 = vadd.s32 120, %v6179_v15  ;;  %v6248_v3 = vadd.s32 144, %v6179_v15 }
  0x27   : > { %4984 = vmatmul.mubr.msk.bf16.gmra.mrb[8].mxu0 %vm7906_vm0, %v327_v29  ;;  %5179 = vmatprep.subr.bf16.mxu1 %v5860_v6  ;;  %v674_v29 = vcvt.s32.f32 %v6186_v23  ;;  %v741_v46 = vfloor.f32 %v705_v32  ;;  %v715_v4 = vmul.f32 0.055555556, %v679_v52  ;;  %v6265_v18 = vadd.s32 128, %v6179_v15 }
  0x28   : > { %4987 = vmatprep.mubr.msk.bf16.mxu0 %vm7906_vm0, %v328_v30  ;;  %5020 = vmatpush3.bf16.msra.mxu0 %v5855_v0  ;;  %v6193_v30 = vadd.s32 56, %v6179_v15  ;;  %v778_v34 = vmul.f32 18.0, %v742_v26 }
  0x29   : > { %5021 = vmatprep.subr.bf16.mxu0 %v5857_v2  ;;  %v777_v61 = vmul.f32 18.0, %v741_v46  ;;  %v751_v24 = vfloor.f32 %v715_v4  ;;  %v684_v46 = vcvt.s32.f32 %v6265_v18 }
  0x2a   : > { %5180 = vmatpush3.bf16.msra.mxu1 %v5860_v6  ;;  %v675_v43 = vcvt.s32.f32 %v6193_v30 }
  0x2b   : > { %5181 = vmatprep.subr.bf16.mxu1 %v5862_v8  ;;  %v6261_v14 = vsub.f32 %v669_v25, %v777_v61 }
  0x2c   : > { %5022 = vmatpush3.bf16.msra.mxu0 %v5857_v2  ;;  %v711_v58 = vmul.f32 0.055555556, %v675_v43  ;;  %v712_v2 = vmul.f32 0.055555556, %v676_v51 }
  0x2d   : > { %5023 = vmatprep.subr.bf16.mxu0 %v5859_v5  ;;  %vm849_vm7 = vcmp.ge.f32.partialorder %v6261_v14, 0.5  ;;  %vm885_vm8 = vcmp.le.f32.partialorder %v6261_v14, 16.5 }
  0x2e   : > { %5182 = vmatpush3.bf16.msra.mxu1 %v5862_v8  ;;  %v747_v10 = vfloor.f32 %v711_v58  ;;  %v748_v21 = vfloor.f32 %v712_v2  ;;  %v787_v58 = vmul.f32 18.0, %v751_v24 }
  0x2f   : > { %4988 = vmatmul.mubr.msk.bf16.gmra.mrb[12].mxu0 %vm7906_vm0, %v329_v35  ;;  %5219 = vmatprep.subr.bf16.mxu1 %v6170_v12  ;;  %v672_v35 = vcvt.s32.f32 %v6189_v27 }
  0x30   : > { %4991 = vmatprep.mubr.msk.bf16.mxu0 %vm7906_vm0, %v330_v36  ;;  %5024 = vmatpush3.bf16.msra.mxu0 %v5859_v5  ;;  %v6200_v36 = vadd.s32 80, %v6179_v15  ;;  %v783_v32 = vmul.f32 18.0, %v747_v10 }
  0x31   : > { %5025 = vmatprep.subr.bf16.mxu0 %v5861_v7  ;;  %v708_v49 = vmul.f32 0.055555556, %v672_v35 }
  0x32   : > { %v678_v50 = vcvt.s32.f32 %v6200_v36 }
  0x33   : > { %v744_v0 = vfloor.f32 %v708_v49  ;;  %v6288_v49 = vadd.s32 136, %v6179_v15 }
  0x34   : > { %5026 = vmatpush3.bf16.msra.mxu0 %v5861_v7  ;;  %v714_v1 = vmul.f32 0.055555556, %v678_v50  ;;  %v683_v7 = vcvt.s32.f32 %v6231_v55 }
  0x35   : > { %5063 = vmatprep.subr.bf16.mxu0 %v6176_v13  ;;  %v685_v30 = vcvt.s32.f32 %v6288_v49 }
  0x36   : > { %v750_v20 = vfloor.f32 %v714_v1  ;;  %v6299_v1 = vsub.f32 %v675_v43, %v783_v32 }
  0x37   : > { %4992 = vmatmul.mubr.msk.bf16.gmra.mrb[16].mxu0 %vm7906_vm0, %v331_v41  ;;  %v743_v41 = vfloor.f32 %v707_v28  ;;  %v719_v28 = vmul.f32 0.055555556, %v683_v7 }
  0x38   : > { %4995 = vmatprep.mubr.msk.bf16.mxu0 %vm7906_vm0, %v332_v42  ;;  %v710_v42 = vmul.f32 0.055555556, %v674_v29  ;;  %vm891_vm14 = vcmp.le.f32.partialorder %v6299_v1, 16.5 }
  0x39   : > { %v779_v56 = vmul.f32 18.0, %v743_v41  ;;  %v6281_v41 = vadd.s32 152, %v6179_v15 }
  0x3a   : > { %v746_v57 = vfloor.f32 %v710_v42 }
  0x3b   : > { %v6257_v8 = vsub.f32 %v671_v22, %v779_v56  ;;  %v686_v22 = vcvt.s32.f32 %v6248_v3  ;;  %v784_v56 = vmul.f32 18.0, %v748_v21  ;;  %v687_v27 = vcvt.s32.f32 %v6281_v41 }
  0x3c   : > { %v782_v9 = vmul.f32 18.0, %v746_v57 }
  0x3d   : > { %vm851_vm5 = vcmp.ge.f32.partialorder %v6257_v8, 0.5  ;;  %vm887_vm6 = vcmp.le.f32.partialorder %v6257_v8, 16.5  ;;  %v722_v57 = vmul.f32 0.055555556, %v686_v22 }
  0x3e   : > { %v6278_v31 = vsub.f32 %v674_v29, %v782_v9  ;;  %v786_v29 = vmul.f32 18.0, %v750_v20  ;;  %v6327_v9 = vadd.s32 176, %v6179_v15 }
  0x3f   : > { %4996 = vmatmul.mubr.msk.bf16.gmra.mrb[20].mxu0 %vm7906_vm0, %v333_v47  ;;  %v673_v47 = vcvt.s32.f32 %v6196_v33  ;;  %v6324_v33 = vsub.f32 %v676_v51, %v784_v56 }
  0x40   : > { %4999 = vmatprep.mubr.msk.bf16.mxu0 %vm7906_vm0, %v334_v48  ;;  %v6221_v48 = vsub.f32 %v670_v17, %v778_v34  ;;  %vm854_vm9 = vcmp.ge.f32.partialorder %v6278_v31, 0.5  ;;  %vm890_vm10 = vcmp.le.f32.partialorder %v6278_v31, 16.5  ;;  %v6320_v43 = vsub.f32 %v678_v50, %v786_v29 }
  0x41   : > { %v709_v62 = vmul.f32 0.055555556, %v673_v47 }
  0x42   : > { %vm850_vm1 = vcmp.ge.f32.partialorder %v6221_v48, 0.5  ;;  %vm886_vm2 = vcmp.le.f32.partialorder %v6221_v48, 16.5 }
  0x43   : > { %v745_v16 = vfloor.f32 %v709_v62  ;;  %vm6359_vm15 = vmand %vm850_vm1, %vm886_vm2 }
  0x44   : > { %vm923_vm2 = vmand %vm851_vm5, %vm887_vm6  ;;  %vm894_vm5 = vcmp.le.f32.partialorder %v6320_v43, 16.5  ;;  %vm856_vm6 = vcmp.ge.f32.partialorder %v6324_v33, 0.5 }
  0x45   : > { %v781_v42 = vmul.f32 18.0, %v745_v16 }
  0x47   : > { %5000 = vmatmul.mubr.msk.bf16.gmra.mrb[24].mxu0 %vm7906_vm0, %v335_v53  ;;  %v677_v53 = vcvt.s32.f32 %v6209_v39  ;;  %v6309_v4 = vsub.f32 %v673_v47, %v781_v42  ;;  %v758_v47 = vfloor.f32 %v722_v57  ;;  %v723_v39 = vmul.f32 0.055555556, %v687_v27 }
  0x48   : > { %5003 = vmatprep.mubr.msk.bf16.mxu0 %vm7906_vm0, %v336_v54  ;;  %v682_v54 = vcvt.s32.f32 %v6212_v40 }
  0x49   : > { %v713_v5 = vmul.f32 0.055555556, %v677_v53  ;;  %vm889_vm13 = vcmp.le.f32.partialorder %v6309_v4, 16.5  ;;  %v759_v8 = vfloor.f32 %v723_v39 }
  0x4a   : > { %v718_v6 = vmul.f32 0.055555556, %v682_v54 }
  0x4b   : > { %v749_v25 = vfloor.f32 %v713_v5 }
  0x4c   : > { %v754_v26 = vfloor.f32 %v718_v6  ;;  %v6313_v6 = vmul.f32 0.055555556, %v684_v46 }
  0x4d   : > { %v785_v61 = vmul.f32 18.0, %v749_v25  ;;  %v794_v25 = vmul.f32 18.0, %v758_v47 }
  0x4e   : > { %v790_v62 = vmul.f32 18.0, %v754_v26  ;;  %v690_v26 = vcvt.s32.f32 %v6327_v9  ;;  %v5871_v9 = vld [vmem:[%s7900_s2 + $0x10] sm:$0xff]  }
  0x4f   : > { %5004 = vmatmul.mubr.msk.bf16.gmra.mrb[28].mxu0 %vm7906_vm0, %v337_v59  ;;  %v680_v59 = vcvt.s32.f32 %v6218_v44  ;;  %v6337_v36 = vsub.f32 %v677_v53, %v785_v61 }
  0x50   : > { %5007 = vmatprep.mubr.msk.bf16.mxu0 %vm7906_vm0, %v338_v60  ;;  %v6236_v60 = vsub.f32 %v668_v19, %v776_v45  ;;  %v780_v19 = vmul.f32 18.0, %v744_v0  ;;  %v755_v0 = vfloor.f32 %v719_v28  ;;  %v6341_v37 = vsub.f32 %v682_v54, %v790_v62 }
  0x51   : > { %v6404_v62 = vadd.s32 208, %v6179_v15 }
  0x52   : > { %vm848_vm3 = vcmp.ge.f32.partialorder %v6236_v60, 0.5  ;;  %vm884_vm4 = vcmp.le.f32.partialorder %v6236_v60, 16.5  ;;  %v6292_v23 = vsub.f32 %v672_v35, %v780_v19  ;;  %v6305_v35 = vld [vmem:[%s7902_s4] ss:$0 sm:$0xff]  ;;  %v791_v50 = vmul.f32 18.0, %v755_v0 }
  0x53   : > { %v721_v19 = vmul.f32 0.055555556, %v685_v30  ;;  %vm6373_vm1 = vmand %vm848_vm3, %vm884_vm4  ;;  %v6385_v60 = vadd.s32 184, %v6179_v15  ;;  %vm858_vm4 = vcmp.ge.f32.partialorder %v6320_v43, 0.5  ;;  %v6547_v43 = vadd.s32 200, %v6179_v15 }
  0x54   : > { %vm852_vm11 = vcmp.ge.f32.partialorder %v6292_v23, 0.5  ;;  %vm888_vm12 = vcmp.le.f32.partialorder %v6292_v23, 16.5  ;;  %vm6396_vm3 = vmand %vm849_vm7, %vm885_vm8  ;;  %v6410_v14 = vsub.f32 %v683_v7, %v791_v50  ;;  %vm892_vm7 = vcmp.le.f32.partialorder %v6324_v33, 16.5 }
  0x55   : > { %v757_v61 = vfloor.f32 %v721_v19  ;;  %v691_v7 = vcvt.s32.f32 %v6385_v60 }
  0x57   : > { %5008 = vmatmul.mubr.msk.bf16.gmra.mrb[32].mxu0 %vm7906_vm0, %v339_v63  ;;  %v6241_v63 = vadd.s32 104, %v6179_v15  ;;  %vm853_vm0 = vcmp.ge.f32.partialorder %v6309_v4, 0.5  ;;  %v793_v3 = vmul.f32 18.0, %v757_v61  ;;  %v6505_v61 = vadd.s32 216, %v6179_v15 }
  0x58   : > { %5027 = vmatprep.mubr.bf16.mxu0 %v1134_v11  ;;  %v716_v11 = vmul.f32 0.055555556, %v680_v59 }
  0x59   : > { %v681_v17 = vcvt.s32.f32 %v6241_v63  ;;  %v795_v63 = vmul.f32 18.0, %v759_v8 }
  0x5a   : > { %v752_v34 = vfloor.f32 %v716_v11  ;;  %v6333_v11 = vsub.f32 %v679_v52, %v787_v58  ;;  %v6353_v52 = vadd.s32 160, %v6179_v15 }
  0x5b   : > { %v717_v45 = vmul.f32 0.055555556, %v681_v17  ;;  %v6496_v29 = vsub.f32 %v687_v27, %v795_v63 }
  0x5c   : > { %v788_v2 = vmul.f32 18.0, %v752_v34  ;;  %v6388_v34 = vadd.s32 168, %v6179_v15  ;;  %v688_v56 = vcvt.s32.f32 %v6353_v52  ;;  %vm859_vm8 = vcmp.ge.f32.partialorder %v6333_v11, 0.5 }
  0x5d   : > { %v753_v5 = vfloor.f32 %v717_v45 }
  0x5e   : > { %v6348_v38 = vsub.f32 %v680_v59, %v788_v2  ;;  %v756_v59 = vfloor.f32 %v6313_v6  ;;  %v6414_v2 = vmul.f32 0.055555556, %v690_v26 }
  0x5f   : > { %v789_v44 = vmul.f32 18.0, %v753_v5  ;;  %v6417_v5 = vadd.s32 192, %v6179_v15 }
  0x60   : > { %v792_v39 = vmul.f32 18.0, %v756_v59 }
  0x61   : > { %v6425_v55 = vsub.f32 %v681_v17, %v789_v44  ;;  %v692_v48 = vcvt.s32.f32 %v6417_v5  ;;  %v5874_v5 = vld [vmem:[%s7900_s2 + $0x20] sm:$0xff]  }
  0xea   : > { %v4977_v10 = vpop.f32.mrb[0].mxu0 }
  0xeb   : > { %v461_v51 = vadd.f32 %v4977_v10, %v6305_v35  ;;  %v452_v16 = vpop.f32.mrb[1].mxu0  ;;  %v689_v10 = vcvt.s32.f32 %v6388_v34  ;;  %v6727_v34 = vld [vmem:[%s7900_s2 + $0x120] sm:$0xff]  }
  0xec   : > { %v453_v53 = vadd.f32 %v6305_v35, %v452_v16  ;;  %v4978_v54 = vpop.f32.mrb[2].mxu0  ;;  %v6434_v16 = vsub.f32 %v686_v22, %v794_v25  ;;  %v6449_v22 = vmul.f32 0.055555556, %v688_v56  ;;  %v6474_v25 = vmul.f32 0.055555556, %v691_v7 }
  0xed   : > { %v597_v20 = vmax.f32 %v461_v51, 0.0  ;;  %v464_v21 = vadd.f32 %v4978_v54, %v6305_v35  ;;  %v455_v24 = vpop.f32.mrb[3].mxu0  ;;  %v694_v54 = vcvt.s32.f32 %v6404_v62 }
  0xee   : > { %v595_v28 = vmax.f32 %v453_v53, 0.0  ;;  %v456_v32 = vadd.f32 %v6305_v35, %v455_v24  ;;  %v5864_v24 = vld [vmem:[%s7900_s2 + $0x108] sm:$0xff]  }
  0xef   : > { %v958_v42 = vsel %vm6359_vm15, %v597_v20, 0.0  ;;  %v598_v45 = vmax.f32 %v464_v21, 0.0  ;;  %vm895_vm15 = vcmp.le.f32.partialorder %v6333_v11, 16.5  ;;  %v762_v20 = vfloor.f32 %v6414_v2 }
  0xf0   : > { %994 = vst [vmem:[#allocation2 + $0x28] sm:$0xff] %v958_v42  ;;  %v956_v57 = vsel %vm6373_vm1, %v595_v28, 0.0  ;;  %v596_v58 = vmax.f32 %v456_v32, 0.0  ;;  %vm6440_vm1 = vmand %vm854_vm9, %vm890_vm10  ;;  %vm7939_vm10 = vcmp.ge.f32.partialorder %v6299_v1, 0.5  ;;  %v6478_v28 = vmul.f32 0.055555556, %v689_v10 }
  0xf1   : > { %992 = vst [vmem:[#allocation2 + $0x18] sm:$0xff] %v956_v57  ;;  %v959_v0 = vsel %vm923_vm2, %v598_v45, 0.0  ;;  %vm6456_vm9 = vmand %vm852_vm11, %vm888_vm12  ;;  %v6492_v45 = vsub.f32 %v684_v46, %v792_v39  ;;  %v6502_v4 = vmul.f32 0.055555556, %v694_v54  ;;  %vm898_vm12 = vcmp.le.f32.partialorder %v6341_v37, 16.5 }
  0xf2   : > { %995 = vst [vmem:[#allocation2 + $0x30] sm:$0xff] %v959_v0  ;;  %v957_v6 = vsel %vm6396_vm3, %v596_v58, 0.0  ;;  %v4981_v47 = vpop.f32.mrb[4].mxu0  ;;  %vm893_vm3 = vcmp.le.f32.partialorder %v6337_v36, 16.5  ;;  %vm6467_vm2 = vmand %vm7939_vm10, %vm891_vm14  ;;  %v6513_v0 = vsub.f32 %v685_v30, %v793_v3  ;;  %v760_v2 = vfloor.f32 %v6449_v22 }
  0xf3   : > { %993 = vst [vmem:[#allocation2 + $0x20] sm:$0xff] %v957_v6  ;;  %v477_v50 = vadd.f32 %v4981_v47, %v6305_v35  ;;  %v468_v51 = vpop.f32.mrb[5].mxu0  ;;  %vm6486_vm11 = vmand %vm853_vm0, %vm889_vm13  ;;  %vm862_vm0 = vcmp.ge.f32.partialorder %v6341_v37, 0.5  ;;  %v6518_v6 = vmul.f32 0.055555556, %v692_v48  ;;  %vm860_vm13 = vcmp.ge.f32.partialorder %v6348_v38, 0.5 }
  0xf4   : > { %v469_v40 = vadd.f32 %v6305_v35, %v468_v51  ;;  %v4982_v53 = vpop.f32.mrb[6].mxu0  ;;  %vm896_vm14 = vcmp.le.f32.partialorder %v6348_v38, 16.5  ;;  %v6524_v49 = vmul.f32 18.0, %v762_v20  ;;  %v763_v30 = vfloor.f32 %v6474_v25  ;;  %v6552_v25 = vld [vmem:[%s7900_s2 + $0x8] sm:$0xff]  }
  0xf5   : > { %v601_v44 = vmax.f32 %v477_v50, 0.0  ;;  %v480_v59 = vadd.f32 %v4982_v53, %v6305_v35  ;;  %v471_v19 = vpop.f32.mrb[7].mxu0  ;;  %v761_v17 = vfloor.f32 %v6478_v28  ;;  %vm861_vm10 = vcmp.ge.f32.partialorder %v6425_v55, 0.5 }
  0xf6   : > { %v599_v21 = vmax.f32 %v469_v40, 0.0  ;;  %v472_v23 = vadd.f32 %v6305_v35, %v471_v19 }
  0xf7   : > { %v962_v32 = vsel %vm6440_vm1, %v601_v44, 0.0  ;;  %v602_v42 = vmax.f32 %v480_v59, 0.0  ;;  %vm863_vm1 = vcmp.ge.f32.partialorder %v6410_v14, 0.5 }
  0xf8   : > { %998 = vst [vmem:[#allocation2 + $0x48] sm:$0xff] %v962_v32  ;;  %v960_v8 = vsel %vm6456_vm9, %v599_v21, 0.0  ;;  %v600_v57 = vmax.f32 %v472_v23, 0.0  ;;  %v1100_v58 = vld [vmem:[#allocation2 + $0x16] sm:$0xff]  ;;  %vm6535_vm9 = vmand %vm858_vm4, %vm894_vm5  ;;  %v695_v23 = vcvt.s32.f32 %v6505_v61  ;;  %v6836_v61 = vadd.s32 256, %v6179_v15 }
  0xf9   : > { %996 = vst [vmem:[#allocation2 + $0x38] sm:$0xff] %v960_v8  ;;  %v963_v18 = vsel %vm6467_vm2, %v602_v42, 0.0  ;;  %v1951_v41 = vld [vmem:[#allocation2 + $0x17] sm:$0xff]  ;;  %v1103_v46 = vld [vmem:[#allocation2 + $0x2e] sm:$0xff]  ;;  %vm899_vm2 = vcmp.le.f32.partialorder %v6410_v14, 16.5  ;;  %vm6558_vm4 = vmand %vm856_vm6, %vm892_vm7  ;;  %v766_v8 = vfloor.f32 %v6502_v4  ;;  %vm7950_vm6 = vcmp.ge.f32.partialorder %v6337_v36, 0.5 }
  0xfa   : > { %v1954_v27 = vld [vmem:[#allocation2 + $0x2f] sm:$0xff]  ;;  %999 = vst [vmem:[#allocation2 + $0x50] sm:$0xff] %v963_v18  ;;  %v961_v47 = vsel %vm6486_vm11, %v600_v57, 0.0  ;;  %v4985_v50 = vpop.f32.mrb[8].mxu0  ;;  %v1101_v51 = vld [vmem:[#allocation2 + $0x1e] sm:$0xff]  ;;  %v1102_v63 = vld [vmem:[#allocation2 + $0x26] sm:$0xff] }
  0xfb   : > { %v1952_v39 = vld [vmem:[#allocation2 + $0x1f] sm:$0xff]  ;;  %997 = vst [vmem:[#allocation2 + $0x40] sm:$0xff] %v961_v47  ;;  %v493_v40 = vadd.f32 %v4985_v50, %v6305_v35  ;;  %v484_v53 = vpop.f32.mrb[9].mxu0  ;;  %v1135_v3 = vpack.c.bf16 %v1101_v51, %v1100_v58  ;;  %v1136_v44 = vpack.c.bf16 %v1103_v46, %v1102_v63  ;;  %v1953_v31 = vld [vmem:[#allocation2 + $0x27] sm:$0xff]  ;;  %vm897_vm11 = vcmp.le.f32.partialorder %v6425_v55, 16.5  ;;  %vm6571_vm5 = vmand %vm859_vm8, %vm895_vm15 }
  0xfc   : > { %v1987_v22 = vpack.c.bf16 %v1952_v39, %v1951_v41  ;;  %v485_v19 = vadd.f32 %v6305_v35, %v484_v53  ;;  %v4986_v20 = vpop.f32.mrb[10].mxu0  ;;  %v1988_v21 = vpack.c.bf16 %v1954_v27, %v1953_v31  ;;  %v6565_v57 = vadd.s32 240, %v6179_v15  ;;  %vm6583_vm7 = vmand %vm7950_vm6, %vm893_vm3  ;;  %v6598_v36 = vld [vmem:[%s7900_s2 + $0x110] sm:$0xff]  }
  0xfd   : > { %v605_v28 = vmax.f32 %v493_v40, 0.0  ;;  %v496_v42 = vadd.f32 %v4986_v20, %v6305_v35  ;;  %v487_v1 = vpop.f32.mrb[11].mxu0  ;;  %5028 = vmatmul.mubr.bf16.vlgmr.msra.gmra.mrb[36].mxu0 %v1135_v3  ;;  %v796_v41 = vmul.f32 18.0, %v760_v2  ;;  %v764_v46 = vfloor.f32 %v6518_v6  ;;  %vm6641_vm6 = vmand %vm862_vm0, %vm898_vm12 }
  0xfe   : > { %5183 = vmatprep.mubr.bf16.mxu1 %v1987_v22  ;;  %v603_v58 = vmax.f32 %v485_v19, 0.0  ;;  %v488_v18 = vadd.f32 %v6305_v35, %v487_v1  ;;  %5031 = vmatprep.mubr.bf16.mxu0 %v1136_v44  ;;  %v6588_v47 = vmul.f32 18.0, %v763_v30  ;;  %v6590_v50 = vmul.f32 18.0, %v761_v17  ;;  %vm6666_vm0 = vmand %vm860_vm13, %vm896_vm14 }
  0xff   : > { %5184 = vmatmul.mubr.bf16.vlgmr.msra.gmra.mrb[0].mxu1 %v1988_v21  ;;  %v966_v4 = vsel %vm6535_vm9, %v605_v28, 0.0  ;;  %v606_v27 = vmax.f32 %v496_v42, 0.0  ;;  %5064 = vmatpush3.bf16.msra.mxu0 %v6176_v13  ;;  %v693_v39 = vcvt.s32.f32 %v6547_v43  ;;  %vm866_vm8 = vcmp.ge.f32.partialorder %v6434_v16, 0.5  ;;  %vm6685_vm12 = vmand %vm863_vm1, %vm899_vm2 }
 0x100   : > { %5220 = vmatpush3.bf16.msra.mxu1 %v6170_v12  ;;  %1002 = vst [vmem:[#allocation2 + $0x68] sm:$0xff] %v966_v4  ;;  %v964_v2 = vsel %vm6558_vm4, %v603_v58, 0.0  ;;  %v604_v6 = vmax.f32 %v488_v18, 0.0  ;;  %v1104_v51 = vld [vmem:[#allocation2 + $0x36] sm:$0xff]  ;;  %v6602_v12 = vmul.f32 0.055555556, %v695_v23  ;;  %5065 = vmatprep.subr.bf16.mxu0 %v6552_v25  ;;  %v698_v53 = vcvt.s32.f32 %v6565_v57  ;;  %vm6700_vm13 = vmand %vm861_vm10, %vm897_vm11 }
 0x101   : > { %5221 = vmatprep.subr.bf16.mxu1 %v5864_v24  ;;  %1000 = vst [vmem:[#allocation2 + $0x58] sm:$0xff] %v964_v2  ;;  %v967_v13 = vsel %vm6571_vm5, %v606_v27, 0.0  ;;  %v1955_v63 = vld [vmem:[#allocation2 + $0x37] sm:$0xff]  ;;  %v1107_v30 = vld [vmem:[#allocation2 + $0x4e] sm:$0xff]  ;;  %vm902_vm15 = vcmp.le.f32.partialorder %v6434_v16, 16.5  ;;  %v6610_v40 = vmul.f32 18.0, %v766_v8  ;;  %v6623_v20 = vsub.f32 %v690_v26, %v6524_v49 }
 0x102   : > { %v1958_v17 = vld [vmem:[#allocation2 + $0x4f] sm:$0xff]  ;;  %v6614_v3 = vadd.s32 224, %v6179_v15  ;;  %1003 = vst [vmem:[#allocation2 + $0x70] sm:$0xff] %v967_v13  ;;  %v965_v22 = vsel %vm6583_vm7, %v604_v6, 0.0  ;;  %v4989_v44 = vpop.f32.mrb[12].mxu0  ;;  %v1105_v31 = vld [vmem:[#allocation2 + $0x3e] sm:$0xff]  ;;  %v6627_v21 = vsub.f32 %v688_v56, %v796_v41  ;;  %v767_v13 = vfloor.f32 %v6602_v12 }
 0x103   : > { %v1956_v59 = vld [vmem:[#allocation2 + $0x3f] sm:$0xff]  ;;  %vm864_vm3 = vcmp.ge.f32.partialorder %v6492_v45, 0.5  ;;  %vm900_vm9 = vcmp.le.f32.partialorder %v6492_v45, 16.5  ;;  %v6629_v28 = vmul.f32 18.0, %v764_v46  ;;  %1001 = vst [vmem:[#allocation2 + $0x60] sm:$0xff] %v965_v22  ;;  %v509_v32 = vadd.f32 %v4989_v44, %v6305_v35  ;;  %v500_v42 = vpop.f32.mrb[13].mxu0  ;;  %5066 = vmatpush3.bf16.msra.mxu0 %v6552_v25 }
 0x104   : > { %v1106_v19 = vld [vmem:[#allocation2 + $0x46] sm:$0xff]  ;;  %v1137_v1 = vpack.c.bf16 %v1105_v31, %v1104_v51  ;;  %v1989_v8 = vpack.c.bf16 %v1956_v59, %v1955_v63  ;;  %5222 = vmatpush3.bf16.msra.mxu1 %v5864_v24  ;;  %vm903_vm5 = vcmp.le.f32.partialorder %v6496_v29, 16.5  ;;  %v501_v26 = vadd.f32 %v6305_v35, %v500_v42  ;;  %v4990_v56 = vpop.f32.mrb[14].mxu0  ;;  %v6652_v24 = vld [vmem:[%s7900_s2 + $0x118] sm:$0xff]   ;;  %5067 = vmatprep.subr.bf16.mxu0 %v5871_v9 }
 0x105   : > { %v1138_v58 = vpack.c.bf16 %v1107_v30, %v1106_v19  ;;  %v1957_v33 = vld [vmem:[#allocation2 + $0x47] sm:$0xff]  ;;  %vm865_vm7 = vcmp.ge.f32.partialorder %v6513_v0, 0.5  ;;  %vm901_vm4 = vcmp.le.f32.partialorder %v6513_v0, 16.5  ;;  %5223 = vmatprep.subr.bf16.mxu1 %v6598_v36  ;;  %v6656_v37 = vmul.f32 0.055555556, %v693_v39  ;;  %v503_v27 = vpop.f32.mrb[15].mxu0 }
 0x106   : > { %v1990_v49 = vpack.c.bf16 %v1958_v17, %v1957_v33  ;;  %v6659_v18 = vadd.s32 248, %v6179_v15  ;;  %v609_v41 = vmax.f32 %v509_v32, 0.0  ;;  %v512_v4 = vadd.f32 %v4990_v56, %v6305_v35  ;;  %5032 = vmatmul.mubr.bf16.gmra.mrb[40].mxu0 %v1137_v1  ;;  %5187 = vmatprep.mubr.bf16.mxu1 %v1989_v8  ;;  %v6679_v2 = vld [vmem:[%s7900_s2 + $0x18] sm:$0xff]   ;;  %v6774_v16 = vld [vmem:[%s7900_s2 + $0x128] sm:$0xff]  }
 0x107   : > { %v6673_v11 = vmul.f32 0.055555556, %v698_v53  ;;  %v696_v25 = vcvt.s32.f32 %v6614_v3  ;;  %v607_v38 = vmax.f32 %v501_v26, 0.0  ;;  %v504_v51 = vadd.f32 %v6305_v35, %v503_v27  ;;  %5035 = vmatprep.mubr.bf16.mxu0 %v1138_v58  ;;  %5068 = vmatpush3.bf16.msra.mxu0 %v5871_v9 }
 0x108   : > { %5188 = vmatmul.mubr.bf16.gmra.mrb[4].mxu1 %v1990_v49  ;;  %v6692_v63 = vadd.s32 232, %v6179_v15  ;;  %v970_v30 = vsel %vm6641_vm6, %v609_v41, 0.0  ;;  %v610_v17 = vmax.f32 %v512_v4, 0.0  ;;  %v6708_v12 = vsub.f32 %v691_v7, %v6588_v47  ;;  %v1108_v31 = vld [vmem:[#allocation2 + $0x56] sm:$0xff]  ;;  %5069 = vmatprep.subr.bf16.mxu0 %v6679_v2 }
 0x109   : > { %5224 = vmatpush3.bf16.msra.mxu1 %v6598_v36  ;;  %v6713_v22 = vsub.f32 %v689_v10, %v6590_v50  ;;  %1006 = vst [vmem:[#allocation2 + $0x88] sm:$0xff] %v970_v30  ;;  %v968_v55 = vsel %vm6666_vm0, %v607_v38, 0.0  ;;  %v608_v44 = vmax.f32 %v504_v51, 0.0  ;;  %v6721_v60 = vsub.f32 %v694_v54, %v6610_v40  ;;  %v1959_v47 = vld [vmem:[#allocation2 + $0x57] sm:$0xff]  ;;  %v1111_v50 = vld [vmem:[#allocation2 + $0x6e] sm:$0xff]  ;;  %vm6761_vm0 = vmand %vm866_vm8, %vm902_vm15 }
 0x10a   : > { %5225 = vmatprep.subr.bf16.mxu1 %v6652_v24  ;;  %v765_v7 = vfloor.f32 %v6656_v37  ;;  %1004 = vst [vmem:[#allocation2 + $0x78] sm:$0xff] %v968_v55  ;;  %v971_v10 = vsel %vm6685_vm12, %v610_v17, 0.0  ;;  %v1962_v36 = vld [vmem:[#allocation2 + $0x6f] sm:$0xff]  ;;  %vm870_vm14 = vcmp.ge.f32.partialorder %v6623_v20, 0.5  ;;  %vm906_vm1 = vcmp.le.f32.partialorder %v6623_v20, 16.5  ;;  %v4993_v19 = vpop.f32.mrb[16].mxu0  ;;  %vm6781_vm8 = vmand %vm864_vm3, %vm900_vm9 }
 0x10b   : > { %v770_v62 = vfloor.f32 %v6673_v11  ;;  %v6736_v54 = vmul.f32 0.055555556, %v696_v25  ;;  %v699_v40 = vcvt.s32.f32 %v6659_v18  ;;  %1007 = vst [vmem:[#allocation2 + $0x90] sm:$0xff] %v971_v10  ;;  %v969_v59 = vsel %vm6700_vm13, %v608_v44, 0.0  ;;  %v1109_v32 = vld [vmem:[#allocation2 + $0x5e] sm:$0xff]  ;;  %v1110_v1 = vld [vmem:[#allocation2 + $0x66] sm:$0xff]  ;;  %5070 = vmatpush3.bf16.msra.mxu0 %v6679_v2  ;;  %vm6817_vm9 = vmand %vm865_vm7, %vm901_vm4 }
 0x10c   : > { %v1960_v42 = vld [vmem:[#allocation2 + $0x5f] sm:$0xff]  ;;  %vm868_vm2 = vcmp.ge.f32.partialorder %v6627_v21, 0.5  ;;  %vm904_vm10 = vcmp.le.f32.partialorder %v6627_v21, 16.5  ;;  %v6747_v8 = vsub.f32 %v692_v48, %v6629_v28  ;;  %v803_v58 = vmul.f32 18.0, %v767_v13  ;;  %1005 = vst [vmem:[#allocation2 + $0x80] sm:$0xff] %v969_v59  ;;  %v516_v52 = vpop.f32.mrb[17].mxu0  ;;  %5071 = vmatprep.subr.bf16.mxu0 %v5874_v5 }
 0x10d   : > { %v697_v33 = vcvt.s32.f32 %v6692_v63  ;;  %v525_v9 = vadd.f32 %v4993_v19, %v6305_v35  ;;  %v1139_v26 = vpack.c.bf16 %v1109_v32, %v1108_v31  ;;  %v1991_v56 = vpack.c.bf16 %v1960_v42, %v1959_v47  ;;  %v1961_v37 = vld [vmem:[#allocation2 + $0x67] sm:$0xff]  ;;  %5226 = vmatpush3.bf16.msra.mxu1 %v6652_v24  ;;  %v4994_v41 = vpop.f32.mrb[18].mxu0  ;;  %v5877_v48 = vld [vmem:[%s7900_s2 + $0x30] sm:$0xff]   ;;  %v5876_v20 = vld [vmem:[%s7900_s2 + $0x138] sm:$0xff]  }
 0x10e   : > { %v1140_v49 = vpack.c.bf16 %v1111_v50, %v1110_v1  ;;  %vm871_vm11 = vcmp.ge.f32.partialorder %v6708_v12, 0.5  ;;  %vm907_vm6 = vcmp.le.f32.partialorder %v6708_v12, 16.5  ;;  %v517_v28 = vadd.f32 %v6305_v35, %v516_v52  ;;  %5227 = vmatprep.subr.bf16.mxu1 %v6727_v34  ;;  %v519_v6 = vpop.f32.mrb[19].mxu0  ;;  %v6793_v2 = vld [vmem:[%s7900_s2 + $0x28] sm:$0xff]  }
 0x10f   : > { %v1992_v46 = vpack.c.bf16 %v1962_v36, %v1961_v37  ;;  %vm869_vm12 = vcmp.ge.f32.partialorder %v6713_v22, 0.5  ;;  %v801_v4 = vmul.f32 18.0, %v765_v7  ;;  %v6769_v24 = vadd.s32 272, %v6179_v15  ;;  %5036 = vmatmul.mubr.bf16.gmra.mrb[44].mxu0 %v1139_v26  ;;  %5191 = vmatprep.mubr.bf16.mxu1 %v1991_v56 }
 0x110   : > { %v613_v27 = vmax.f32 %v525_v9, 0.0  ;;  %v528_v38 = vadd.f32 %v4994_v41, %v6305_v35  ;;  %v806_v51 = vmul.f32 18.0, %v770_v62  ;;  %v6788_v13 = vmul.f32 0.055555556, %v699_v40  ;;  %5039 = vmatprep.mubr.bf16.mxu0 %v1140_v49  ;;  %5072 = vmatpush3.bf16.msra.mxu0 %v5874_v5 }
 0x111   : > { %v611_v45 = vmax.f32 %v517_v28, 0.0  ;;  %vm7965_vm15 = vcmp.ge.f32.partialorder %v6496_v29, 0.5  ;;  %v6804_v17 = vadd.f32 %v6305_v35, %v519_v6  ;;  %5192 = vmatmul.mubr.bf16.gmra.mrb[8].mxu1 %v1992_v46  ;;  %v768_v14 = vfloor.f32 %v6736_v54  ;;  %v1112_v0 = vld [vmem:[#allocation2 + $0x76] sm:$0xff]  ;;  %5073 = vmatprep.subr.bf16.mxu0 %v6793_v2  ;;  %v7259_v29 = vld [vmem:[%s7900_s2 + $0x200] sm:$0xff]  }
 0x112   : > { %vm6799_vm3 = vmand %vm7965_vm15, %vm903_vm5  ;;  %v6809_v55 = vmul.f32 0.055555556, %v697_v33  ;;  %v974_v44 = vsel %vm6761_vm0, %v613_v27, 0.0  ;;  %v614_v31 = vmax.f32 %v528_v38, 0.0  ;;  %vm905_vm5 = vcmp.le.f32.partialorder %v6713_v22, 16.5  ;;  %5228 = vmatpush3.bf16.msra.mxu1 %v6727_v34  ;;  %v1963_v36 = vld [vmem:[#allocation2 + $0x77] sm:$0xff] }
 0x113   : > { %v6824_v7 = vsub.f32 %v695_v23, %v803_v58  ;;  %1010 = vst [vmem:[#allocation2 + $0xa8] sm:$0xff] %v974_v44  ;;  %v972_v10 = vsel %vm6781_vm8, %v611_v45, 0.0  ;;  %v7928_v47 = vmax.f32 %v6804_v17, 0.0  ;;  %v6832_v50 = vsub.f32 %v693_v39, %v801_v4  ;;  %5229 = vmatprep.subr.bf16.mxu1 %v6774_v16  ;;  %v6841_v23 = vld [vmem:[%s7900_s2 + $0x130] sm:$0xff]   ;;  %v4997_v32 = vpop.f32.mrb[20].mxu0  ;;  %v1113_v42 = vld [vmem:[#allocation2 + $0x7e] sm:$0xff] }
 0x114   : > { %1008 = vst [vmem:[#allocation2 + $0x98] sm:$0xff] %v972_v10  ;;  %v975_v34 = vsel %vm6799_vm3, %v614_v31, 0.0  ;;  %v1115_v62 = vld [vmem:[#allocation2 + $0x8e] sm:$0xff]  ;;  %vm874_vm4 = vcmp.ge.f32.partialorder %v6721_v60, 0.5  ;;  %vm910_vm7 = vcmp.le.f32.partialorder %v6721_v60, 16.5  ;;  %v6849_v39 = vsub.f32 %v698_v53, %v806_v51  ;;  %v1964_v1 = vld [vmem:[#allocation2 + $0x7f] sm:$0xff]  ;;  %vm6877_vm3 = vmand %vm870_vm14, %vm906_vm1  ;;  %5074 = vmatpush3.bf16.msra.mxu0 %v6793_v2 }
 0x115   : > { %v1966_v43 = vld [vmem:[#allocation2 + $0x8f] sm:$0xff]  ;;  %v771_v54 = vfloor.f32 %v6788_v13  ;;  %v6853_v59 = vadd.s32 280, %v6179_v15  ;;  %1011 = vst [vmem:[#allocation2 + $0xb0] sm:$0xff] %v975_v34  ;;  %v973_v19 = vsel %vm6817_vm9, %v7928_v47, 0.0  ;;  %v1114_v58 = vld [vmem:[#allocation2 + $0x86] sm:$0xff]  ;;  %vm872_vm13 = vcmp.ge.f32.partialorder %v6747_v8, 0.5  ;;  %vm6899_vm14 = vmand %vm868_vm2, %vm904_vm10  ;;  %5075 = vmatprep.subr.bf16.mxu0 %v5877_v48 }
 0x116   : > { %vm908_vm0 = vcmp.le.f32.partialorder %v6747_v8, 16.5  ;;  %v804_v57 = vmul.f32 18.0, %v768_v14  ;;  %v769_v53 = vfloor.f32 %v6809_v55  ;;  %v702_v9 = vcvt.s32.f32 %v6769_v24  ;;  %1009 = vst [vmem:[#allocation2 + $0xa0] sm:$0xff] %v973_v19  ;;  %v532_v26 = vpop.f32.mrb[21].mxu0  ;;  %v1965_v5 = vld [vmem:[#allocation2 + $0x87] sm:$0xff]  ;;  %5230 = vmatpush3.bf16.msra.mxu1 %v6774_v16  ;;  %v5878_v2 = vld [vmem:[%s7900_s2 + $0x38] sm:$0xff]   ;;  %vm6915_vm1 = vmand %vm871_vm11, %vm907_vm6 }
 0x117   : > { %v6865_v52 = vadd.f32 %v4997_v32, %v6305_v35  ;;  %v1141_v56 = vpack.c.bf16 %v1113_v42, %v1112_v0  ;;  %v1993_v49 = vpack.c.bf16 %v1964_v1, %v1963_v36  ;;  %v1142_v37 = vpack.c.bf16 %v1115_v62, %v1114_v58  ;;  %v4998_v46 = vpop.f32.mrb[22].mxu0  ;;  %5231 = vmatprep.subr.bf16.mxu1 %v6841_v23  ;;  %vm6939_vm2 = vmand %vm869_vm12, %vm905_vm5 }
 0x118   : > { %vm911_vm15 = vcmp.le.f32.partialorder %v6824_v7, 16.5  ;;  %v6882_v41 = vadd.f32 %v6305_v35, %v532_v26  ;;  %v1994_v4 = vpack.c.bf16 %v1966_v43, %v1965_v5  ;;  %vm873_vm8 = vcmp.ge.f32.partialorder %v6832_v50, 0.5  ;;  %v535_v6 = vpop.f32.mrb[23].mxu0  ;;  %5076 = vmatpush3.bf16.msra.mxu0 %v5877_v48  ;;  %v6985_v48 = vld [vmem:[%s7900_s2 + $0x80] sm:$0xff]   ;;  %vm6991_vm12 = vmand %vm874_vm4, %vm910_vm7 }
 0x119   : > { %v700_v16 = vcvt.s32.f32 %v6836_v61  ;;  %v6887_v27 = vadd.s32 264, %v6179_v15  ;;  %v7925_v11 = vmax.f32 %v6865_v52, 0.0  ;;  %v6904_v15 = vadd.f32 %v4998_v46, %v6305_v35  ;;  %5040 = vmatmul.mubr.bf16.gmra.mrb[48].mxu0 %v1141_v56  ;;  %5195 = vmatprep.mubr.bf16.mxu1 %v1993_v49  ;;  %vm7007_vm4 = vmand %vm872_vm13, %vm908_vm0 }
 0x11a   : > { %v807_v51 = vmul.f32 18.0, %v771_v54  ;;  %v703_v13 = vcvt.s32.f32 %v6853_v59  ;;  %v7927_v45 = vmax.f32 %v6882_v41, 0.0  ;;  %v6920_v30 = vadd.f32 %v6305_v35, %v535_v6  ;;  %5043 = vmatprep.mubr.bf16.mxu0 %v1142_v37  ;;  %5196 = vmatmul.mubr.bf16.gmra.mrb[12].mxu1 %v1994_v4  ;;  %v5001_v1 = vpop.f32.mrb[24].mxu0 }
 0x11b   : > { %v6924_v14 = vsub.f32 %v696_v25, %v804_v57  ;;  %v6928_v55 = vmul.f32 0.055555556, %v702_v9  ;;  %v978_v12 = vsel %vm6877_vm3, %v7925_v11, 0.0  ;;  %v7924_v44 = vmax.f32 %v6904_v15, 0.0  ;;  %5232 = vmatpush3.bf16.msra.mxu1 %v6841_v23  ;;  %v1116_v0 = vld [vmem:[#allocation2 + $0x96] sm:$0xff]  ;;  %v6958_v23 = vld [vmem:[%s7900_s2 + $0x140] sm:$0xff]   ;;  %5077 = vmatprep.subr.bf16.mxu0 %v5878_v2 }
 0x11c   : > { %vm909_vm10 = vcmp.le.f32.partialorder %v6832_v50, 16.5  ;;  %v805_v3 = vmul.f32 18.0, %v769_v53  ;;  %1014 = vst [vmem:[#allocation2 + $0xc8] sm:$0xff] %v978_v12  ;;  %v976_v25 = vsel %vm6899_vm14, %v7927_v45, 0.0  ;;  %v7926_v10 = vmax.f32 %v6920_v30, 0.0  ;;  %5233 = vmatprep.subr.bf16.mxu1 %v5876_v20  ;;  %v1967_v62 = vld [vmem:[#allocation2 + $0x97] sm:$0xff]  ;;  %5078 = vmatpush3.bf16.msra.mxu0 %v5878_v2 }
 0x11d   : > { %v6952_v22 = vmul.f32 0.055555556, %v700_v16  ;;  %v701_v34 = vcvt.s32.f32 %v6887_v27  ;;  %1012 = vst [vmem:[#allocation2 + $0xb8] sm:$0xff] %v976_v25  ;;  %v979_v36 = vsel %vm6915_vm1, %v7924_v44, 0.0  ;;  %v1119_v43 = vld [vmem:[#allocation2 + $0xae] sm:$0xff]  ;;  %vm878_vm11 = vcmp.ge.f32.partialorder %v6849_v39, 0.5  ;;  %vm7037_vm0 = vmand %vm873_vm8, %vm909_vm10  ;;  %5115 = vmatprep.subr.bf16.mxu0 %v6985_v48 }
 0x11e   : > { %v1970_v54 = vld [vmem:[#allocation2 + $0xaf] sm:$0xff]  ;;  %vm914_vm6 = vcmp.le.f32.partialorder %v6849_v39, 16.5  ;;  %v6968_v19 = vsub.f32 %v699_v40, %v807_v51  ;;  %v739_v32 = vmul.f32 0.055555556, %v703_v13  ;;  %1015 = vst [vmem:[#allocation2 + $0xd0] sm:$0xff] %v979_v36  ;;  %v977_v42 = vsel %vm6939_vm2, %v7926_v10, 0.0 }
 0x11f   : > { %v1117_v58 = vld [vmem:[#allocation2 + $0x9e] sm:$0xff]  ;;  %v1118_v53 = vld [vmem:[#allocation2 + $0xa6] sm:$0xff]  ;;  %vm912_vm5 = vcmp.le.f32.partialorder %v6924_v14, 16.5  ;;  %v774_v18 = vfloor.f32 %v6928_v55  ;;  %1013 = vst [vmem:[#allocation2 + $0xc0] sm:$0xff] %v977_v42  ;;  %v6980_v40 = vadd.f32 %v5001_v1, %v6305_v35  ;;  %v548_v26 = vpop.f32.mrb[25].mxu0  ;;  %5234 = vmatpush3.bf16.msra.mxu1 %v5876_v20  ;;  %v7978_v46 = vmov 0  ;;  %vm7068_vm8 = vmand %vm878_vm11, %vm914_vm6 }
 0x120   : > { %v1968_v57 = vld [vmem:[#allocation2 + $0x9f] sm:$0xff]  ;;  %v1143_v56 = vpack.c.bf16 %v1117_v58, %v1116_v0  ;;  %v1144_v37 = vpack.c.bf16 %v1119_v43, %v1118_v53  ;;  %v1969_v5 = vld [vmem:[#allocation2 + $0xa7] sm:$0xff]  ;;  %v7979_v46 = vsel %vm6991_vm12, 4294967295, %v7978_v46  ;;  %v6996_v4 = vadd.f32 %v6305_v35, %v548_v26  ;;  %v5002_v6 = vpop.f32.mrb[26].mxu0  ;;  %5271 = vmatprep.subr.bf16.mxu1 %v6958_v23  ;;  %v2286_v11 = vld [vmem:[#allocation2 + $0x30] sm:$0xff] }
 0x121   : > { %v1995_v49 = vpack.c.bf16 %v1968_v57, %v1967_v62  ;;  %v1996_v51 = vpack.c.bf16 %v1970_v54, %v1969_v5  ;;  %v772_v20 = vfloor.f32 %v6952_v22  ;;  %v737_v55 = vmul.f32 0.055555556, %v701_v34  ;;  %v551_v0 = vpop.f32.mrb[27].mxu0  ;;  %v1033_v44 = vld [vmem:[#allocation2 + $0x2d] sm:$0xff]  ;;  %v1030_v10 = vld [vmem:[#allocation2 + $0x15] sm:$0xff]  ;;  %v2288_v45 = vld [vmem:[#allocation2 + $0x40] sm:$0xff] }
 0x122   : > { %v7921_v12 = vmax.f32 %v6980_v40, 0.0  ;;  %v7012_v25 = vadd.f32 %v5002_v6, %v6305_v35  ;;  %5044 = vmatmul.mubr.bf16.gmra.mrb[52].mxu0 %v1143_v56  ;;  %v841_v2 = vsub.f32 %v697_v33, %v805_v3  ;;  %v775_v22 = vfloor.f32 %v739_v32  ;;  %v5005_v56 = vpop.f32.mrb[28].mxu0 }
 0x123   : > { %5199 = vmatprep.mubr.bf16.mxu1 %v1995_v49  ;;  %v7923_v36 = vmax.f32 %v6996_v4, 0.0  ;;  %vm7982_vm7 = vcmp.ge.f32.partialorder %v6824_v7, 0.5  ;;  %v7983_v8 = vmov 0  ;;  %v7026_v62 = vadd.f32 %v6305_v35, %v551_v0  ;;  %5047 = vmatprep.mubr.bf16.mxu0 %v1144_v37 }
 0x124   : > { %vm7021_vm13 = vmand %vm7982_vm7, %vm911_vm15  ;;  %5200 = vmatmul.mubr.bf16.gmra.mrb[16].mxu1 %v1996_v51  ;;  %v810_v43 = vmul.f32 18.0, %v774_v18  ;;  %v982_v63 = vsel %vm6991_vm12, %v7921_v12, 0.0  ;;  %v7918_v33 = vmax.f32 %v7012_v25, 0.0  ;;  %vm879_vm15 = vcmp.ge.f32.partialorder %v6968_v19, 0.5  ;;  %v1120_v32 = vld [vmem:[#allocation2 + $0xb6] sm:$0xff] }
 0x125   : > { %v7984_v8 = vsel %vm7021_vm13, 4294967295, %v7983_v8  ;;  %vm915_vm7 = vcmp.le.f32.partialorder %v6968_v19, 16.5  ;;  %1018 = vst [vmem:[#allocation2 + $0xe8] sm:$0xff] %v982_v63  ;;  %v980_v3 = vsel %vm7007_vm4, %v7923_v36, 0.0  ;;  %v7922_v54 = vmax.f32 %v7026_v62, 0.0  ;;  %v1971_v58 = vld [vmem:[#allocation2 + $0xb7] sm:$0xff] }
 0x126   : > { %v808_v50 = vmul.f32 18.0, %v772_v20  ;;  %v773_v42 = vfloor.f32 %v737_v55  ;;  %1016 = vst [vmem:[#allocation2 + $0xd8] sm:$0xff] %v980_v3  ;;  %v983_v1 = vsel %vm7021_vm13, %v7918_v33, 0.0  ;;  %v1123_v57 = vld [vmem:[#allocation2 + $0xce] sm:$0xff]  ;;  %v811_v18 = vmul.f32 18.0, %v775_v22  ;;  %v1121_v49 = vld [vmem:[#allocation2 + $0xbe] sm:$0xff]  ;;  %vm7099_vm6 = vmand %vm879_vm15, %vm915_vm7 }
 0x127   : > { %v1974_v53 = vld [vmem:[#allocation2 + $0xcf] sm:$0xff]  ;;  %1019 = vst [vmem:[#allocation2 + $0xf0] sm:$0xff] %v983_v1  ;;  %v981_v26 = vsel %vm7037_vm0, %v7922_v54, 0.0  ;;  %v1972_v37 = vld [vmem:[#allocation2 + $0xbf] sm:$0xff]  ;;  %v846_v6 = vsub.f32 %v702_v9, %v810_v43  ;;  %v7060_v51 = vadd.f32 %v5005_v56, %v6305_v35  ;;  %v564_v20 = vpop.f32.mrb[29].mxu0  ;;  %v1145_v55 = vpack.c.bf16 %v1121_v49, %v1120_v32  ;;  %v1973_v63 = vld [vmem:[#allocation2 + $0xc7] sm:$0xff] }
 0x128   : > { %v1122_v5 = vld [vmem:[#allocation2 + $0xc6] sm:$0xff]  ;;  %1017 = vst [vmem:[#allocation2 + $0xe0] sm:$0xff] %v981_v26  ;;  %v7062_v0 = vpack.c.bf16 %v1972_v37, %v1971_v58  ;;  %v7987_v3 = vmov 0  ;;  %v7073_v24 = vadd.f32 %v6305_v35, %v564_v20  ;;  %v5006_v9 = vpop.f32.mrb[30].mxu0  ;;  %v7075_v43 = vpack.c.bf16 %v1974_v53, %v1973_v63 }
 0x129   : > { %v1146_v22 = vpack.c.bf16 %v1123_v57, %v1122_v5  ;;  %v7988_v3 = vsel %vm7068_vm8, 4294967295, %v7987_v3  ;;  %v844_v32 = vsub.f32 %v700_v16, %v808_v50  ;;  %v809_v1 = vmul.f32 18.0, %v773_v42  ;;  %v567_v26 = vpop.f32.mrb[31].mxu0 }
 0x12a   : > { %v7910_v58 = vmax.f32 %v7060_v51, 0.0  ;;  %vm7989_vm10 = vcmp.ge.f32.partialorder %v6924_v14, 0.5  ;;  %v7089_v57 = vadd.f32 %v5006_v9, %v6305_v35  ;;  %5048 = vmatmul.mubr.bf16.gmra.mrb[56].mxu0 %v1145_v55  ;;  %5203 = vmatprep.mubr.bf16.mxu1 %v7062_v0  ;;  %v847_v61 = vsub.f32 %v703_v13, %v811_v18  ;;  %v5009_v27 = vpop.f32.mrb[32].mxu0 }
 0x12b   : > { %vm7084_vm11 = vmand %vm7989_vm10, %vm912_vm5  ;;  %v7917_v16 = vmax.f32 %v7073_v24, 0.0  ;;  %v7992_v14 = vmov 0  ;;  %v7104_v50 = vadd.f32 %v6305_v35, %v567_v26  ;;  %5051 = vmatprep.mubr.bf16.mxu0 %v1146_v22  ;;  %vm7994_vm5 = vcmp.le.f32.partialorder %v841_v2, 16.5  ;;  %v5927_v22 = vld [vmem:[%s7902_s4] ss:$0 sm:$0xff]  ;;  %v580_v9 = vpop.f32.mrb[33].mxu0 }
 0x12c   : > { %v7993_v14 = vsel %vm7099_vm6, 4294967295, %v7992_v14  ;;  %5204 = vmatmul.mubr.bf16.gmra.mrb[20].mxu1 %v7075_v43  ;;  %v986_v59 = vsel %vm7068_vm8, %v7910_v58, 0.0  ;;  %v7909_v13 = vmax.f32 %v7089_v57, 0.0  ;;  %vm7995_vm10 = vcmp.ge.f32.partialorder %v841_v2, 0.5 }
 0x12d   : > { %vm7114_vm13 = vmand %vm7995_vm10, %vm7994_vm5  ;;  %v7996_v19 = vmov 0  ;;  %vm882_vm15 = vcmp.ge.f32.partialorder %v846_v6, 0.5  ;;  %vm918_vm7 = vcmp.le.f32.partialorder %v846_v6, 16.5  ;;  %1022 = vst [vmem:[#allocation2 + $0x108] sm:$0xff] %v986_v59  ;;  %v984_v35 = vsel %vm7084_vm11, %v7917_v16, 0.0  ;;  %v1124_v18 = vld [vmem:[#allocation2 + $0xd6] sm:$0xff] }
 0x12e   : > { %v7997_v19 = vsel %vm7114_vm13, 4294967295, %v7996_v19  ;;  %v7916_v42 = vmax.f32 %v7104_v50, 0.0  ;;  %v845_v53 = vsub.f32 %v701_v34, %v809_v1  ;;  %1020 = vst [vmem:[#allocation2 + $0xf8] sm:$0xff] %v984_v35  ;;  %v987_v2 = vsel %vm7099_vm6, %v7909_v13, 0.0  ;;  %v1975_v56 = vld [vmem:[#allocation2 + $0xd7] sm:$0xff]  ;;  %v1127_v49 = vld [vmem:[#allocation2 + $0xee] sm:$0xff]  ;;  %vm7142_vm10 = vmand %vm882_vm15, %vm918_vm7 }
 0x12f   : > { %v1978_v37 = vld [vmem:[#allocation2 + $0xef] sm:$0xff]  ;;  %1023 = vst [vmem:[#allocation2 + $0x110] sm:$0xff] %v987_v2  ;;  %v1125_v34 = vld [vmem:[#allocation2 + $0xde] sm:$0xff]  ;;  %v1126_v55 = vld [vmem:[#allocation2 + $0xe6] sm:$0xff]  ;;  %v7136_v63 = vadd.f32 %v5927_v22, %v5009_v27  ;;  %v7146_v13 = vadd.f32 %v5927_v22, %v580_v9  ;;  %vm8000_vm6 = vcmp.le.f32.partialorder %v844_v32, 16.5  ;;  %vm8001_vm8 = vcmp.ge.f32.partialorder %v844_v32, 0.5 }
 0x130   : > { %v985_v5 = vsel %vm7114_vm13, %v7916_v42, 0.0  ;;  %v1976_v20 = vld [vmem:[#allocation2 + $0xdf] sm:$0xff]  ;;  %v1147_v1 = vpack.c.bf16 %v1125_v34, %v1124_v18  ;;  %v1148_v59 = vpack.c.bf16 %v1127_v49, %v1126_v55  ;;  %v1977_v35 = vld [vmem:[#allocation2 + $0xe7] sm:$0xff]  ;;  %vm917_vm5 = vcmp.le.f32.partialorder %v845_v53, 16.5  ;;  %vm7153_vm13 = vmand %vm8001_vm8, %vm8000_vm6 }
 0x131   : > { %1021 = vst [vmem:[#allocation2 + $0x100] sm:$0xff] %v985_v5  ;;  %v7138_v26 = vpack.c.bf16 %v1976_v20, %v1975_v56  ;;  %v5010_v5 = vpop.f32.mrb[34].mxu0  ;;  %v7148_v58 = vpack.c.bf16 %v1978_v37, %v1977_v35  ;;  %v7914_v27 = vmax.f32 %v7136_v63, 0.0  ;;  %v7915_v49 = vmax.f32 %v7146_v13, 0.0  ;;  %v1055_v28 = vld [vmem:[#allocation2 + $0xdd] sm:$0xff]  ;;  %v1056_v21 = vld [vmem:[#allocation2 + $0xe5] sm:$0xff] }
 0x132   : > { %v7157_v6 = vadd.f32 %v5927_v22, %v5010_v5  ;;  %v583_v56 = vpop.f32.mrb[35].mxu0  ;;  %5052 = vmatmul.mubr.bf16.gmra.mrb[60].mxu0 %v1147_v1  ;;  %vm8004_vm15 = vcmp.le.f32.partialorder %v847_v61, 16.5  ;;  %vm8005_vm7 = vcmp.ge.f32.partialorder %v847_v61, 0.5  ;;  %vm8008_vm8 = vcmp.ge.f32.partialorder %v845_v53, 0.5  ;;  %v1622_v61 = vld [vmem:[#allocation2 + $0x1f] sm:$0xff]  ;;  %v2617_v2 = vld [vmem:[#allocation2 + $0x29] sm:$0xff] }
 0x133   : > { %5207 = vmatprep.mubr.bf16.mxu1 %v7138_v26  ;;  %vm7163_vm12 = vmand %vm8005_vm7, %vm8004_vm15  ;;  %v7167_v34 = vadd.f32 %v5927_v22, %v583_v56  ;;  %5055 = vmatprep.mubr.bf16.mxu0 %v1148_v59  ;;  %v990_v32 = vsel %vm7142_vm10, %v7914_v27, 0.0  ;;  %v988_v55 = vsel %vm7153_vm13, %v7915_v49, 0.0  ;;  %v8014_v38 = vmax.f32 %v6865_v52, 0.0 }
 0x134   : > { %5208 = vmatmul.mubr.bf16.gmra.mrb[24].mxu1 %v7148_v58  ;;  %v7919_v20 = vmax.f32 %v7157_v6, 0.0  ;;  %vm7177_vm6 = vmand %vm8008_vm8, %vm917_vm5  ;;  %1026 = vst [vmem:[#allocation2 + $0x128] sm:$0xff] %v990_v32  ;;  %vm6000_vm5 = vmmov 1   ;;  %v8016_v31 = vmax.f32 %v6996_v4, 0.0  ;;  %v8021_v4 = vmax.f32 %v7012_v25, 0.0 }
 0x135   : > { %v7920_v22 = vmax.f32 %v7167_v34, 0.0  ;;  %v1128_v9 = vld [vmem:[#allocation2 + $0xf6] sm:$0xff]  ;;  %1024 = vst [vmem:[#allocation2 + $0x118] sm:$0xff] %v988_v55  ;;  %vm5964_vm15 = vmpackc.low %vm6817_vm9, %vm6000_vm5  ;;  %v8024_v7 = vmax.f32 %v7104_v50, 0.0  ;;  %vm8025_vm8 = vnez %v7988_v3  ;;  %vm8026_vm5 = vnez %v7993_v14  ;;  %v1619_v3 = vld [vmem:[#allocation2 + $0x7] sm:$0xff] }
 0x136   : > { %v991_v1 = vsel %vm7163_vm12, %v7919_v20, 0.0  ;;  %v1979_v53 = vld [vmem:[#allocation2 + $0xf7] sm:$0xff]  ;;  %v1131_v59 = vld [vmem:[#allocation2 + $0x10e] sm:$0xff]  ;;  %vm5967_vm9 = vmpackc.low %vm6939_vm2, %vm6899_vm14  ;;  %v8027_v25 = vmax.f32 %v7060_v51, 0.0  ;;  %v8029_v50 = vmax.f32 %v7146_v13, 0.0  ;;  %v8031_v13 = vmax.f32 %v7136_v63, 0.0 }
 0x137   : > { %v1982_v35 = vld [vmem:[#allocation2 + $0x10f] sm:$0xff]  ;;  %1027 = vst [vmem:[#allocation2 + $0x130] sm:$0xff] %v991_v1  ;;  %v989_v5 = vsel %vm7177_vm6, %v7920_v22, 0.0  ;;  %v1028_v1 = vld [vmem:[#allocation2 + $0x5] sm:$0xff]  ;;  %vm5970_vm7 = vmpackc.low %vm6915_vm1, %vm6877_vm3  ;;  %vm8018_vm3 = vnez %v7979_v46  ;;  %vm8019_vm1 = vnez %v7984_v8  ;;  %v8032_v18 = vmax.f32 %v7157_v6, 0.0 }
 0x138   : > { %v1129_v56 = vld [vmem:[#allocation2 + $0xfe] sm:$0xff]  ;;  %v1130_v27 = vld [vmem:[#allocation2 + $0x106] sm:$0xff]  ;;  %1025 = vst [vmem:[#allocation2 + $0x120] sm:$0xff] %v989_v5  ;;  %vm5973_vm14 = vmpackc.low %vm7037_vm0, %vm7007_vm4  ;;  %vm8022_vm4 = vnez %v7997_v19  ;;  %v8030_v19 = vmax.f32 %v7167_v34, 0.0 }
 0x139   : > { %v1980_v32 = vld [vmem:[#allocation2 + $0xff] sm:$0xff]  ;;  %v1149_v49 = vpack.c.bf16 %v1129_v56, %v1128_v9  ;;  %v1150_v42 = vpack.c.bf16 %v1131_v59, %v1130_v27  ;;  %v1981_v16 = vld [vmem:[#allocation2 + $0x107] sm:$0xff]  ;;  %vm5976_vm2 = vmpackc.low %vm8019_vm1, %vm8018_vm3  ;;  %v5989_v34 = vpack.c.bf16 %v8032_v18, %v8031_v13 }
 0x13a   : > { %v7194_v55 = vpack.c.bf16 %v1980_v32, %v1979_v53  ;;  %v7196_v33 = vpack.c.bf16 %v1982_v35, %v1981_v16  ;;  %v1029_v20 = vld [vmem:[#allocation2 + $0xd] sm:$0xff]  ;;  %v2284_v22 = vld [vmem:[#allocation2 + $0x20] sm:$0xff]  ;;  %vm5979_vm0 = vmpackc.low %vm8022_vm4, %vm7084_vm11 }
 0x13b   : > { %5056 = vmatmul.mubr.bf16.gmra.mrb[64].mxu0 %v1149_v49  ;;  %v1064_v56 = vpack.c.bf16 %v1029_v20, %v1028_v1  ;;  %v2283_v49 = vld [vmem:[#allocation2 + $0x18] sm:$0xff]  ;;  %v1032_v32 = vld [vmem:[#allocation2 + $0x25] sm:$0xff]  ;;  %vm5985_vm11 = vmpackc.low %vm7177_vm6, %vm7153_vm13 }
 0x13c   : > { %5211 = vmatprep.mubr.bf16.mxu1 %v7194_v55  ;;  %5059 = vmatprep.mubr.bf16.mxu0 %v1150_v42  ;;  %v1132_v12 = vld [vmem:[#allocation2 + $0x116] sm:$0xff]  ;;  %v2319_v42 = vpack.c.bf16 %v2284_v22, %v2283_v49  ;;  %v2285_v20 = vld [vmem:[#allocation2 + $0x28] sm:$0xff]  ;;  %vm5988_vm13 = vmpackc.low %vm7163_vm12, %vm7142_vm10  ;;  %vm8057_vm12 = vcmask 261120  }
 0x13d   : > { %5212 = vmatmul.mubr.bf16.gmra.mrb[28].mxu1 %v7196_v33  ;;  %v1983_v54 = vld [vmem:[#allocation2 + $0x117] sm:$0xff]  ;;  %v1060_v8 = vld [vmem:[#allocation2 + $0x105] sm:$0xff]  ;;  %v1620_v14 = vld [vmem:[#allocation2 + $0xf] sm:$0xff] }
 0x13e   : > { %v1986_v36 = vld [vmem:[#allocation2 + $0x12f] sm:$0xff]  ;;  %v1031_v35 = vld [vmem:[#allocation2 + $0x1d] sm:$0xff]  ;;  %vm8058_vm10 = vmmov %vm8057_vm12 }
 0x13f   : > { %v1133_v5 = vld [vmem:[#allocation2 + $0x11e] sm:$0xff]  ;;  %v1985_v53 = vld [vmem:[#allocation2 + $0x127] sm:$0xff]  ;;  %v1065_v47 = vpack.c.bf16 %v1031_v35, %v1030_v10  ;;  %vm8059_vm6 = vmmov %vm8058_vm10 }
 0x140   : > { %v1984_v9 = vld [vmem:[#allocation2 + $0x11f] sm:$0xff]  ;;  %v1151_v27 = vpack.c.bf16 %v1133_v5, %v1132_v12  ;;  %v2004_v16 = vpack.c.bf16 %v1986_v36, %v1985_v53  ;;  %v1066_v12 = vpack.c.bf16 %v1033_v44, %v1032_v32  ;;  %v5880_v36 = vld [vmem:[%s7900_s2 + $0x148] sm:$0xff]   ;;  %v1034_v53 = vld [vmem:[#allocation2 + $0x35] sm:$0xff] }
 0x141   : > { %v7200_v59 = vpack.c.bf16 %v1984_v9, %v1983_v54  ;;  %v2320_v54 = vpack.c.bf16 %v2286_v11, %v2285_v20  ;;  %v2287_v1 = vld [vmem:[#allocation2 + $0x38] sm:$0xff]  ;;  %v5885_v5 = vld [vmem:[%s7900_s2 + $0x88] sm:$0xff]   ;;  %v5881_v11 = vld [vmem:[%s7900_s2 + $0x150] sm:$0xff]  }
 0x142   : > { %v2321_v22 = vpack.c.bf16 %v2288_v45, %v2287_v1  ;;  %v1035_v10 = vld [vmem:[#allocation2 + $0x3d] sm:$0xff]  ;;  %v1036_v45 = vld [vmem:[#allocation2 + $0x45] sm:$0xff]  ;;  %v1037_v44 = vld [vmem:[#allocation2 + $0x4d] sm:$0xff] }
 0x143   : > { %5060 = vmatmul.mubr.bf16.gmra.mrb[68].mxu0 %v1151_v27  ;;  %5215 = vmatprep.mubr.bf16.mxu1 %v7200_v59  ;;  %v2290_v9 = vld [vmem:[#allocation2 + $0x50] sm:$0xff]  ;;  %v2289_v27 = vld [vmem:[#allocation2 + $0x48] sm:$0xff]  ;;  %v5888_v32 = vld [vmem:[%s7900_s2 + $0x98] sm:$0xff]  }
 0x144   : > { %5079 = vmatprep.mubr.bf16.mxu0 %v1064_v56  ;;  %v2292_v56 = vld [vmem:[#allocation2 + $0x60] sm:$0xff]  ;;  %v2322_v49 = vpack.c.bf16 %v2290_v9, %v2289_v27  ;;  %v5896_v63 = vld [vmem:[%s7900_s2 + $0x188] sm:$0xff]   ;;  %vm8063_vm3 = vmmov %vm8059_vm6 }
 0x145   : > { %5216 = vmatmul.mubr.bf16.gmra.mrb[32].mxu1 %v2004_v16  ;;  %v1068_v16 = vpack.c.bf16 %v1037_v44, %v1036_v45  ;;  %v1039_v20 = vld [vmem:[#allocation2 + $0x5d] sm:$0xff]  ;;  %v1040_v1 = vld [vmem:[#allocation2 + $0x65] sm:$0xff]  ;;  %vm8064_vm1 = vmmov %vm8063_vm3 }
 0x146   : > { %5235 = vmatprep.mubr.bf16.mxu1 %v2319_v42  ;;  %v2291_v42 = vld [vmem:[#allocation2 + $0x58] sm:$0xff]  ;;  %v2293_v44 = vld [vmem:[#allocation2 + $0x68] sm:$0xff]  ;;  %vm8066_vm4 = vmmov %vm8064_vm1 }
 0x147   : > { %v2323_v35 = vpack.c.bf16 %v2292_v56, %v2291_v42  ;;  %v1043_v27 = vld [vmem:[#allocation2 + $0x7d] sm:$0xff]  ;;  %v1044_v42 = vld [vmem:[#allocation2 + $0x85] sm:$0xff] }
 0x148   : > { %v1059_v46 = vld [vmem:[#allocation2 + $0xfd] sm:$0xff] }
 0x149   : > { %v2615_v51 = vld [vmem:[#allocation2 + $0x19] sm:$0xff]  ;;  %v2632_v18 = vld [vmem:[#allocation2 + $0xa1] sm:$0xff] }
 0x14a   : > { %v2631_v13 = vld [vmem:[#allocation2 + $0x99] sm:$0xff] }
 0x14b   : > { %5080 = vmatmul.mubr.bf16.vlgmr.msra.gmra.mrb[36].mxu0 %v1065_v47  ;;  %v5887_v47 = vld [vmem:[%s7900_s2 + $0x90] sm:$0xff]  }
 0x14c   : > { %5083 = vmatprep.mubr.bf16.mxu0 %v1066_v12  ;;  %5116 = vmatpush3.bf16.msra.mxu0 %v6985_v48  ;;  %v5882_v48 = vld [vmem:[%s7900_s2 + $0x158] sm:$0xff]   ;;  %v5883_v12 = vld [vmem:[%s7900_s2 + $0x160] sm:$0xff]  }
 0x14d   : > { %5236 = vmatmul.mubr.bf16.vlgmr.msra.gmra.mrb[0].mxu1 %v2320_v54  ;;  %5117 = vmatprep.subr.bf16.mxu0 %v5885_v5  ;;  %v5890_v54 = vld [vmem:[%s7900_s2 + $0xa0] sm:$0xff]  }
 0x14e   : > { %5272 = vmatpush3.bf16.msra.mxu1 %v6958_v23  ;;  %5239 = vmatprep.mubr.bf16.mxu1 %v2321_v22  ;;  %v1067_v23 = vpack.c.bf16 %v1035_v10, %v1034_v53  ;;  %v2294_v22 = vld [vmem:[#allocation2 + $0x70] sm:$0xff]  ;;  %v2296_v10 = vld [vmem:[#allocation2 + $0x80] sm:$0xff]  ;;  %v2295_v53 = vld [vmem:[#allocation2 + $0x78] sm:$0xff] }
 0x14f   : > { %5273 = vmatprep.subr.bf16.mxu1 %v5880_v36  ;;  %v2324_v9 = vpack.c.bf16 %v2294_v22, %v2293_v44  ;;  %v2325_v56 = vpack.c.bf16 %v2296_v10, %v2295_v53  ;;  %v8011_v10 = vmax.f32 %v6804_v17, 0.0  ;;  %v1047_v44 = vld [vmem:[#allocation2 + $0x9d] sm:$0xff]  ;;  %v1049_v53 = vld [vmem:[#allocation2 + $0xad] sm:$0xff]  ;;  %v1046_v17 = vld [vmem:[#allocation2 + $0x95] sm:$0xff] }
 0x150   : > { %5118 = vmatpush3.bf16.msra.mxu0 %v5885_v5  ;;  %v1038_v5 = vld [vmem:[#allocation2 + $0x55] sm:$0xff] }
 0x151   : > { %5119 = vmatprep.subr.bf16.mxu0 %v5887_v47  ;;  %v1069_v45 = vpack.c.bf16 %v1039_v20, %v1038_v5  ;;  %v2299_v20 = vld [vmem:[#allocation2 + $0x98] sm:$0xff] }
 0x152   : > { %5274 = vmatpush3.bf16.msra.mxu1 %v5880_v36  ;;  %v1041_v36 = vld [vmem:[#allocation2 + $0x6d] sm:$0xff]  ;;  %v5894_v5 = vld [vmem:[%s7900_s2 + $0xb8] sm:$0xff]  }
 0x153   : > { %5275 = vmatprep.subr.bf16.mxu1 %v5881_v11  ;;  %5084 = vmatmul.mubr.bf16.gmra.mrb[40].mxu0 %v1067_v23  ;;  %v5891_v23 = vld [vmem:[%s7900_s2 + $0xa8] sm:$0xff]  }
 0x154   : > { %5087 = vmatprep.mubr.bf16.mxu0 %v1068_v16  ;;  %5120 = vmatpush3.bf16.msra.mxu0 %v5887_v47  ;;  %v5886_v47 = vld [vmem:[%s7900_s2 + $0x168] sm:$0xff]   ;;  %v5889_v16 = vld [vmem:[%s7900_s2 + $0x170] sm:$0xff]  }
 0x155   : > { %5240 = vmatmul.mubr.bf16.gmra.mrb[4].mxu1 %v2322_v49  ;;  %5121 = vmatprep.subr.bf16.mxu0 %v5888_v32  ;;  %v5893_v49 = vld [vmem:[%s7900_s2 + $0xb0] sm:$0xff]  }
 0x156   : > { %5243 = vmatprep.mubr.bf16.mxu1 %v2323_v35  ;;  %5276 = vmatpush3.bf16.msra.mxu1 %v5881_v11  ;;  %v1070_v11 = vpack.c.bf16 %v1041_v36, %v1040_v1  ;;  %v2298_v35 = vld [vmem:[#allocation2 + $0x90] sm:$0xff]  ;;  %v2297_v36 = vld [vmem:[#allocation2 + $0x88] sm:$0xff] }
 0x157   : > { %5277 = vmatprep.subr.bf16.mxu1 %v5882_v48  ;;  %v2326_v22 = vpack.c.bf16 %v2298_v35, %v2297_v36  ;;  %v1051_v35 = vld [vmem:[#allocation2 + $0xbd] sm:$0xff] }
 0x158   : > { %5122 = vmatpush3.bf16.msra.mxu0 %v5888_v32  ;;  %v1042_v32 = vld [vmem:[#allocation2 + $0x75] sm:$0xff] }
 0x159   : > { %5123 = vmatprep.subr.bf16.mxu0 %v5890_v54  ;;  %v1071_v1 = vpack.c.bf16 %v1043_v27, %v1042_v32  ;;  %v1052_v32 = vld [vmem:[#allocation2 + $0xc5] sm:$0xff] }
 0x15a   : > { %5278 = vmatpush3.bf16.msra.mxu1 %v5882_v48  ;;  %v1045_v48 = vld [vmem:[#allocation2 + $0x8d] sm:$0xff] }
 0x15b   : > { %5279 = vmatprep.subr.bf16.mxu1 %v5883_v12  ;;  %5088 = vmatmul.mubr.bf16.gmra.mrb[44].mxu0 %v1069_v45  ;;  %v5965_v45 = vpack.c.bf16 %v8011_v10, %v2299_v20  ;;  %v1053_v20 = vld [vmem:[#allocation2 + $0xcd] sm:$0xff]  ;;  %v1054_v10 = vld [vmem:[#allocation2 + $0xd5] sm:$0xff] }
 0x15c   : > { %5091 = vmatprep.mubr.bf16.mxu0 %v1070_v11  ;;  %5124 = vmatpush3.bf16.msra.mxu0 %v5890_v54  ;;  %v5892_v54 = vld [vmem:[%s7900_s2 + $0x178] sm:$0xff]   ;;  %v1048_v11 = vld [vmem:[#allocation2 + $0xa5] sm:$0xff]  ;;  %v1077_v52 = vpack.c.bf16 %v1055_v28, %v1054_v10  ;;  %v7350_v28 = vld [vmem:[%s7900_s2 + $0x210] sm:$0xff]  }
 0x15d   : > { %5244 = vmatmul.mubr.bf16.gmra.mrb[8].mxu1 %v2324_v9  ;;  %5125 = vmatprep.subr.bf16.mxu0 %v5891_v23  ;;  %v7254_v9 = vld [vmem:[%s7900_s2 + $0x180] sm:$0xff]   ;;  %v1074_v27 = vpack.c.bf16 %v1049_v53, %v1048_v11  ;;  %v1061_v11 = vld [vmem:[#allocation2 + $0x10d] sm:$0xff]  ;;  %v1058_v53 = vld [vmem:[#allocation2 + $0xf5] sm:$0xff] }
 0x15e   : > { %5247 = vmatprep.mubr.bf16.mxu1 %v2325_v56  ;;  %5280 = vmatpush3.bf16.msra.mxu1 %v5883_v12  ;;  %v1072_v12 = vpack.c.bf16 %v1045_v48, %v1044_v42  ;;  %v1073_v56 = vpack.c.bf16 %v1047_v44, %v1046_v17  ;;  %v8013_v42 = vmax.f32 %v6920_v30, 0.0  ;;  %v5986_v17 = vpack.c.bf16 %v8030_v19, %v8029_v50 }
 0x15f   : > { %5281 = vmatprep.subr.bf16.mxu1 %v5886_v47 }
 0x160   : > { %5126 = vmatpush3.bf16.msra.mxu0 %v5891_v23  ;;  %v2301_v23 = vld [vmem:[#allocation2 + $0xa8] sm:$0xff] }
 0x161   : > { %5127 = vmatprep.subr.bf16.mxu0 %v5893_v49 }
 0x162   : > { %5282 = vmatpush3.bf16.msra.mxu1 %v5886_v47  ;;  %v2302_v47 = vld [vmem:[#allocation2 + $0xb0] sm:$0xff] }
 0x163   : > { %5283 = vmatprep.subr.bf16.mxu1 %v5889_v16  ;;  %5092 = vmatmul.mubr.bf16.gmra.mrb[48].mxu0 %v1071_v1  ;;  %v1050_v1 = vld [vmem:[#allocation2 + $0xb5] sm:$0xff] }
 0x164   : > { %5095 = vmatprep.mubr.bf16.mxu0 %v1072_v12  ;;  %5128 = vmatpush3.bf16.msra.mxu0 %v5893_v49  ;;  %v8012_v49 = vmax.f32 %v6882_v41, 0.0  ;;  %v1075_v36 = vpack.c.bf16 %v1051_v35, %v1050_v1  ;;  %v1076_v12 = vpack.c.bf16 %v1053_v20, %v1052_v32  ;;  %v8015_v41 = vmax.f32 %v6904_v15, 0.0  ;;  %v2618_v35 = vld [vmem:[#allocation2 + $0x31] sm:$0xff]  ;;  %v2619_v20 = vld [vmem:[#allocation2 + $0x39] sm:$0xff]  ;;  %v2620_v1 = vld [vmem:[#allocation2 + $0x41] sm:$0xff] }
 0x165   : > { %5248 = vmatmul.mubr.bf16.gmra.mrb[12].mxu1 %v2326_v22  ;;  %5129 = vmatprep.subr.bf16.mxu0 %v5894_v5  ;;  %v8017_v22 = vmax.f32 %v7026_v62, 0.0  ;;  %v8020_v15 = vmax.f32 %v6980_v40, 0.0  ;;  %v8023_v62 = vmax.f32 %v7073_v24, 0.0  ;;  %v1079_v40 = vpack.c.bf16 %v1059_v46, %v1058_v53  ;;  %v1621_v32 = vld [vmem:[#allocation2 + $0x17] sm:$0xff]  ;;  %v5899_v46 = vld [vmem:[%s7900_s2 + $0x1a0] sm:$0xff]  }
 0x166   : > { %5966 = vmatprep.mubr.msk.bf16.mxu1 %vm5964_vm15, %v5965_v45  ;;  %5284 = vmatpush3.bf16.msra.mxu1 %v5889_v16  ;;  %v2328_v16 = vpack.c.bf16 %v2302_v47, %v2301_v23  ;;  %v5968_v48 = vpack.c.bf16 %v8013_v42, %v8012_v49  ;;  %v5971_v30 = vpack.c.bf16 %v8015_v41, %v8014_v38  ;;  %vm5982_vm15 = vmpackc.low %vm8026_vm5, %vm8025_vm8  ;;  %v8028_v24 = vmax.f32 %v7089_v57, 0.0  ;;  %v1062_v23 = vld [vmem:[#allocation2 + $0x115] sm:$0xff]  ;;  %v1623_v42 = vld [vmem:[#allocation2 + $0x27] sm:$0xff] }
 0x167   : > { %5285 = vmatprep.subr.bf16.mxu1 %v5892_v54  ;;  %v5977_v60 = vpack.c.bf16 %v8021_v4, %v8020_v15  ;;  %v5980_v44 = vpack.c.bf16 %v8024_v7, %v8023_v62  ;;  %v1080_v47 = vpack.c.bf16 %v1061_v11, %v1060_v8  ;;  %v1655_v57 = vpack.c.bf16 %v1620_v14, %v1619_v3  ;;  %v7337_v38 = vld [vmem:[%s7900_s2 + $0x208] sm:$0xff]   ;;  %v1626_v41 = vld [vmem:[#allocation2 + $0x3f] sm:$0xff]  ;;  %v2626_v11 = vld [vmem:[#allocation2 + $0x71] sm:$0xff] }
 0x168   : > { %5130 = vmatpush3.bf16.msra.mxu0 %v5894_v5  ;;  %v1057_v5 = vld [vmem:[#allocation2 + $0xed] sm:$0xff]  ;;  %v5983_v39 = vpack.c.bf16 %v8028_v24, %v8027_v25  ;;  %v7327_v37 = vpack.c.bf16 %v2618_v35, %v2617_v2  ;;  %v7332_v6 = vpack.c.bf16 %v2620_v1, %v2619_v20  ;;  %v5898_v4 = vld [vmem:[%s7900_s2 + $0x198] sm:$0xff]   ;;  %v7376_v53 = vld [vmem:[%s7900_s2 + $0x220] sm:$0xff]  }
 0x169   : > { %5427 = vmatprep.subr.bf16.mxu0 %v7259_v29  ;;  %v1078_v45 = vpack.c.bf16 %v1057_v5, %v1056_v21  ;;  %v2623_v21 = vld [vmem:[#allocation2 + $0x59] sm:$0xff]  ;;  %v2624_v5 = vld [vmem:[#allocation2 + $0x61] sm:$0xff]  ;;  %v1632_v8 = vld [vmem:[#allocation2 + $0x6f] sm:$0xff] }
 0x16a   : > { %5286 = vmatpush3.bf16.msra.mxu1 %v5892_v54  ;;  %v5974_v54 = vpack.c.bf16 %v8017_v22, %v8016_v31  ;;  %v5897_v31 = vld [vmem:[%s7900_s2 + $0x190] sm:$0xff]   ;;  %v7364_v62 = vld [vmem:[%s7900_s2 + $0x218] sm:$0xff]   ;;  %v2628_v25 = vld [vmem:[#allocation2 + $0x81] sm:$0xff] }
 0x16b   : > { %5323 = vmatprep.subr.bf16.mxu1 %v7254_v9  ;;  %5096 = vmatmul.mubr.bf16.gmra.mrb[52].mxu0 %v1073_v56  ;;  %v1063_v56 = vld [vmem:[#allocation2 + $0x11d] sm:$0xff]  ;;  %v1628_v22 = vld [vmem:[#allocation2 + $0x4f] sm:$0xff]  ;;  %v1639_v2 = vld [vmem:[#allocation2 + $0xa7] sm:$0xff] }
 0x16c   : > { %5099 = vmatprep.mubr.bf16.mxu0 %v1074_v27  ;;  %v2616_v27 = vld [vmem:[#allocation2 + $0x21] sm:$0xff]  ;;  %v5908_v35 = vld [vmem:[%s7900_s2 + $0x1b8] sm:$0xff]  }
 0x16d   : > { %5252 = vmatmul.mubr.bf16.gmra.mrb[16].mxu1 %v2328_v16  ;;  %v1081_v16 = vpack.c.bf16 %v1063_v56, %v1062_v23  ;;  %v2651_v49 = vpack.c.bf16 %v2616_v27, %v2615_v51  ;;  %v1630_v7 = vld [vmem:[#allocation2 + $0x5f] sm:$0xff]  ;;  %v7390_v14 = vld [vmem:[%s7900_s2 + $0x228] sm:$0xff]   ;;  %v5905_v51 = vld [vmem:[%s7900_s2 + $0x1b0] sm:$0xff]  }
 0x16e   : > { %5969 = vmatprep.mubr.msk.bf16.mxu1 %vm5967_vm9, %v5968_v48  ;;  %v1624_v48 = vld [vmem:[#allocation2 + $0x2f] sm:$0xff]  ;;  %v1634_v56 = vld [vmem:[#allocation2 + $0x7f] sm:$0xff]  ;;  %v1635_v23 = vld [vmem:[#allocation2 + $0x87] sm:$0xff] }
 0x16f   : > { %v1636_v27 = vld [vmem:[#allocation2 + $0x8f] sm:$0xff]  ;;  %v7416_v20 = vld [vmem:[%s7900_s2 + $0x238] sm:$0xff]   ;;  %vm8060_vm9 = vmmov %vm8059_vm6 }
 0x170   : > { %v1638_v1 = vld [vmem:[#allocation2 + $0x9f] sm:$0xff] }
 0x173   : > { %5100 = vmatmul.mubr.bf16.gmra.mrb[56].mxu0 %v1075_v36  ;;  %v1656_v36 = vpack.c.bf16 %v1622_v61, %v1621_v32  ;;  %v2629_v61 = vld [vmem:[#allocation2 + $0x89] sm:$0xff]  ;;  %v7410_v32 = vpack.c.bf16 %v2632_v18, %v2631_v13 }
 0x174   : > { %5103 = vmatprep.mubr.bf16.mxu0 %v1076_v12  ;;  %v1657_v12 = vpack.c.bf16 %v1624_v48, %v1623_v42  ;;  %v1663_v42 = vpack.c.bf16 %v1636_v27, %v1635_v23  ;;  %v3611_v23 = vld [vmem:[#allocation2 + $0x2b] sm:$0xff] }
 0x175   : > { %5972 = vmatmul.mubr.msk.bf16.gmra.mrb[20].mxu1 %vm5970_vm7, %v5971_v30  ;;  %v1627_v30 = vld [vmem:[#allocation2 + $0x47] sm:$0xff]  ;;  %vm8061_vm7 = vmmov %vm8059_vm6 }
 0x176   : > { %5975 = vmatprep.mubr.msk.bf16.mxu1 %vm5973_vm14, %v5974_v54  ;;  %v2622_v54 = vld [vmem:[#allocation2 + $0x51] sm:$0xff]  ;;  %vm8062_vm14 = vmmov %vm8059_vm6 }
 0x177   : > { %v3615_v13 = vld [vmem:[#allocation2 + $0x4b] sm:$0xff] }
 0x17b   : > { %5104 = vmatmul.mubr.bf16.gmra.mrb[60].mxu0 %v1077_v52  ;;  %v2621_v52 = vld [vmem:[#allocation2 + $0x49] sm:$0xff] }
 0x17c   : > { %5107 = vmatprep.mubr.bf16.mxu0 %v1078_v45  ;;  %v1659_v45 = vpack.c.bf16 %v1628_v22, %v1627_v30  ;;  %v7352_v15 = vpack.c.bf16 %v2622_v54, %v2621_v52  ;;  %v2635_v30 = vld [vmem:[#allocation2 + $0xb9] sm:$0xff]  ;;  %v2633_v54 = vld [vmem:[#allocation2 + $0xa9] sm:$0xff] }
 0x17d   : > { %5978 = vmatmul.mubr.msk.bf16.gmra.mrb[24].mxu1 %vm5976_vm2, %v5977_v60  ;;  %v7358_v60 = vpack.c.bf16 %v2624_v5, %v2623_v21  ;;  %v2639_v52 = vld [vmem:[#allocation2 + $0xd9] sm:$0xff]  ;;  %vm8065_vm2 = vmmov %vm8064_vm1 }
 0x17e   : > { %5981 = vmatprep.mubr.msk.bf16.mxu1 %vm5979_vm0, %v5980_v44  ;;  %v1631_v44 = vld [vmem:[#allocation2 + $0x67] sm:$0xff]  ;;  %vm8067_vm0 = vmmov %vm8064_vm1 }
 0x17f   : > { %v1661_v50 = vpack.c.bf16 %v1632_v8, %v1631_v44  ;;  %v2643_v8 = vld [vmem:[#allocation2 + $0xf9] sm:$0xff]  ;;  %vm8068_vm8 = vmmov %vm8067_vm0 }
 0x180   : > { %vm8069_vm5 = vmmov %vm8067_vm0 }
 0x183   : > { %5108 = vmatmul.mubr.bf16.gmra.mrb[64].mxu0 %v1079_v40  ;;  %v1629_v40 = vld [vmem:[#allocation2 + $0x57] sm:$0xff] }
 0x184   : > { %5111 = vmatprep.mubr.bf16.mxu0 %v1080_v47  ;;  %v2627_v47 = vld [vmem:[#allocation2 + $0x79] sm:$0xff]  ;;  %v1660_v24 = vpack.c.bf16 %v1630_v7, %v1629_v40  ;;  %v2641_v40 = vld [vmem:[#allocation2 + $0xe9] sm:$0xff] }
 0x185   : > { %5984 = vmatmul.mubr.msk.bf16.gmra.mrb[28].mxu1 %vm5982_vm15, %v5983_v39  ;;  %v2625_v39 = vld [vmem:[#allocation2 + $0x69] sm:$0xff]  ;;  %v7384_v3 = vpack.c.bf16 %v2628_v25, %v2627_v47  ;;  %vm8070_vm15 = vmmov %vm8067_vm0 }
 0x186   : > { %5987 = vmatprep.mubr.msk.bf16.mxu1 %vm5985_vm11, %v5986_v17  ;;  %v7378_v19 = vpack.c.bf16 %v2626_v11, %v2625_v39  ;;  %v5902_v17 = vld [vmem:[%s7900_s2 + $0x1a8] sm:$0xff]   ;;  %vm8071_vm11 = vmmov %vm8067_vm0 }
 0x187   : > { %v2644_v11 = vld [vmem:[#allocation2 + $0x101] sm:$0xff]  ;;  %v2645_v39 = vld [vmem:[#allocation2 + $0x109] sm:$0xff] }
 0x188   : > { %v7446_v25 = vpack.c.bf16 %v2644_v11, %v2643_v8  ;;  %v3631_v11 = vld [vmem:[#allocation2 + $0xcb] sm:$0xff] }
 0x18b   : > { %5112 = vmatmul.mubr.bf16.gmra.mrb[68].mxu0 %v1081_v16  ;;  %v7402_v16 = vld [vmem:[%s7900_s2 + $0x230] sm:$0xff]  }
 0x18c   : > { %5131 = vmatprep.mubr.bf16.mxu0 %v1655_v57  ;;  %v2630_v57 = vld [vmem:[#allocation2 + $0x91] sm:$0xff] }
 0x18d   : > { %5990 = vmatmul.mubr.msk.bf16.gmra.mrb[32].mxu1 %vm5988_vm13, %v5989_v34  ;;  %v7404_v48 = vpack.c.bf16 %v2630_v57, %v2629_v61  ;;  %v3616_v57 = vld [vmem:[#allocation2 + $0x53] sm:$0xff]  ;;  %vm8072_vm13 = vmmov %vm8067_vm0 }
 0x18e   : > { %5287 = vmatprep.mubr.bf16.mxu1 %v2651_v49  ;;  %v1633_v49 = vld [vmem:[#allocation2 + $0x77] sm:$0xff]  ;;  %v3649_v18 = vpack.c.bf16 %v3616_v57, %v3615_v13  ;;  %v3290_v57 = vld [vmem:[#allocation2 + $0x82] sm:$0xff] }
 0x18f   : > { %v1662_v34 = vpack.c.bf16 %v1634_v56, %v1633_v49  ;;  %v3612_v56 = vld [vmem:[#allocation2 + $0x33] sm:$0xff] }
 0x190   : > { %v3647_v27 = vpack.c.bf16 %v3612_v56, %v3611_v23  ;;  %v5913_v61 = vld [vmem:[%s7900_s2 + $0x1d0] sm:$0xff]  }
 0x191   : > { %v3284_v56 = vld [vmem:[#allocation2 + $0x52] sm:$0xff]  ;;  %v3283_v23 = vld [vmem:[#allocation2 + $0x4a] sm:$0xff] }
 0x193   : > { %5132 = vmatmul.mubr.bf16.vlgmr.msra.gmra.mrb[36].mxu0 %v1656_v36  ;;  %v7424_v36 = vld [vmem:[%s7900_s2 + $0x1c0] sm:$0xff]  }
 0x194   : > { %5135 = vmatprep.mubr.bf16.mxu0 %v1657_v12  ;;  %5428 = vmatpush3.bf16.msra.mxu0 %v7259_v29  ;;  %v1640_v12 = vld [vmem:[#allocation2 + $0xaf] sm:$0xff] }
 0x195   : > { %5288 = vmatmul.mubr.bf16.vlgmr.msra.gmra.mrb[0].mxu1 %v7327_v37  ;;  %5429 = vmatprep.subr.bf16.mxu0 %v7337_v38 }
 0x196   : > { %5324 = vmatpush3.bf16.msra.mxu1 %v7254_v9  ;;  %5291 = vmatprep.mubr.bf16.mxu1 %v7332_v6  ;;  %v1625_v9 = vld [vmem:[#allocation2 + $0x37] sm:$0xff] }
 0x197   : > { %5325 = vmatprep.subr.bf16.mxu1 %v5896_v63  ;;  %v1658_v10 = vpack.c.bf16 %v1626_v41, %v1625_v9  ;;  %v1637_v41 = vld [vmem:[#allocation2 + $0x97] sm:$0xff]  ;;  %v1665_v9 = vpack.c.bf16 %v1640_v12, %v1639_v2  ;;  %v5915_v12 = vld [vmem:[%s7900_s2 + $0x1e0] sm:$0xff]  }
 0x198   : > { %5430 = vmatpush3.bf16.msra.mxu0 %v7337_v38  ;;  %v1664_v22 = vpack.c.bf16 %v1638_v1, %v1637_v41  ;;  %v3619_v1 = vld [vmem:[#allocation2 + $0x6b] sm:$0xff] }
 0x199   : > { %5431 = vmatprep.subr.bf16.mxu0 %v7350_v28 }
 0x19a   : > { %5326 = vmatpush3.bf16.msra.mxu1 %v5896_v63  ;;  %v2634_v63 = vld [vmem:[#allocation2 + $0xb1] sm:$0xff] }
 0x19b   : > { %5327 = vmatprep.subr.bf16.mxu1 %v5897_v31  ;;  %5136 = vmatmul.mubr.bf16.gmra.mrb[40].mxu0 %v1658_v10  ;;  %v7427_v21 = vpack.c.bf16 %v2634_v63, %v2633_v54  ;;  %v2638_v10 = vld [vmem:[#allocation2 + $0xd1] sm:$0xff] }
 0x19c   : > { %5139 = vmatprep.mubr.bf16.mxu0 %v1659_v45  ;;  %5432 = vmatpush3.bf16.msra.mxu0 %v7350_v28  ;;  %v2640_v45 = vld [vmem:[#allocation2 + $0xe1] sm:$0xff]  ;;  %v3624_v63 = vld [vmem:[#allocation2 + $0x93] sm:$0xff] }
 0x19d   : > { %5292 = vmatmul.mubr.bf16.gmra.mrb[4].mxu1 %v7352_v15  ;;  %5433 = vmatprep.subr.bf16.mxu0 %v7364_v62  ;;  %v7438_v44 = vpack.c.bf16 %v2640_v45, %v2639_v52  ;;  %v5917_v54 = vld [vmem:[%s7900_s2 + $0x1f0] sm:$0xff]  }
 0x19e   : > { %5295 = vmatprep.mubr.bf16.mxu1 %v7358_v60  ;;  %5328 = vmatpush3.bf16.msra.mxu1 %v5897_v31  ;;  %v2636_v31 = vld [vmem:[#allocation2 + $0xc1] sm:$0xff]  ;;  %v3627_v52 = vld [vmem:[#allocation2 + $0xab] sm:$0xff] }
 0x19f   : > { %5329 = vmatprep.subr.bf16.mxu1 %v5898_v4  ;;  %v7431_v5 = vpack.c.bf16 %v2636_v31, %v2635_v30  ;;  %v3623_v30 = vld [vmem:[#allocation2 + $0x8b] sm:$0xff] }
 0x1a0   : > { %5434 = vmatpush3.bf16.msra.mxu0 %v7364_v62  ;;  %v3653_v31 = vpack.c.bf16 %v3624_v63, %v3623_v30  ;;  %v3303_v63 = vld [vmem:[#allocation2 + $0xea] sm:$0xff]  ;;  %v3306_v30 = vld [vmem:[#allocation2 + $0x102] sm:$0xff] }
 0x1a1   : > { %5435 = vmatprep.subr.bf16.mxu0 %v7376_v53 }
 0x1a2   : > { %5330 = vmatpush3.bf16.msra.mxu1 %v5898_v4  ;;  %v2637_v4 = vld [vmem:[#allocation2 + $0xc9] sm:$0xff] }
 0x1a3   : > { %5331 = vmatprep.subr.bf16.mxu1 %v5899_v46  ;;  %5140 = vmatmul.mubr.bf16.gmra.mrb[44].mxu0 %v1660_v24  ;;  %v7435_v7 = vpack.c.bf16 %v2638_v10, %v2637_v4  ;;  %v2648_v24 = vld [vmem:[#allocation2 + $0x121] sm:$0xff] }
 0x1a4   : > { %5143 = vmatprep.mubr.bf16.mxu0 %v1661_v50  ;;  %5436 = vmatpush3.bf16.msra.mxu0 %v7376_v53  ;;  %v3630_v4 = vld [vmem:[#allocation2 + $0xc3] sm:$0xff] }
 0x1a5   : > { %5296 = vmatmul.mubr.bf16.gmra.mrb[8].mxu1 %v7378_v19  ;;  %5437 = vmatprep.subr.bf16.mxu0 %v7390_v14 }
 0x1a6   : > { %5299 = vmatprep.mubr.bf16.mxu1 %v7384_v3  ;;  %5332 = vmatpush3.bf16.msra.mxu1 %v5899_v46  ;;  %v2642_v46 = vld [vmem:[#allocation2 + $0xf1] sm:$0xff] }
 0x1a7   : > { %5333 = vmatprep.subr.bf16.mxu1 %v5902_v17  ;;  %v7443_v47 = vpack.c.bf16 %v2642_v46, %v2641_v40  ;;  %v3632_v46 = vld [vmem:[#allocation2 + $0xd3] sm:$0xff] }
 0x1a8   : > { %5438 = vmatpush3.bf16.msra.mxu0 %v7390_v14  ;;  %v3657_v40 = vpack.c.bf16 %v3632_v46, %v3631_v11  ;;  %v3314_v46 = vld [vmem:[#allocation2 + $0x142] sm:$0xff] }
 0x1a9   : > { %5439 = vmatprep.subr.bf16.mxu0 %v7402_v16 }
 0x1aa   : > { %5334 = vmatpush3.bf16.msra.mxu1 %v5902_v17 }
 0x1ab   : > { %5335 = vmatprep.subr.bf16.mxu1 %v5905_v51  ;;  %5144 = vmatmul.mubr.bf16.gmra.mrb[48].mxu0 %v1662_v34  ;;  %v5912_v34 = vld [vmem:[%s7900_s2 + $0x1c8] sm:$0xff]  }
 0x1ac   : > { %5147 = vmatprep.mubr.bf16.mxu0 %v1663_v42  ;;  %5440 = vmatpush3.bf16.msra.mxu0 %v7402_v16  ;;  %v3620_v42 = vld [vmem:[#allocation2 + $0x73] sm:$0xff] }
 0x1ad   : > { %5300 = vmatmul.mubr.bf16.gmra.mrb[12].mxu1 %v7404_v48  ;;  %5441 = vmatprep.subr.bf16.mxu0 %v7416_v20  ;;  %v3651_v2 = vpack.c.bf16 %v3620_v42, %v3619_v1  ;;  %v3297_v42 = vld [vmem:[#allocation2 + $0xba] sm:$0xff] }
 0x1ae   : > { %5303 = vmatprep.mubr.bf16.mxu1 %v7410_v32  ;;  %5336 = vmatpush3.bf16.msra.mxu1 %v5905_v51 }
 0x1af   : > { %5337 = vmatprep.subr.bf16.mxu1 %v5908_v35 }
 0x1b0   : > { %5442 = vmatpush3.bf16.msra.mxu0 %v7416_v20 }
 0x1b2   : > { %5338 = vmatpush3.bf16.msra.mxu1 %v5908_v35 }
 0x1b3   : > { %5375 = vmatprep.subr.bf16.mxu1 %v7424_v36  ;;  %5148 = vmatmul.mubr.bf16.gmra.mrb[52].mxu0 %v1664_v22  ;;  %v3626_v22 = vld [vmem:[#allocation2 + $0xa3] sm:$0xff] }
 0x1b4   : > { %5151 = vmatprep.mubr.bf16.mxu0 %v1665_v9  ;;  %v3628_v9 = vld [vmem:[#allocation2 + $0xb3] sm:$0xff] }
 0x1b5   : > { %5304 = vmatmul.mubr.bf16.gmra.mrb[16].mxu1 %v7427_v21  ;;  %v3655_v45 = vpack.c.bf16 %v3628_v9, %v3627_v52  ;;  %v3311_v9 = vld [vmem:[#allocation2 + $0x12a] sm:$0xff]  ;;  %v5919_v52 = vld [vmem:[%s7901_s3] sm:$0xff]  }
 0x1b6   : > { %5307 = vmatprep.mubr.bf16.mxu1 %v7431_v5  ;;  %5479 = vmatprep.subr.bf16.mxu0 %v5919_v52 }
 0x1bb   : > { %5152 = vmatmul.mubr.bf16.gmra.mrb[56].mxu0 %v7062_v0  ;;  %v2646_v0 = vld [vmem:[#allocation2 + $0x111] sm:$0xff] }
 0x1bc   : > { %5155 = vmatprep.mubr.bf16.mxu0 %v7075_v43  ;;  %v2647_v43 = vld [vmem:[#allocation2 + $0x119] sm:$0xff]  ;;  %v7451_v50 = vpack.c.bf16 %v2646_v0, %v2645_v39  ;;  %v3634_v0 = vld [vmem:[#allocation2 + $0xe3] sm:$0xff] }
 0x1bd   : > { %5308 = vmatmul.mubr.bf16.gmra.mrb[20].mxu1 %v7435_v7  ;;  %v7454_v17 = vpack.c.bf16 %v2648_v24, %v2647_v43  ;;  %v2982_v43 = vld [vmem:[#allocation2 + $0x141] sm:$0xff]  ;;  %v3279_v39 = vld [vmem:[#allocation2 + $0x2a] sm:$0xff] }
 0x1be   : > { %5311 = vmatprep.mubr.bf16.mxu1 %v7438_v44 }
 0x1c3   : > { %5156 = vmatmul.mubr.bf16.gmra.mrb[60].mxu0 %v7138_v26  ;;  %v2650_v26 = vld [vmem:[#allocation2 + $0x131] sm:$0xff] }
 0x1c4   : > { %5159 = vmatprep.mubr.bf16.mxu0 %v7148_v58  ;;  %v2649_v58 = vld [vmem:[#allocation2 + $0x129] sm:$0xff] }
 0x1c5   : > { %5312 = vmatmul.mubr.bf16.gmra.mrb[24].mxu1 %v7443_v47  ;;  %v7459_v51 = vpack.c.bf16 %v2650_v26, %v2649_v58  ;;  %v3281_v26 = vld [vmem:[#allocation2 + $0x3a] sm:$0xff] }
 0x1c6   : > { %5315 = vmatprep.mubr.bf16.mxu1 %v7446_v25 }
 0x1cb   : > { %5160 = vmatmul.mubr.bf16.gmra.mrb[64].mxu0 %v7194_v55  ;;  %v3613_v55 = vld [vmem:[#allocation2 + $0x3b] sm:$0xff] }
 0x1cc   : > { %5163 = vmatprep.mubr.bf16.mxu0 %v7196_v33  ;;  %v3614_v33 = vld [vmem:[#allocation2 + $0x43] sm:$0xff] }
 0x1cd   : > { %5316 = vmatmul.mubr.bf16.gmra.mrb[28].mxu1 %v7451_v50  ;;  %v3648_v49 = vpack.c.bf16 %v3614_v33, %v3613_v55  ;;  %v3287_v55 = vld [vmem:[#allocation2 + $0x6a] sm:$0xff] }
 0x1ce   : > { %5319 = vmatprep.mubr.bf16.mxu1 %v7454_v17 }
 0x1d3   : > { %5164 = vmatmul.mubr.bf16.gmra.mrb[68].mxu0 %v7200_v59  ;;  %v3617_v59 = vld [vmem:[#allocation2 + $0x5b] sm:$0xff] }
 0x1d4   : > { %5443 = vmatprep.mubr.bf16.mxu0 %v3647_v27 }
 0x1d5   : > { %5320 = vmatmul.mubr.bf16.gmra.mrb[32].mxu1 %v7459_v51 }
 0x1d6   : > { %5339 = vmatprep.mubr.bf16.mxu1 %v7327_v37  ;;  %v3618_v37 = vld [vmem:[#allocation2 + $0x63] sm:$0xff] }
 0x1d7   : > { %v3650_v35 = vpack.c.bf16 %v3618_v37, %v3617_v59  ;;  %v3296_v59 = vld [vmem:[#allocation2 + $0xb2] sm:$0xff] }
 0x1db   : > { %5444 = vmatmul.mubr.bf16.vlgmr.msra.gmra.mrb[72].mxu0 %v3648_v49  ;;  %v3292_v49 = vld [vmem:[#allocation2 + $0x92] sm:$0xff] }
 0x1dc   : > { %5447 = vmatprep.mubr.bf16.mxu0 %v3649_v18  ;;  %v3291_v18 = vld [vmem:[#allocation2 + $0x8a] sm:$0xff]  ;;  %5480 = vmatpush3.bf16.msra.mxu0 %v5919_v52 }
 0x1dd   : > { %5340 = vmatmul.mubr.bf16.vlgmr.msra.gmra.mrb[0].mxu1 %v7332_v6  ;;  %v5914_v6 = vld [vmem:[%s7900_s2 + $0x1d8] sm:$0xff]  }
 0x1de   : > { %5376 = vmatpush3.bf16.msra.mxu1 %v7424_v36  ;;  %5343 = vmatprep.mubr.bf16.mxu1 %v7352_v15  ;;  %v3621_v15 = vld [vmem:[#allocation2 + $0x7b] sm:$0xff]  ;;  %v3622_v36 = vld [vmem:[#allocation2 + $0x83] sm:$0xff] }
 0x1df   : > { %5377 = vmatprep.subr.bf16.mxu1 %v5912_v34  ;;  %v3652_v41 = vpack.c.bf16 %v3622_v36, %v3621_v15  ;;  %v3302_v15 = vld [vmem:[#allocation2 + $0xe2] sm:$0xff]  ;;  %v3304_v36 = vld [vmem:[#allocation2 + $0xf2] sm:$0xff] }
 0x1e2   : > { %5378 = vmatpush3.bf16.msra.mxu1 %v5912_v34  ;;  %v3293_v34 = vld [vmem:[#allocation2 + $0x9a] sm:$0xff] }
 0x1e3   : > { %5379 = vmatprep.subr.bf16.mxu1 %v5913_v61  ;;  %5448 = vmatmul.mubr.bf16.gmra.mrb[76].mxu0 %v3650_v35  ;;  %v3300_v35 = vld [vmem:[#allocation2 + $0xd2] sm:$0xff] }
 0x1e4   : > { %5451 = vmatprep.mubr.bf16.mxu0 %v3651_v2  ;;  %v3299_v2 = vld [vmem:[#allocation2 + $0xca] sm:$0xff] }
 0x1e5   : > { %5344 = vmatmul.mubr.bf16.gmra.mrb[4].mxu1 %v7358_v60  ;;  %v5916_v60 = vld [vmem:[%s7900_s2 + $0x1e8] sm:$0xff]  }
 0x1e6   : > { %5347 = vmatprep.mubr.bf16.mxu1 %v7378_v19  ;;  %5380 = vmatpush3.bf16.msra.mxu1 %v5913_v61  ;;  %v3625_v19 = vld [vmem:[#allocation2 + $0x9b] sm:$0xff]  ;;  %v3295_v61 = vld [vmem:[#allocation2 + $0xaa] sm:$0xff] }
 0x1e7   : > { %5381 = vmatprep.subr.bf16.mxu1 %v5914_v6  ;;  %v3654_v10 = vpack.c.bf16 %v3626_v22, %v3625_v19  ;;  %v3307_v19 = vld [vmem:[#allocation2 + $0x10a] sm:$0xff] }
 0x1ea   : > { %5382 = vmatpush3.bf16.msra.mxu1 %v5914_v6  ;;  %v3325_v6 = vpack.c.bf16 %v3300_v35, %v3299_v2  ;;  %v5924_v35 = vld [vmem:[%s7901_s3 + $0x28] sm:$0xff]  }
 0x1eb   : > { %5383 = vmatprep.subr.bf16.mxu1 %v5915_v12  ;;  %5452 = vmatmul.mubr.bf16.gmra.mrb[80].mxu0 %v3652_v41  ;;  %v3327_v41 = vpack.c.bf16 %v3304_v36, %v3303_v63  ;;  %v5926_v36 = vld [vmem:[%s7901_s3 + $0x38] sm:$0xff]  }
 0x1ec   : > { %5455 = vmatprep.mubr.bf16.mxu0 %v3653_v31  ;;  %v3308_v31 = vld [vmem:[#allocation2 + $0x112] sm:$0xff] }
 0x1ed   : > { %5348 = vmatmul.mubr.bf16.gmra.mrb[8].mxu1 %v7384_v3  ;;  %v5918_v3 = vld [vmem:[%s7900_s2 + $0x1f8] sm:$0xff]   ;;  %v3329_v22 = vpack.c.bf16 %v3308_v31, %v3307_v19 }
 0x1ee   : > { %5351 = vmatprep.mubr.bf16.mxu1 %v7404_v48  ;;  %5384 = vmatpush3.bf16.msra.mxu1 %v5915_v12  ;;  %v3629_v48 = vld [vmem:[#allocation2 + $0xbb] sm:$0xff] }
 0x1ef   : > { %5385 = vmatprep.subr.bf16.mxu1 %v5916_v60  ;;  %v3656_v8 = vpack.c.bf16 %v3630_v4, %v3629_v48  ;;  %v3313_v4 = vld [vmem:[#allocation2 + $0x13a] sm:$0xff] }
 0x1f0   : > { %v3332_v11 = vpack.c.bf16 %v3314_v46, %v3313_v4 }
 0x1f2   : > { %5386 = vmatpush3.bf16.msra.mxu1 %v5916_v60 }
 0x1f3   : > { %5387 = vmatprep.subr.bf16.mxu1 %v5917_v54  ;;  %5456 = vmatmul.mubr.bf16.gmra.mrb[84].mxu0 %v3654_v10  ;;  %v3312_v10 = vld [vmem:[#allocation2 + $0x132] sm:$0xff] }
 0x1f4   : > { %5459 = vmatprep.mubr.bf16.mxu0 %v3655_v45  ;;  %v5920_v45 = vld [vmem:[%s7901_s3 + $0x8] sm:$0xff]   ;;  %v3331_v48 = vpack.c.bf16 %v3312_v10, %v3311_v9 }
 0x1f5   : > { %5352 = vmatmul.mubr.bf16.gmra.mrb[12].mxu1 %v7410_v32  ;;  %v3633_v32 = vld [vmem:[#allocation2 + $0xdb] sm:$0xff]  ;;  %5481 = vmatprep.subr.bf16.mxu0 %v5920_v45 }
 0x1f6   : > { %5355 = vmatprep.mubr.bf16.mxu1 %v7427_v21  ;;  %5388 = vmatpush3.bf16.msra.mxu1 %v5917_v54  ;;  %v3658_v21 = vpack.c.bf16 %v3634_v0, %v3633_v32  ;;  %v3310_v54 = vld [vmem:[#allocation2 + $0x122] sm:$0xff]  ;;  %v5922_v32 = vld [vmem:[%s7901_s3 + $0x18] sm:$0xff]   ;;  %v3635_v0 = vld [vmem:[#allocation2 + $0xeb] sm:$0xff] }
 0x1f7   : > { %5389 = vmatprep.subr.bf16.mxu1 %v5918_v3  ;;  %5482 = vmatpush3.bf16.msra.mxu0 %v5920_v45 }
 0x1fa   : > { %5390 = vmatpush3.bf16.msra.mxu1 %v5918_v3 }
 0x1fb   : > { %5531 = vmatprep.subr.bf16.mxu1 %v7259_v29  ;;  %5460 = vmatmul.mubr.bf16.gmra.mrb[88].mxu0 %v3656_v8  ;;  %v5921_v8 = vld [vmem:[%s7901_s3 + $0x10] sm:$0xff]  }
 0x1fc   : > { %5463 = vmatprep.mubr.bf16.mxu0 %v3657_v40  ;;  %v3636_v40 = vld [vmem:[#allocation2 + $0xf3] sm:$0xff]  ;;  %5483 = vmatprep.subr.bf16.mxu0 %v5921_v8 }
 0x1fd   : > { %5356 = vmatmul.mubr.bf16.gmra.mrb[16].mxu1 %v7431_v5  ;;  %v2981_v5 = vld [vmem:[#allocation2 + $0x139] sm:$0xff]  ;;  %5484 = vmatpush3.bf16.msra.mxu0 %v5921_v8 }
 0x1fe   : > { %5359 = vmatprep.mubr.bf16.mxu1 %v7435_v7  ;;  %v3000_v24 = vpack.c.bf16 %v2982_v43, %v2981_v5  ;;  %v3280_v7 = vld [vmem:[#allocation2 + $0x32] sm:$0xff]  ;;  %5485 = vmatprep.subr.bf16.mxu0 %v5922_v32  ;;  %v5923_v5 = vld [vmem:[%s7901_s3 + $0x20] sm:$0xff]  }
 0x1ff   : > { %v3315_v58 = vpack.c.bf16 %v3280_v7, %v3279_v39  ;;  %v3637_v7 = vld [vmem:[#allocation2 + $0xfb] sm:$0xff]  ;;  %v3638_v39 = vld [vmem:[#allocation2 + $0x103] sm:$0xff] }
 0x201   : > { %5486 = vmatpush3.bf16.msra.mxu0 %v5922_v32 }
 0x202   : > { %5487 = vmatprep.subr.bf16.mxu0 %v5923_v5 }
 0x203   : > { %5464 = vmatmul.mubr.bf16.gmra.mrb[92].mxu0 %v3658_v21  ;;  %v3659_v21 = vpack.c.bf16 %v3636_v40, %v3635_v0 }
 0x205   : > { %5360 = vmatmul.mubr.bf16.gmra.mrb[20].mxu1 %v7438_v44  ;;  %v3282_v44 = vld [vmem:[#allocation2 + $0x42] sm:$0xff]  ;;  %5488 = vmatpush3.bf16.msra.mxu0 %v5923_v5 }
 0x206   : > { %5363 = vmatprep.mubr.bf16.mxu1 %v7443_v47  ;;  %v3316_v47 = vpack.c.bf16 %v3282_v44, %v3281_v26  ;;  %v3640_v26 = vld [vmem:[#allocation2 + $0x113] sm:$0xff]  ;;  %5489 = vmatprep.subr.bf16.mxu0 %v5924_v35 }
 0x209   : > { %5490 = vmatpush3.bf16.msra.mxu0 %v5924_v35 }
 0x20d   : > { %5364 = vmatmul.mubr.bf16.gmra.mrb[24].mxu1 %v7446_v25  ;;  %v3317_v25 = vpack.c.bf16 %v3284_v56, %v3283_v23  ;;  %v3660_v56 = vpack.c.bf16 %v3638_v39, %v3637_v7 }
 0x20e   : > { %5367 = vmatprep.mubr.bf16.mxu1 %v7451_v50  ;;  %v3285_v50 = vld [vmem:[#allocation2 + $0x5a] sm:$0xff] }
 0x215   : > { %5368 = vmatmul.mubr.bf16.gmra.mrb[28].mxu1 %v7454_v17  ;;  %v3286_v17 = vld [vmem:[#allocation2 + $0x62] sm:$0xff] }
 0x216   : > { %5371 = vmatprep.mubr.bf16.mxu1 %v7459_v51  ;;  %v3288_v51 = vld [vmem:[#allocation2 + $0x72] sm:$0xff]  ;;  %v3318_v27 = vpack.c.bf16 %v3286_v17, %v3285_v50  ;;  %v3641_v17 = vld [vmem:[#allocation2 + $0x11b] sm:$0xff] }
 0x217   : > { %v3319_v33 = vpack.c.bf16 %v3288_v51, %v3287_v55  ;;  %v3642_v51 = vld [vmem:[#allocation2 + $0x123] sm:$0xff]  ;;  %v3643_v55 = vld [vmem:[#allocation2 + $0x12b] sm:$0xff] }
 0x21d   : > { %5372 = vmatmul.mubr.bf16.gmra.mrb[32].mxu1 %v3000_v24 }
 0x21e   : > { %5391 = vmatprep.mubr.bf16.mxu1 %v3315_v58 }
 0x225   : > { %5392 = vmatmul.mubr.bf16.vlgmr.msra.gmra.mrb[0].mxu1 %v3316_v47  ;;  %v3639_v47 = vld [vmem:[#allocation2 + $0x10b] sm:$0xff] }
 0x226   : > { %5539 = vmatpush3.bf16.msra.mxu1 %v7259_v29  ;;  %5395 = vmatprep.mubr.bf16.mxu1 %v3317_v25  ;;  %v3289_v29 = vld [vmem:[#allocation2 + $0x7a] sm:$0xff]  ;;  %v3661_v23 = vpack.c.bf16 %v3640_v26, %v3639_v47 }
 0x227   : > { %5532 = vmatprep.subr.bf16.mxu1 %v7337_v38  ;;  %v3320_v13 = vpack.c.bf16 %v3290_v57, %v3289_v29  ;;  %v3662_v57 = vpack.c.bf16 %v3642_v51, %v3641_v17 }
 0x22a   : > { %5540 = vmatpush3.bf16.msra.mxu1 %v7337_v38  ;;  %v3321_v38 = vpack.c.bf16 %v3292_v49, %v3291_v18  ;;  %v3646_v18 = vld [vmem:[#allocation2 + $0x143] sm:$0xff] }
 0x22b   : > { %5533 = vmatprep.subr.bf16.mxu1 %v7350_v28 }
 0x22d   : > { %5396 = vmatmul.mubr.bf16.gmra.mrb[4].mxu1 %v3318_v27 }
 0x22e   : > { %5399 = vmatprep.mubr.bf16.mxu1 %v3319_v33  ;;  %5541 = vmatpush3.bf16.msra.mxu1 %v7350_v28  ;;  %v3294_v28 = vld [vmem:[#allocation2 + $0xa2] sm:$0xff]  ;;  %v3644_v33 = vld [vmem:[#allocation2 + $0x133] sm:$0xff] }
 0x22f   : > { %5534 = vmatprep.subr.bf16.mxu1 %v7364_v62  ;;  %v3322_v37 = vpack.c.bf16 %v3294_v28, %v3293_v34  ;;  %v3663_v49 = vpack.c.bf16 %v3644_v33, %v3643_v55 }
 0x232   : > { %5542 = vmatpush3.bf16.msra.mxu1 %v7364_v62  ;;  %v3323_v62 = vpack.c.bf16 %v3296_v59, %v3295_v61 }
 0x233   : > { %5535 = vmatprep.subr.bf16.mxu1 %v7376_v53 }
 0x235   : > { %5400 = vmatmul.mubr.bf16.gmra.mrb[8].mxu1 %v3320_v13  ;;  %v3645_v13 = vld [vmem:[#allocation2 + $0x13b] sm:$0xff] }
 0x236   : > { %5403 = vmatprep.mubr.bf16.mxu1 %v3321_v38  ;;  %5543 = vmatpush3.bf16.msra.mxu1 %v7376_v53  ;;  %v3298_v53 = vld [vmem:[#allocation2 + $0xc2] sm:$0xff]  ;;  %v3664_v59 = vpack.c.bf16 %v3646_v18, %v3645_v13 }
 0x237   : > { %5536 = vmatprep.subr.bf16.mxu1 %v7390_v14  ;;  %v3324_v1 = vpack.c.bf16 %v3298_v53, %v3297_v42 }
 0x23a   : > { %5544 = vmatpush3.bf16.msra.mxu1 %v7390_v14  ;;  %v3301_v14 = vld [vmem:[#allocation2 + $0xda] sm:$0xff] }
 0x23b   : > { %5537 = vmatprep.subr.bf16.mxu1 %v7402_v16  ;;  %v3326_v12 = vpack.c.bf16 %v3302_v15, %v3301_v14 }
 0x23d   : > { %5404 = vmatmul.mubr.bf16.gmra.mrb[12].mxu1 %v3322_v37 }
 0x23e   : > { %5407 = vmatprep.mubr.bf16.mxu1 %v3323_v62  ;;  %5545 = vmatpush3.bf16.msra.mxu1 %v7402_v16  ;;  %v3305_v16 = vld [vmem:[#allocation2 + $0xfa] sm:$0xff] }
 0x23f   : > { %5538 = vmatprep.subr.bf16.mxu1 %v7416_v20  ;;  %v3328_v60 = vpack.c.bf16 %v3306_v30, %v3305_v16 }
 0x242   : > { %5546 = vmatpush3.bf16.msra.mxu1 %v7416_v20  ;;  %v3309_v20 = vld [vmem:[#allocation2 + $0x11a] sm:$0xff] }
 0x243   : > { %v3330_v3 = vpack.c.bf16 %v3310_v54, %v3309_v20 }
 0x245   : > { %5408 = vmatmul.mubr.bf16.gmra.mrb[16].mxu1 %v3324_v1  ;;  %v5925_v1 = vld [vmem:[%s7901_s3 + $0x30] sm:$0xff]  }
 0x246   : > { %5411 = vmatprep.mubr.bf16.mxu1 %v3325_v6  ;;  %5491 = vmatprep.subr.bf16.mxu0 %v5925_v1 }
 0x247   : > { %5492 = vmatpush3.bf16.msra.mxu0 %v5925_v1 }
 0x248   : > { %5493 = vmatprep.subr.bf16.mxu0 %v5926_v36 }
 0x24b   : > { %5494 = vmatpush3.bf16.msra.mxu0 %v5926_v36  ;;  %v7650_v36 = vld [vmem:[%s7903_s5] ss:$0 sm:$0xff] }
 0x24d   : > { %5412 = vmatmul.mubr.bf16.gmra.mrb[20].mxu1 %v3326_v12 }
 0x24e   : > { %5415 = vmatprep.mubr.bf16.mxu1 %v3327_v41 }
 0x255   : > { %5416 = vmatmul.mubr.bf16.gmra.mrb[24].mxu1 %v3328_v60 }
 0x256   : > { %5419 = vmatprep.mubr.bf16.mxu1 %v3329_v22 }
 0x25d   : > { %5420 = vmatmul.mubr.bf16.gmra.mrb[28].mxu1 %v3330_v3 }
 0x25e   : > { %5423 = vmatprep.mubr.bf16.mxu1 %v3331_v48 }
 0x265   : > { %5424 = vmatmul.mubr.bf16.gmra.mrb[32].mxu1 %v3332_v11 }
 0x266   : > { %5467 = vmatprep.mubr.bf16.mxu1 %v3659_v21  ;;  %v7533_v43 = vpop.f32.mrb[36].mxu0 }
 0x267   : > { %v7535_v24 = vpop.f32.mrb[37].mxu0 }
 0x268   : > { %v7537_v58 = vpop.f32.mrb[38].mxu0 }
 0x269   : > { %v7539_v44 = vpop.f32.mrb[39].mxu0 }
 0x26d   : > { %5468 = vmatmul.mubr.bf16.vlgmr.msra.gmra.mrb[24].mxu1 %v3660_v56 }
 0x26e   : > { %5471 = vmatprep.mubr.bf16.mxu1 %v3661_v23  ;;  %v7541_v25 = vpop.f32.mrb[40].mxu0 }
 0x26f   : > { %v7543_v50 = vpop.f32.mrb[41].mxu0 }
 0x270   : > { %v7545_v27 = vpop.f32.mrb[42].mxu0 }
 0x271   : > { %v7547_v29 = vpop.f32.mrb[43].mxu0 }
 0x275   : > { %5472 = vmatmul.mubr.bf16.gmra.mrb[28].mxu1 %v3662_v57 }
 0x276   : > { %5475 = vmatprep.mubr.bf16.mxu1 %v3663_v49  ;;  %v7549_v38 = vpop.f32.mrb[44].mxu0 }
 0x277   : > { %v7551_v34 = vpop.f32.mrb[45].mxu0 }
 0x278   : > { %v7553_v28 = vpop.f32.mrb[46].mxu0 }
 0x279   : > { %v7555_v37 = vpop.f32.mrb[47].mxu0 }
 0x27d   : > { %5476 = vmatmul.mubr.bf16.gmra.mrb[32].mxu1 %v3664_v59 }
 0x27e   : > { %v7557_v61 = vpop.f32.mrb[48].mxu0 }
 0x27f   : > { %v7559_v62 = vpop.f32.mrb[49].mxu0 }
 0x280   : > { %v7561_v42 = vpop.f32.mrb[50].mxu0 }
 0x281   : > { %v7563_v53 = vpop.f32.mrb[51].mxu0 }
 0x286   : > { %v7571_v2 = vpop.f32.mrb[52].mxu0 }
 0x287   : > { %v7573_v6 = vpop.f32.mrb[53].mxu0 }
 0x288   : > { %v7575_v14 = vpop.f32.mrb[54].mxu0 }
 0x289   : > { %v7577_v15 = vpop.f32.mrb[55].mxu0 }
 0x28e   : > { %v7582_v12 = vpop.f32.mrb[56].mxu0 }
 0x28f   : > { %v7584_v63 = vpop.f32.mrb[57].mxu0 }
 0x290   : > { %v7586_v41 = vpop.f32.mrb[58].mxu0 }
 0x291   : > { %v7588_v16 = vpop.f32.mrb[59].mxu0 }
 0x296   : > { %v7590_v30 = vpop.f32.mrb[60].mxu0 }
 0x297   : > { %8033 = vst [vmem:[#allocation3_spill] sm:$0xff] %v7590_v30  ;;  %v7592_v31 = vpop.f32.mrb[61].mxu0 }
 0x298   : > { %8034 = vst [vmem:[#allocation4_spill] sm:$0xff] %v7592_v31  ;;  %v7594_v60 = vpop.f32.mrb[62].mxu0 }
 0x299   : > { %8035 = vst [vmem:[#allocation5_spill] sm:$0xff] %v7594_v60  ;;  %v7596_v19 = vpop.f32.mrb[63].mxu0 }
 0x29a   : > { %8036 = vst [vmem:[#allocation6_spill] sm:$0xff] %v7596_v19 }
 0x29e   : > { %v7598_v22 = vpop.f32.mrb[64].mxu0 }
 0x29f   : > { %8037 = vst [vmem:[#allocation7_spill] sm:$0xff] %v7598_v22  ;;  %v7600_v20 = vpop.f32.mrb[65].mxu0 }
 0x2a0   : > { %8038 = vst [vmem:[#allocation8_spill] sm:$0xff] %v7600_v20  ;;  %v7602_v54 = vpop.f32.mrb[66].mxu0 }
 0x2a1   : > { %8039 = vst [vmem:[#allocation9_spill] sm:$0xff] %v7602_v54  ;;  %v7604_v9 = vpop.f32.mrb[67].mxu0 }
 0x2a2   : > { %8040 = vst [vmem:[#allocation10_spill] sm:$0xff] %v7604_v9 }
 0x2a6   : > { %v7606_v10 = vpop.f32.mrb[68].mxu0 }
 0x2a7   : > { %8041 = vst [vmem:[#allocation11_spill] sm:$0xff] %v7606_v10  ;;  %v7608_v52 = vpop.f32.mrb[69].mxu0 }
 0x2a8   : > { %8042 = vst [vmem:[#allocation12_spill] sm:$0xff] %v7608_v52  ;;  %v7610_v45 = vpop.f32.mrb[70].mxu0 }
 0x2a9   : > { %8043 = vst [vmem:[#allocation13_spill] sm:$0xff] %v7610_v45  ;;  %v7612_v3 = vpop.f32.mrb[71].mxu0 }
 0x2aa   : > { %8044 = vst [vmem:[#allocation14_spill] sm:$0xff] %v7612_v3 }
 0x2ae   : > { %v5445_v48 = vpop.f32.mrb[72].mxu0 }
 0x2af   : > { %v3764_v4 = vpop.f32.mrb[73].mxu0 }
 0x2b0   : > { %v5446_v46 = vpop.f32.mrb[74].mxu0 }
 0x2b1   : > { %v3767_v8 = vpop.f32.mrb[75].mxu0 }
 0x2b6   : > { %v5449_v11 = vpop.f32.mrb[76].mxu0 }
 0x2b7   : > { %v3780_v40 = vpop.f32.mrb[77].mxu0 }
 0x2b8   : > { %v5450_v32 = vpop.f32.mrb[78].mxu0 }
 0x2b9   : > { %v3783_v0 = vpop.f32.mrb[79].mxu0 }
 0x2be   : > { %v7614_v21 = vpop.f32.mrb[80].mxu0 }
 0x2bf   : > { %v7616_v5 = vpop.f32.mrb[81].mxu0 }
 0x2c0   : > { %v7618_v7 = vpop.f32.mrb[82].mxu0 }
 0x2c1   : > { %v7620_v39 = vpop.f32.mrb[83].mxu0 }
 0x2c6   : > { %v7622_v26 = vpop.f32.mrb[84].mxu0 }
 0x2c7   : > { %v7624_v56 = vpop.f32.mrb[85].mxu0 }
 0x2c8   : > { %v7626_v47 = vpop.f32.mrb[86].mxu0 }
 0x2c9   : > { %v7628_v23 = vpop.f32.mrb[87].mxu0 }
 0x2ce   : > { %v7630_v17 = vpop.f32.mrb[88].mxu0 }
 0x2cf   : > { %v7632_v51 = vpop.f32.mrb[89].mxu0 }
 0x2d0   : > { %v7634_v55 = vpop.f32.mrb[90].mxu0 }
 0x2d1   : > { %v7636_v33 = vpop.f32.mrb[91].mxu0 }
 0x2d6   : > { %v7638_v57 = vpop.f32.mrb[92].mxu0 }
 0x2d7   : > { %v7640_v49 = vpop.f32.mrb[93].mxu0 }
 0x2d8   : > { %v7642_v13 = vpop.f32.mrb[94].mxu0 }
 0x2d9   : > { %v7644_v18 = vpop.f32.mrb[95].mxu0 }
 0x2f8   : > { %v5393_v59 = vpop.f32.mrb[0].mxu1 }
 0x2f9   : > { %v5547_v35 = vadd.f32 %v5393_v59, %v7533_v43  ;;  %v3432_v1 = vpop.f32.mrb[1].mxu1 }
 0x2fa   : > { %v5549_v3 = vadd.f32 %v3432_v1, %v7535_v24  ;;  %v5394_v45 = vpop.f32.mrb[2].mxu1 }
 0x2fb   : > { %v5548_v52 = vadd.f32 %v5547_v35, %v5445_v48  ;;  %v5551_v10 = vadd.f32 %v5394_v45, %v7537_v58  ;;  %v3435_v9 = vpop.f32.mrb[3].mxu1 }
 0x2fc   : > { %v5550_v54 = vadd.f32 %v5549_v3, %v3764_v4  ;;  %v5553_v20 = vadd.f32 %v3435_v9, %v7539_v44 }
 0x2fd   : > { %v3952_v22 = vadd.f32 %v5548_v52, %v7650_v36  ;;  %v5552_v19 = vadd.f32 %v5551_v10, %v5446_v46 }
 0x2fe   : > { %v3950_v43 = vadd.f32 %v5550_v54, %v7650_v36  ;;  %v5554_v59 = vadd.f32 %v5553_v20, %v3767_v8 }
 0x2ff   : > { %v3953_v60 = vadd.f32 %v5552_v19, %v7650_v36  ;;  %v3988_v24 = vmax.f32 %v3952_v22, 0.0 }
 0x300   : > { %v3951_v31 = vadd.f32 %v5554_v59, %v7650_v36  ;;  %v5397_v30 = vpop.f32.mrb[4].mxu1  ;;  %v3986_v45 = vmax.f32 %v3950_v43, 0.0 }
 0x301   : > { %v3989_v1 = vmax.f32 %v3953_v60, 0.0  ;;  %v5555_v48 = vadd.f32 %v5397_v30, %v7541_v25  ;;  %v3448_v58 = vpop.f32.mrb[5].mxu1 }
 0x302   : > { %v3987_v3 = vmax.f32 %v3951_v31, 0.0  ;;  %v5557_v44 = vadd.f32 %v3448_v58, %v7543_v50  ;;  %v5398_v9 = vpop.f32.mrb[6].mxu1 }
 0x303   : > { %v4023_v52 = vpack.c.bf16 %v3989_v1, %v3988_v24  ;;  %v5556_v10 = vadd.f32 %v5555_v48, %v5449_v11  ;;  %v5559_v54 = vadd.f32 %v5398_v9, %v7545_v27  ;;  %v3451_v20 = vpop.f32.mrb[7].mxu1 }
 0x304   : > { %v5558_v4 = vadd.f32 %v5557_v44, %v3780_v40  ;;  %v5561_v19 = vadd.f32 %v3451_v20, %v7547_v29  ;;  %v4022_v46 = vpack.c.bf16 %v3987_v3, %v3986_v45 }
 0x305   : > { %v3956_v22 = vadd.f32 %v5556_v10, %v7650_v36  ;;  %v5560_v60 = vadd.f32 %v5559_v54, %v5450_v32 }
 0x306   : > { %v3954_v25 = vadd.f32 %v5558_v4, %v7650_v36  ;;  %v5562_v30 = vadd.f32 %v5561_v19, %v3783_v0  ;;  %5495 = vmatprep.mubr.bf16.mxu0 %v4022_v46 }
 0x307   : > { %v3957_v31 = vadd.f32 %v5560_v60, %v7650_v36  ;;  %5496 = vmatmul.mubr.bf16.vlgmr.msra.gmra.mrb[96].mxu0 %v4023_v52  ;;  %v3992_v11 = vmax.f32 %v3956_v22, 0.0 }
 0x308   : > { %v3955_v50 = vadd.f32 %v5562_v30, %v7650_v36  ;;  %v5401_v8 = vpop.f32.mrb[8].mxu1  ;;  %v3990_v29 = vmax.f32 %v3954_v25, 0.0 }
 0x309   : > { %v3993_v27 = vmax.f32 %v3957_v31, 0.0  ;;  %v5563_v40 = vadd.f32 %v5401_v8, %v7549_v38  ;;  %v3464_v35 = vpop.f32.mrb[9].mxu1 }
 0x30a   : > { %v3991_v43 = vmax.f32 %v3955_v50, 0.0  ;;  %v5565_v59 = vadd.f32 %v3464_v35, %v7551_v34  ;;  %v5402_v32 = vpop.f32.mrb[10].mxu1 }
 0x30b   : > { %v5564_v24 = vadd.f32 %v5563_v40, %v7614_v21  ;;  %v5567_v0 = vadd.f32 %v5402_v32, %v7553_v28  ;;  %v3467_v1 = vpop.f32.mrb[11].mxu1  ;;  %v4025_v48 = vpack.c.bf16 %v3993_v27, %v3992_v11 }
 0x30c   : > { %v5566_v58 = vadd.f32 %v5565_v59, %v7616_v5  ;;  %v5569_v45 = vadd.f32 %v3467_v1, %v7555_v37  ;;  %v4024_v3 = vpack.c.bf16 %v3991_v43, %v3990_v29 }
 0x30d   : > { %v3960_v44 = vadd.f32 %v5564_v24, %v7650_v36  ;;  %v5568_v38 = vadd.f32 %v5567_v0, %v7618_v7 }
 0x30e   : > { %v3958_v9 = vadd.f32 %v5566_v58, %v7650_v36  ;;  %v5570_v34 = vadd.f32 %v5569_v45, %v7620_v39  ;;  %5499 = vmatprep.mubr.bf16.mxu0 %v4024_v3 }
 0x30f   : > { %v3961_v21 = vadd.f32 %v5568_v38, %v7650_v36  ;;  %5500 = vmatmul.mubr.bf16.gmra.mrb[100].mxu0 %v4025_v48  ;;  %v3996_v10 = vmax.f32 %v3960_v44, 0.0 }
 0x310   : > { %v3959_v28 = vadd.f32 %v5570_v34, %v7650_v36  ;;  %v5405_v52 = vpop.f32.mrb[12].mxu1  ;;  %v3994_v20 = vmax.f32 %v3958_v9, 0.0 }
 0x311   : > { %v3997_v5 = vmax.f32 %v3961_v21, 0.0  ;;  %v5571_v37 = vadd.f32 %v5405_v52, %v7557_v61  ;;  %v3480_v54 = vpop.f32.mrb[13].mxu1 }
 0x312   : > { %v3995_v4 = vmax.f32 %v3959_v28, 0.0  ;;  %v5573_v7 = vadd.f32 %v3480_v54, %v7559_v62  ;;  %v5406_v19 = vpop.f32.mrb[14].mxu1 }
 0x313   : > { %v5572_v46 = vadd.f32 %v5571_v37, %v7622_v26  ;;  %v5575_v39 = vadd.f32 %v5406_v19, %v7561_v42  ;;  %v3483_v22 = vpop.f32.mrb[15].mxu1  ;;  %v4027_v60 = vpack.c.bf16 %v3997_v5, %v3996_v10 }
 0x314   : > { %v5574_v25 = vadd.f32 %v5573_v7, %v7624_v56  ;;  %v5577_v30 = vadd.f32 %v3483_v22, %v7563_v53  ;;  %v4026_v31 = vpack.c.bf16 %v3995_v4, %v3994_v20 }
 0x315   : > { %v3964_v50 = vadd.f32 %v5572_v46, %v7650_v36  ;;  %v5576_v61 = vadd.f32 %v5575_v39, %v7626_v47 }
 0x316   : > { %v3962_v8 = vadd.f32 %v5574_v25, %v7650_v36  ;;  %v5578_v62 = vadd.f32 %v5577_v30, %v7628_v23  ;;  %5503 = vmatprep.mubr.bf16.mxu0 %v4026_v31  ;;  %v8046_v30 = vld [vmem:[#allocation4_spill] sm:$0xff] }
 0x317   : > { %v3965_v26 = vadd.f32 %v5576_v61, %v7650_v36  ;;  %5504 = vmatmul.mubr.bf16.gmra.mrb[104].mxu0 %v4027_v60  ;;  %v4000_v27 = vmax.f32 %v3964_v50, 0.0  ;;  %v8047_v61 = vld [vmem:[#allocation5_spill] sm:$0xff] }
 0x318   : > { %v3963_v42 = vadd.f32 %v5578_v62, %v7650_v36  ;;  %v5409_v11 = vpop.f32.mrb[16].mxu1  ;;  %v3998_v35 = vmax.f32 %v3962_v8, 0.0 }
 0x319   : > { %v4001_v56 = vmax.f32 %v3965_v26, 0.0  ;;  %v5579_v53 = vadd.f32 %v5409_v11, %v7571_v2  ;;  %v3496_v40 = vpop.f32.mrb[17].mxu1 }
 0x31a   : > { %v3999_v29 = vmax.f32 %v3963_v42, 0.0  ;;  %v5581_v47 = vadd.f32 %v3496_v40, %v7573_v6  ;;  %v5410_v43 = vpop.f32.mrb[18].mxu1  ;;  %v8048_v42 = vld [vmem:[#allocation6_spill] sm:$0xff] }
 0x31b   : > { %v5580_v59 = vadd.f32 %v5579_v53, %v7630_v17  ;;  %v5583_v23 = vadd.f32 %v5410_v43, %v7575_v14  ;;  %v3499_v32 = vpop.f32.mrb[19].mxu1  ;;  %v4029_v24 = vpack.c.bf16 %v4001_v56, %v4000_v27  ;;  %v8049_v43 = vld [vmem:[#allocation7_spill] sm:$0xff] }
 0x31c   : > { %v5582_v0 = vadd.f32 %v5581_v47, %v7632_v51  ;;  %v5585_v1 = vadd.f32 %v3499_v32, %v7577_v15  ;;  %v4028_v48 = vpack.c.bf16 %v3999_v29, %v3998_v35 }
 0x31d   : > { %v3968_v58 = vadd.f32 %v5580_v59, %v7650_v36  ;;  %v5584_v2 = vadd.f32 %v5583_v23, %v7634_v55 }
 0x31e   : > { %v3966_v45 = vadd.f32 %v5582_v0, %v7650_v36  ;;  %v5586_v6 = vadd.f32 %v5585_v1, %v7636_v33  ;;  %5507 = vmatprep.mubr.bf16.mxu0 %v4028_v48 }
 0x31f   : > { %v3969_v17 = vadd.f32 %v5584_v2, %v7650_v36  ;;  %5508 = vmatmul.mubr.bf16.gmra.mrb[108].mxu0 %v4029_v24  ;;  %v4004_v44 = vmax.f32 %v3968_v58, 0.0  ;;  %v8050_v24 = vld [vmem:[#allocation8_spill] sm:$0xff]  ;;  %v8051_v2 = vld [vmem:[#allocation9_spill] sm:$0xff] }
 0x320   : > { %v3967_v14 = vadd.f32 %v5586_v6, %v7650_v36  ;;  %v5413_v3 = vpop.f32.mrb[20].mxu1  ;;  %v4002_v9 = vmax.f32 %v3966_v45, 0.0 }
 0x321   : > { %v4005_v51 = vmax.f32 %v3969_v17, 0.0  ;;  %v5587_v15 = vadd.f32 %v5413_v3, %v7582_v12  ;;  %v3512_v38 = vpop.f32.mrb[21].mxu1 }
 0x322   : > { %v4003_v34 = vmax.f32 %v3967_v14, 0.0  ;;  %v5589_v55 = vadd.f32 %v3512_v38, %v7584_v63  ;;  %v5414_v21 = vpop.f32.mrb[22].mxu1  ;;  %v8052_v14 = vld [vmem:[#allocation10_spill] sm:$0xff] }
 0x323   : > { %v5588_v28 = vadd.f32 %v5587_v15, %v7638_v57  ;;  %v5591_v33 = vadd.f32 %v5414_v21, %v7586_v41  ;;  %v3515_v52 = vpop.f32.mrb[23].mxu1  ;;  %v4031_v10 = vpack.c.bf16 %v4005_v51, %v4004_v44  ;;  %v8053_v21 = vld [vmem:[#allocation11_spill] sm:$0xff] }
 0x324   : > { %v5590_v5 = vadd.f32 %v5589_v55, %v7640_v49  ;;  %v5593_v37 = vadd.f32 %v3515_v52, %v7588_v16  ;;  %v4030_v54 = vpack.c.bf16 %v4003_v34, %v4002_v9 }
 0x325   : > { %v3972_v20 = vadd.f32 %v5588_v28, %v7650_v36  ;;  %v5592_v12 = vadd.f32 %v5591_v33, %v7642_v13  ;;  %v8045_v13 = vld [vmem:[#allocation3_spill] sm:$0xff] }
 0x326   : > { %v3970_v4 = vadd.f32 %v5590_v5, %v7650_v36  ;;  %v5594_v63 = vadd.f32 %v5593_v37, %v7644_v18  ;;  %5511 = vmatprep.mubr.bf16.mxu0 %v4030_v54 }
 0x327   : > { %v3973_v57 = vadd.f32 %v5592_v12, %v7650_v36  ;;  %5512 = vmatmul.mubr.bf16.gmra.mrb[112].mxu0 %v4031_v10  ;;  %v4008_v7 = vmax.f32 %v3972_v20, 0.0  ;;  %v8054_v10 = vld [vmem:[#allocation12_spill] sm:$0xff]  ;;  %v8055_v12 = vld [vmem:[#allocation13_spill] sm:$0xff] }
 0x328   : > { %v3971_v41 = vadd.f32 %v5594_v63, %v7650_v36  ;;  %v4006_v49 = vmax.f32 %v3970_v4, 0.0 }
 0x329   : > { %v4009_v19 = vmax.f32 %v3973_v57, 0.0 }
 0x32a   : > { %v4007_v46 = vmax.f32 %v3971_v41, 0.0  ;;  %v8056_v41 = vld [vmem:[#allocation14_spill] sm:$0xff] }
 0x32b   : > { %v4033_v16 = vpack.c.bf16 %v4009_v19, %v4008_v7 }
 0x32c   : > { %v4032_v39 = vpack.c.bf16 %v4007_v46, %v4006_v49 }
 0x32e   : > { %5515 = vmatprep.mubr.bf16.mxu0 %v4032_v39 }
 0x32f   : > { %5516 = vmatmul.mubr.bf16.gmra.mrb[116].mxu0 %v4033_v16 }
 0x340   : > { %v5469_v22 = vpop.f32.mrb[24].mxu1 }
 0x341   : > { %v5595_v60 = vadd.f32 %v5469_v22, %v8045_v13  ;;  %v3860_v25 = vpop.f32.mrb[25].mxu1 }
 0x342   : > { %v5596_v18 = vadd.f32 %v3860_v25, %v8046_v30  ;;  %v5470_v31 = vpop.f32.mrb[26].mxu1  ;;  %v7742_v25 = vld [vmem:[%s7904_s6] ss:$0 sm:$0xff] }
 0x343   : > { %v3976_v50 = vadd.f32 %v5595_v60, %v7650_v36  ;;  %v5597_v8 = vadd.f32 %v5470_v31, %v8047_v61  ;;  %v3863_v62 = vpop.f32.mrb[27].mxu1  ;;  %v5928_v61 = vld [vmem:[%s6072_s16 + $0x10] sm:$0xff] }
 0x344   : > { %v3974_v26 = vadd.f32 %v5596_v18, %v7650_v36  ;;  %v5598_v11 = vadd.f32 %v3863_v62, %v8048_v42  ;;  %v5929_v42 = vld [vmem:[%s6072_s16] sm:$0xff] }
 0x345   : > { %v3977_v27 = vadd.f32 %v5597_v8, %v7650_v36  ;;  %v4012_v53 = vmax.f32 %v3976_v50, 0.0 }
 0x346   : > { %v3975_v56 = vadd.f32 %v5598_v11, %v7650_v36  ;;  %v4010_v35 = vmax.f32 %v3974_v26, 0.0 }
 0x347   : > { %v4013_v40 = vmax.f32 %v3977_v27, 0.0 }
 0x348   : > { %v4011_v29 = vmax.f32 %v3975_v56, 0.0  ;;  %v5473_v47 = vpop.f32.mrb[28].mxu1 }
 0x349   : > { %v5599_v59 = vadd.f32 %v5473_v47, %v8049_v43  ;;  %v3876_v23 = vpop.f32.mrb[29].mxu1  ;;  %v4035_v32 = vpack.c.bf16 %v4013_v40, %v4012_v53  ;;  %v5930_v53 = vld [vmem:[%s6072_s16 + $0x18] sm:$0xff] }
 0x34a   : > { %v5600_v0 = vadd.f32 %v3876_v23, %v8050_v24  ;;  %v5474_v1 = vpop.f32.mrb[30].mxu1  ;;  %v4034_v48 = vpack.c.bf16 %v4011_v29, %v4010_v35  ;;  %v5931_v29 = vld [vmem:[%s6072_s16 + $0x8] sm:$0xff] }
 0x34b   : > { %v3980_v58 = vadd.f32 %v5599_v59, %v7650_v36  ;;  %v5601_v45 = vadd.f32 %v5474_v1, %v8051_v2  ;;  %v3879_v6 = vpop.f32.mrb[31].mxu1 }
 0x34c   : > { %v3978_v17 = vadd.f32 %v5600_v0, %v7650_v36  ;;  %v5602_v3 = vadd.f32 %v3879_v6, %v8052_v14  ;;  %5519 = vmatprep.mubr.bf16.mxu0 %v4034_v48  ;;  %v5932_v48 = vld [vmem:[%s6072_s16 + $0x30] sm:$0xff]  ;;  %v5933_v6 = vld [vmem:[%s6072_s16 + $0x20] sm:$0xff] }
 0x34d   : > { %v3981_v44 = vadd.f32 %v5601_v45, %v7650_v36  ;;  %5520 = vmatmul.mubr.bf16.gmra.mrb[120].mxu0 %v4035_v32  ;;  %v4016_v15 = vmax.f32 %v3980_v58, 0.0 }
 0x34e   : > { %v3979_v51 = vadd.f32 %v5602_v3, %v7650_v36  ;;  %v4014_v9 = vmax.f32 %v3978_v17, 0.0 }
 0x34f   : > { %v4017_v38 = vmax.f32 %v3981_v44, 0.0  ;;  %v5934_v44 = vld [vmem:[%s6072_s16 + $0x38] sm:$0xff] }
 0x350   : > { %v4015_v34 = vmax.f32 %v3979_v51, 0.0  ;;  %v5477_v55 = vpop.f32.mrb[32].mxu1 }
 0x351   : > { %v5603_v28 = vadd.f32 %v5477_v55, %v8053_v21  ;;  %v3892_v33 = vpop.f32.mrb[33].mxu1  ;;  %v4037_v52 = vpack.c.bf16 %v4017_v38, %v4016_v15  ;;  %v5935_v38 = vld [vmem:[%s6072_s16 + $0x28] sm:$0xff] }
 0x352   : > { %v5604_v5 = vadd.f32 %v3892_v33, %v8054_v10  ;;  %v5478_v37 = vpop.f32.mrb[34].mxu1  ;;  %v4036_v54 = vpack.c.bf16 %v4015_v34, %v4014_v9 }
 0x353   : > { %v3984_v20 = vadd.f32 %v5603_v28, %v7650_v36  ;;  %v5605_v4 = vadd.f32 %v5478_v37, %v8055_v12  ;;  %v3895_v63 = vpop.f32.mrb[35].mxu1  ;;  %v5937_v12 = vld [vmem:[%s6072_s16 + $0x40] sm:$0xff] }
 0x354   : > { %v3982_v57 = vadd.f32 %v5604_v5, %v7650_v36  ;;  %v5606_v7 = vadd.f32 %v3895_v63, %v8056_v41  ;;  %5523 = vmatprep.mubr.bf16.mxu0 %v4036_v54  ;;  %v5936_v5 = vld [vmem:[%s6072_s16 + $0x50] sm:$0xff]  ;;  %v5938_v41 = vld [vmem:[%s6072_s16 + $0x58] sm:$0xff] }
 0x355   : > { %v3985_v19 = vadd.f32 %v5605_v4, %v7650_v36  ;;  %5524 = vmatmul.mubr.bf16.gmra.mrb[124].mxu0 %v4037_v52  ;;  %v4020_v46 = vmax.f32 %v3984_v20, 0.0 }
 0x356   : > { %v3983_v49 = vadd.f32 %v5606_v7, %v7650_v36  ;;  %v4018_v39 = vmax.f32 %v3982_v57, 0.0 }
 0x357   : > { %v4021_v16 = vmax.f32 %v3985_v19, 0.0 }
 0x358   : > { %v4019_v22 = vmax.f32 %v3983_v49, 0.0  ;;  %v5939_v49 = vld [vmem:[%s6072_s16 + $0x48] sm:$0xff] }
 0x359   : > { %v4039_v13 = vpack.c.bf16 %v4021_v16, %v4020_v46 }
 0x35a   : > { %v4038_v60 = vpack.c.bf16 %v4019_v22, %v4018_v39 }
 0x35c   : > { %5527 = vmatprep.mubr.bf16.mxu0 %v4038_v60 }
 0x35d   : > { %5528 = vmatmul.mubr.bf16.gmra.mrb[128].mxu0 %v4039_v13 }
 0x3da   : > { %v5497_v30 = vpop.f32.mrb[96].mxu0 }
 0x3db   : > { %v4154_v18 = vadd.f32 %v5497_v30, %v7742_v25  ;;  %v4145_v36 = vpop.f32.mrb[97].mxu0 }
 0x3dc   : > { %v4146_v31 = vadd.f32 %v7742_v25, %v4145_v36  ;;  %v5498_v50 = vpop.f32.mrb[98].mxu0  ;;  %v5940_v36 = vld [vmem:[%s6072_s16 + $0x70] sm:$0xff] }
 0x3dd   : > { %v4290_v8 = vadd.f32 %v5928_v61, %v4154_v18  ;;  %v4157_v62 = vadd.f32 %v5498_v50, %v7742_v25  ;;  %v4148_v26 = vpop.f32.mrb[99].mxu0 }
 0x3de   : > { %v4288_v11 = vadd.f32 %v5929_v42, %v4146_v31  ;;  %v4149_v27 = vadd.f32 %v7742_v25, %v4148_v26 }
 0x3df   : > { %v4326_v56 = vmax.f32 %v4290_v8, 0.0  ;;  %v4291_v40 = vadd.f32 %v5930_v53, %v4157_v62  ;;  %v5941_v8 = vld [vmem:[%s6072_s16 + $0x60] sm:$0xff]  ;;  %v5943_v53 = vld [vmem:[%s6072_s16 + $0x68] sm:$0xff] }
 0x3e0   : > { %v4324_v35 = vmax.f32 %v4288_v11, 0.0  ;;  %v4289_v47 = vadd.f32 %v5931_v29, %v4149_v27  ;;  %v5942_v11 = vld [vmem:[%s6072_s16 + $0x78] sm:$0xff] }
 0x3e1   : > { %4362 = vst.msk [vmem:[%s7753_s8 + $0x10] sm:$0xff] %vm8057_vm12, %v4326_v56  ;;  %v4327_v43 = vmax.f32 %v4291_v40, 0.0  ;;  %vm8073_vm12 = vmmov %vm8067_vm0 }
 0x3e2   : > { %4360 = vst.msk [vmem:[%s7753_s8] sm:$0xff] %vm8058_vm10, %v4324_v35  ;;  %v4325_v59 = vmax.f32 %v4289_v47, 0.0  ;;  %v5501_v23 = vpop.f32.mrb[100].mxu0  ;;  %vm8074_vm10 = vmmov %vm8067_vm0 }
 0x3e3   : > { %4363 = vst.msk [vmem:[%s7753_s8 + $0x18] sm:$0xff] %vm8059_vm6, %v4327_v43  ;;  %v4170_v32 = vadd.f32 %v5501_v23, %v7742_v25  ;;  %v4161_v24 = vpop.f32.mrb[101].mxu0  ;;  %vm8075_vm6 = vmmov %vm8067_vm0 }
 0x3e4   : > { %4361 = vst.msk [vmem:[%s7753_s8 + $0x8] sm:$0xff] %vm8060_vm9, %v4325_v59  ;;  %v4162_v0 = vadd.f32 %v7742_v25, %v4161_v24  ;;  %v5502_v1 = vpop.f32.mrb[102].mxu0  ;;  %v5944_v24 = vld [vmem:[%s6072_s16 + $0x90] sm:$0xff]  ;;  %vm8076_vm9 = vmmov %vm8067_vm0 }
 0x3e5   : > { %v4294_v58 = vadd.f32 %v5932_v48, %v4170_v32  ;;  %v4173_v2 = vadd.f32 %v5502_v1, %v7742_v25  ;;  %v4164_v45 = vpop.f32.mrb[103].mxu0 }
 0x3e6   : > { %v4292_v17 = vadd.f32 %v5933_v6, %v4162_v0  ;;  %v4165_v14 = vadd.f32 %v7742_v25, %v4164_v45 }
 0x3e7   : > { %v4330_v3 = vmax.f32 %v4294_v58, 0.0  ;;  %v4295_v51 = vadd.f32 %v5934_v44, %v4173_v2  ;;  %v5945_v58 = vld [vmem:[%s6072_s16 + $0x80] sm:$0xff]  ;;  %v5947_v44 = vld [vmem:[%s6072_s16 + $0x88] sm:$0xff] }
 0x3e8   : > { %v4328_v15 = vmax.f32 %v4292_v17, 0.0  ;;  %v4293_v9 = vadd.f32 %v5935_v38, %v4165_v14  ;;  %v5946_v17 = vld [vmem:[%s6072_s16 + $0x98] sm:$0xff] }
 0x3e9   : > { %4366 = vst.msk [vmem:[%s7753_s8 + $0x30] sm:$0xff] %vm8061_vm7, %v4330_v3  ;;  %v4331_v34 = vmax.f32 %v4295_v51, 0.0  ;;  %vm8077_vm7 = vmmov %vm8067_vm0 }
 0x3ea   : > { %4364 = vst.msk [vmem:[%s7753_s8 + $0x20] sm:$0xff] %vm8062_vm14, %v4328_v15  ;;  %v4329_v55 = vmax.f32 %v4293_v9, 0.0  ;;  %v5505_v21 = vpop.f32.mrb[104].mxu0  ;;  %vm8078_vm14 = vmmov %vm8067_vm0 }
 0x3eb   : > { %4367 = vst.msk [vmem:[%s7753_s8 + $0x38] sm:$0xff] %vm8063_vm3, %v4331_v34  ;;  %v4186_v28 = vadd.f32 %v5505_v21, %v7742_v25  ;;  %v4177_v33 = vpop.f32.mrb[105].mxu0  ;;  %vm8079_vm3 = vmmov %vm8067_vm0 }
 0x3ec   : > { %4365 = vst.msk [vmem:[%s7753_s8 + $0x28] sm:$0xff] %vm8064_vm1, %v4329_v55  ;;  %v4178_v52 = vadd.f32 %v7742_v25, %v4177_v33  ;;  %v5506_v10 = vpop.f32.mrb[106].mxu0  ;;  %v5948_v33 = vld [vmem:[%s6072_s16 + $0xb0] sm:$0xff]  ;;  %vm8080_vm1 = vmmov %vm8067_vm0 }
 0x3ed   : > { %v4298_v37 = vadd.f32 %v5936_v5, %v4186_v28  ;;  %v4189_v54 = vadd.f32 %v5506_v10, %v7742_v25  ;;  %v4180_v20 = vpop.f32.mrb[107].mxu0 }
 0x3ee   : > { %v4296_v4 = vadd.f32 %v5937_v12, %v4178_v52  ;;  %v4181_v63 = vadd.f32 %v7742_v25, %v4180_v20 }
 0x3ef   : > { %v4334_v57 = vmax.f32 %v4298_v37, 0.0  ;;  %v4299_v7 = vadd.f32 %v5938_v41, %v4189_v54  ;;  %v5949_v37 = vld [vmem:[%s6072_s16 + $0xa0] sm:$0xff]  ;;  %v5951_v41 = vld [vmem:[%s6072_s16 + $0xa8] sm:$0xff] }
 0x3f0   : > { %v4332_v19 = vmax.f32 %v4296_v4, 0.0  ;;  %v4297_v46 = vadd.f32 %v5939_v49, %v4181_v63  ;;  %v5950_v4 = vld [vmem:[%s6072_s16 + $0xb8] sm:$0xff] }
 0x3f1   : > { %4370 = vst.msk [vmem:[%s7753_s8 + $0x50] sm:$0xff] %vm8065_vm2, %v4334_v57  ;;  %v4335_v16 = vmax.f32 %v4299_v7, 0.0  ;;  %vm8081_vm2 = vmmov %vm8067_vm0 }
 0x3f2   : > { %4368 = vst.msk [vmem:[%s7753_s8 + $0x40] sm:$0xff] %vm8066_vm4, %v4332_v19  ;;  %v4333_v39 = vmax.f32 %v4297_v46, 0.0  ;;  %v5509_v22 = vpop.f32.mrb[108].mxu0  ;;  %vm8082_vm4 = vmmov %vm8067_vm0 }
 0x3f3   : > { %4371 = vst.msk [vmem:[%s7753_s8 + $0x58] sm:$0xff] %vm8067_vm0, %v4335_v16  ;;  %v4202_v13 = vadd.f32 %v5509_v22, %v7742_v25  ;;  %v4193_v60 = vpop.f32.mrb[109].mxu0 }
 0x3f4   : > { %4369 = vst.msk [vmem:[%s7753_s8 + $0x48] sm:$0xff] %vm8068_vm8, %v4333_v39  ;;  %v4194_v30 = vadd.f32 %v7742_v25, %v4193_v60  ;;  %v5510_v18 = vpop.f32.mrb[110].mxu0  ;;  %v5952_v60 = vld [vmem:[%s6072_s16 + $0xd0] sm:$0xff]  ;;  %vm8083_vm8 = vmmov %vm8067_vm0 }
 0x3f5   : > { %v4302_v31 = vadd.f32 %v5940_v36, %v4202_v13  ;;  %v4205_v50 = vadd.f32 %v5510_v18, %v7742_v25  ;;  %v4196_v61 = vpop.f32.mrb[111].mxu0 }
 0x3f6   : > { %v4300_v62 = vadd.f32 %v5941_v8, %v4194_v30  ;;  %v4197_v26 = vadd.f32 %v7742_v25, %v4196_v61 }
 0x3f7   : > { %v4338_v42 = vmax.f32 %v4302_v31, 0.0  ;;  %v4303_v27 = vadd.f32 %v5942_v11, %v4205_v50  ;;  %v5953_v31 = vld [vmem:[%s6072_s16 + $0xc0] sm:$0xff]  ;;  %v5955_v11 = vld [vmem:[%s6072_s16 + $0xc8] sm:$0xff] }
 0x3f8   : > { %v4336_v56 = vmax.f32 %v4300_v62, 0.0  ;;  %v4301_v40 = vadd.f32 %v5943_v53, %v4197_v26  ;;  %v5954_v62 = vld [vmem:[%s6072_s16 + $0xd8] sm:$0xff] }
 0x3f9   : > { %4374 = vst.msk [vmem:[%s7753_s8 + $0x70] sm:$0xff] %vm8069_vm5, %v4338_v42  ;;  %v4339_v35 = vmax.f32 %v4303_v27, 0.0  ;;  %vm8084_vm5 = vmmov %vm8067_vm0 }
 0x3fa   : > { %4372 = vst.msk [vmem:[%s7753_s8 + $0x60] sm:$0xff] %vm8070_vm15, %v4336_v56  ;;  %v4337_v29 = vmax.f32 %v4301_v40, 0.0  ;;  %v5513_v47 = vpop.f32.mrb[112].mxu0  ;;  %vm8085_vm15 = vmmov %vm8067_vm0 }
 0x3fb   : > { %4375 = vst.msk [vmem:[%s7753_s8 + $0x78] sm:$0xff] %vm8071_vm11, %v4339_v35  ;;  %v4218_v43 = vadd.f32 %v5513_v47, %v7742_v25  ;;  %v4209_v59 = vpop.f32.mrb[113].mxu0  ;;  %vm8086_vm11 = vmmov %vm8067_vm0 }
 0x3fc   : > { %4373 = vst.msk [vmem:[%s7753_s8 + $0x68] sm:$0xff] %vm8072_vm13, %v4337_v29  ;;  %v4210_v23 = vadd.f32 %v7742_v25, %v4209_v59  ;;  %v5514_v32 = vpop.f32.mrb[114].mxu0  ;;  %v5956_v59 = vld [vmem:[%s6072_s16 + $0xf0] sm:$0xff]  ;;  %vm8087_vm13 = vmmov %vm8067_vm0 }
 0x3fd   : > { %v4306_v0 = vadd.f32 %v5944_v24, %v4218_v43  ;;  %v4221_v1 = vadd.f32 %v5514_v32, %v7742_v25  ;;  %v4212_v48 = vpop.f32.mrb[115].mxu0 }
 0x3fe   : > { %v4304_v2 = vadd.f32 %v5945_v58, %v4210_v23  ;;  %v4213_v45 = vadd.f32 %v7742_v25, %v4212_v48 }
 0x3ff   : > { %v4342_v6 = vmax.f32 %v4306_v0, 0.0  ;;  %v4307_v14 = vadd.f32 %v5946_v17, %v4221_v1  ;;  %v5957_v0 = vld [vmem:[%s6072_s16 + $0xe0] sm:$0xff]  ;;  %v5959_v17 = vld [vmem:[%s6072_s16 + $0xe8] sm:$0xff] }
 0x400   : > { %v4340_v3 = vmax.f32 %v4304_v2, 0.0  ;;  %v4305_v51 = vadd.f32 %v5947_v44, %v4213_v45  ;;  %v5958_v2 = vld [vmem:[%s6072_s16 + $0xf8] sm:$0xff] }
 0x401   : > { %4378 = vst.msk [vmem:[%s7753_s8 + $0x90] sm:$0xff] %vm8073_vm12, %v4342_v6  ;;  %v4343_v15 = vmax.f32 %v4307_v14, 0.0  ;;  %vm8088_vm12 = vmmov %vm8067_vm0 }
 0x402   : > { %4376 = vst.msk [vmem:[%s7753_s8 + $0x80] sm:$0xff] %vm8074_vm10, %v4340_v3  ;;  %v4341_v38 = vmax.f32 %v4305_v51, 0.0  ;;  %v5517_v9 = vpop.f32.mrb[116].mxu0  ;;  %vm8089_vm10 = vmmov %vm8067_vm0 }
 0x403   : > { %4379 = vst.msk [vmem:[%s7753_s8 + $0x98] sm:$0xff] %vm8075_vm6, %v4343_v15  ;;  %v4234_v34 = vadd.f32 %v5517_v9, %v7742_v25  ;;  %v4225_v55 = vpop.f32.mrb[117].mxu0  ;;  %vm8090_vm6 = vmmov %vm8067_vm0 }
 0x404   : > { %4377 = vst.msk [vmem:[%s7753_s8 + $0x88] sm:$0xff] %vm8076_vm9, %v4341_v38  ;;  %v4226_v21 = vadd.f32 %v7742_v25, %v4225_v55  ;;  %v5518_v28 = vpop.f32.mrb[118].mxu0  ;;  %v5960_v55 = vld [vmem:[%s6072_s16 + $0x110] sm:$0xff]  ;;  %vm8091_vm9 = vmmov %vm8067_vm0 }
 0x405   : > { %v4310_v52 = vadd.f32 %v5948_v33, %v4234_v34  ;;  %v4237_v10 = vadd.f32 %v5518_v28, %v7742_v25  ;;  %v4228_v5 = vpop.f32.mrb[119].mxu0 }
 0x406   : > { %v4308_v54 = vadd.f32 %v5949_v37, %v4226_v21  ;;  %v4229_v20 = vadd.f32 %v7742_v25, %v4228_v5 }
 0x407   : > { %v4346_v12 = vmax.f32 %v4310_v52, 0.0  ;;  %v4311_v63 = vadd.f32 %v5950_v4, %v4237_v10  ;;  %v5961_v52 = vld [vmem:[%s6072_s16 + $0x100] sm:$0xff]  ;;  %v5963_v4 = vld [vmem:[%s6072_s16 + $0x108] sm:$0xff] }
 0x408   : > { %v4344_v57 = vmax.f32 %v4308_v54, 0.0  ;;  %v4309_v7 = vadd.f32 %v5951_v41, %v4229_v20  ;;  %v5962_v54 = vld [vmem:[%s6072_s16 + $0x118] sm:$0xff] }
 0x409   : > { %4382 = vst.msk [vmem:[%s7753_s8 + $0xb0] sm:$0xff] %vm8077_vm7, %v4346_v12  ;;  %v4347_v19 = vmax.f32 %v4311_v63, 0.0 }
 0x40a   : > { %4380 = vst.msk [vmem:[%s7753_s8 + $0xa0] sm:$0xff] %vm8078_vm14, %v4344_v57  ;;  %v4345_v49 = vmax.f32 %v4309_v7, 0.0 }
 0x40b   : > { %4383 = vst.msk [vmem:[%s7753_s8 + $0xb8] sm:$0xff] %vm8079_vm3, %v4347_v19 }
 0x40c   : > { %4381 = vst.msk [vmem:[%s7753_s8 + $0xa8] sm:$0xff] %vm8080_vm1, %v4345_v49 }
 0x420   : > { %v5521_v46 = vpop.f32.mrb[120].mxu0 }
 0x421   : > { %v4250_v16 = vadd.f32 %v5521_v46, %v7742_v25  ;;  %v4241_v39 = vpop.f32.mrb[121].mxu0 }
 0x422   : > { %v4242_v22 = vadd.f32 %v7742_v25, %v4241_v39  ;;  %v5522_v13 = vpop.f32.mrb[122].mxu0 }
 0x423   : > { %v4314_v30 = vadd.f32 %v5952_v60, %v4250_v16  ;;  %v4253_v18 = vadd.f32 %v5522_v13, %v7742_v25  ;;  %v4244_v36 = vpop.f32.mrb[123].mxu0 }
 0x424   : > { %v4312_v50 = vadd.f32 %v5953_v31, %v4242_v22  ;;  %v4245_v61 = vadd.f32 %v7742_v25, %v4244_v36 }
 0x425   : > { %v4350_v8 = vmax.f32 %v4314_v30, 0.0  ;;  %v4315_v26 = vadd.f32 %v5954_v62, %v4253_v18 }
 0x426   : > { %v4348_v42 = vmax.f32 %v4312_v50, 0.0  ;;  %v4313_v27 = vadd.f32 %v5955_v11, %v4245_v61 }
 0x427   : > { %4386 = vst.msk [vmem:[%s7753_s8 + $0xd0] sm:$0xff] %vm8081_vm2, %v4350_v8  ;;  %v4351_v56 = vmax.f32 %v4315_v26, 0.0 }
 0x428   : > { %4384 = vst.msk [vmem:[%s7753_s8 + $0xc0] sm:$0xff] %vm8082_vm4, %v4348_v42  ;;  %v4349_v53 = vmax.f32 %v4313_v27, 0.0  ;;  %v5525_v40 = vpop.f32.mrb[124].mxu0 }
 0x429   : > { %4387 = vst.msk [vmem:[%s7753_s8 + $0xd8] sm:$0xff] %vm8067_vm0, %v4351_v56  ;;  %v4266_v35 = vadd.f32 %v5525_v40, %v7742_v25  ;;  %v4257_v29 = vpop.f32.mrb[125].mxu0 }
 0x42a   : > { %4385 = vst.msk [vmem:[%s7753_s8 + $0xc8] sm:$0xff] %vm8083_vm8, %v4349_v53  ;;  %v4258_v47 = vadd.f32 %v7742_v25, %v4257_v29  ;;  %v5526_v43 = vpop.f32.mrb[126].mxu0 }
 0x42b   : > { %v4318_v23 = vadd.f32 %v5956_v59, %v4266_v35  ;;  %v4269_v32 = vadd.f32 %v5526_v43, %v7742_v25  ;;  %v4260_v24 = vpop.f32.mrb[127].mxu0 }
 0x42c   : > { %v4316_v1 = vadd.f32 %v5957_v0, %v4258_v47  ;;  %v4261_v48 = vadd.f32 %v7742_v25, %v4260_v24 }
 0x42d   : > { %v4354_v58 = vmax.f32 %v4318_v23, 0.0  ;;  %v4319_v45 = vadd.f32 %v5958_v2, %v4269_v32 }
 0x42e   : > { %v4352_v6 = vmax.f32 %v4316_v1, 0.0  ;;  %v4317_v14 = vadd.f32 %v5959_v17, %v4261_v48 }
 0x42f   : > { %4390 = vst.msk [vmem:[%s7753_s8 + $0xf0] sm:$0xff] %vm8084_vm5, %v4354_v58  ;;  %v4355_v3 = vmax.f32 %v4319_v45, 0.0 }
 0x430   : > { %4388 = vst.msk [vmem:[%s7753_s8 + $0xe0] sm:$0xff] %vm8085_vm15, %v4352_v6  ;;  %v4353_v44 = vmax.f32 %v4317_v14, 0.0  ;;  %v5529_v51 = vpop.f32.mrb[128].mxu0 }
 0x431   : > { %4391 = vst.msk [vmem:[%s7753_s8 + $0xf8] sm:$0xff] %vm8086_vm11, %v4355_v3  ;;  %v4282_v15 = vadd.f32 %v5529_v51, %v7742_v25  ;;  %v4273_v38 = vpop.f32.mrb[129].mxu0 }
 0x432   : > { %4389 = vst.msk [vmem:[%s7753_s8 + $0xe8] sm:$0xff] %vm8087_vm13, %v4353_v44  ;;  %v4274_v9 = vadd.f32 %v7742_v25, %v4273_v38  ;;  %v5530_v34 = vpop.f32.mrb[130].mxu0 }
 0x433   : > { %v4322_v21 = vadd.f32 %v5960_v55, %v4282_v15  ;;  %v4285_v28 = vadd.f32 %v5530_v34, %v7742_v25  ;;  %v4276_v33 = vpop.f32.mrb[131].mxu0 }
 0x434   : > { %v4320_v10 = vadd.f32 %v5961_v52, %v4274_v9  ;;  %v4277_v5 = vadd.f32 %v7742_v25, %v4276_v33 }
 0x435   : > { %v4358_v37 = vmax.f32 %v4322_v21, 0.0  ;;  %v4323_v20 = vadd.f32 %v5962_v54, %v4285_v28 }
 0x436   : > { %v4356_v12 = vmax.f32 %v4320_v10, 0.0  ;;  %v4321_v63 = vadd.f32 %v5963_v4, %v4277_v5 }
 0x437   : > { %4394 = vst.msk [vmem:[%s7753_s8 + $0x110] sm:$0xff] %vm8088_vm12, %v4358_v37  ;;  %v4359_v57 = vmax.f32 %v4323_v20, 0.0 }
 0x438   : > { %4392 = vst.msk [vmem:[%s7753_s8 + $0x100] sm:$0xff] %vm8089_vm10, %v4356_v12  ;;  %v4357_v41 = vmax.f32 %v4321_v63, 0.0 }
 0x439   : > { %4395 = vst.msk [vmem:[%s7753_s8 + $0x118] sm:$0xff] %vm8090_vm6, %v4359_v57 }
 0x43a   : > { %4393 = vst.msk [vmem:[%s7753_s8 + $0x108] sm:$0xff] %vm8091_vm9, %v4357_v41 }
 0x43b PF: > { %s17_s24 = sadd.s32 1, %s5997_s24  }
 0x43c   : > { %p14_p4 = scmp.ge.s32.totalorder %s17_s24, 4  }
 0x43e   :  { %16 = sbr.rel (!%p14_p4) target bundleno = 1 (0x1), region = 86 }

</bundles_post_ra>
